<compile_context>
chip_gen: v5e
topology: v5e:2x2
jax: 0.10.0
libtpu: 0.0.40
codegen_flags: <defaults>
</compile_context>

<pallas_src>
from functools import partial

import jax
import jax.numpy as jnp
from jax import lax
from jax.experimental import pallas as pl
from jax.experimental.pallas import tpu as pltpu


# ----------------------------- Fused kernel ----------------------------------
def _fused_kernel(w1_ref, b1_ref, w2_ref, b2_ref,      # SMEM scalar params
                  x_ref, y_ref, shn_ref, swn_ref,      # VMEM blocks
                  o_ref, *, eps, tb, H, W, cmid):
    f32 = jnp.float32

    # ---- Guided map: g = sum_o w2[o] * relu(w1[o,:]·x + b1[o]) + b2 ---------
    # Per-pixel channel mixing on the VPU (scalar weights read from SMEM);
    # avoids any (3,HW)<->(H,W) relayout and keeps the MXU for the box filter.
    x = x_ref[...]                                       # (tb, 3, H, W)
    x0, x1, x2 = x[:, 0], x[:, 1], x[:, 2]               # (tb, H, W) each
    g = jnp.zeros((tb, H, W), f32)
    for o in range(cmid):                                # static unroll (64)
        h = (w1_ref[3 * o + 0] * x0
             + w1_ref[3 * o + 1] * x1
             + w1_ref[3 * o + 2] * x2
             + b1_ref[o])
        g = g + w2_ref[o] * jnp.maximum(h, 0.0)
    g = g + b2_ref[0]

    y = y_ref[...]                                       # (tb, H, W)
    shn = shn_ref[...]                                   # (H, H) resident
    swn = swn_ref[...]                                   # (W, W) resident

    def box(v):
        # Normalized box filter: SHn @ v[i] @ SWn for every slab of the stack.
        nb = v.shape[0]
        if H % 8 == 0:
            # Merge the whole stack into one lane-contraction matmul.
            t = jnp.dot(v.reshape(nb * H, W), swn, preferred_element_type=f32)
            t = t.reshape(nb, H, W)
        else:
            t = jnp.concatenate(
                [jnp.dot(v[i], swn, preferred_element_type=f32)[None]
                 for i in range(nb)], axis=0)
        # H-contraction: per-slab 2-D dots against the resident SHn.
        return jnp.concatenate(
            [jnp.dot(shn, t[i], preferred_element_type=f32)[None]
             for i in range(nb)], axis=0)

    # ---- Guided filter (all box outputs are already mean-normalized) --------
    m = box(jnp.concatenate([g, y, g * y, g * g], axis=0))     # (4*tb, H, W)
    mean_x = m[0 * tb:1 * tb]
    mean_y = m[1 * tb:2 * tb]
    cov_xy = m[2 * tb:3 * tb] - mean_x * mean_y
    var_x = m[3 * tb:4 * tb] - mean_x * mean_x
    # approx=True (~2e-4 rel err) would break the 1e-4 check; keep exact.
    A = cov_xy * pl.reciprocal(var_x + eps, approx=False)
    b = mean_y - A * mean_x

    mab = box(jnp.concatenate([A, b], axis=0))                  # (2*tb, H, W)
    o_ref[...] = mab[:tb] * g + mab[tb:]


# ----------------------------- Helpers & wrapper ------------------------------
def _band(n, r):
    i = jnp.arange(n)
    return (jnp.abs(i[:, None] - i[None, :]) <= r).astype(jnp.float32)


def _pick_tb(N, H, W, budget_bytes):
    # ~24 live f32 (H,W) planes per image inside the fused kernel (x, y, g,
    # stacked stats, box temporaries, A/b, output, double-buffered inputs).
    per_image = 24 * H * W * 4
    cap = max(1, budget_bytes // per_image)
    if N >= 2:
        cap = min(cap, max(1, N // 2))   # >= 2 grid steps -> both v7x TCs busy
    cap = min(cap, N, 8)
    tb = 1
    for d in range(1, int(cap) + 1):     # largest divisor of N within the cap
        if N % d == 0:
            tb = d
    return tb


def saliency_guided_filter(x, guide, w1, b1, w2, b2, r, eps):
    # x: (N, 3, H, W);  guide: (N, 1, H, W)
    # w1: (64, 3), b1: (64,), w2: (64,), b2: (1,)
    N, C, H, W = x.shape
    cmid = w1.shape[0]

    y = guide[:, 0, :, :]                                          # (N, H, W)

    # Band matrices with the box count folded in (separable normalization):
    # box(v)/Ncnt == (SH/nh[:,None]) @ v @ (SW/nw[None,:]).
    SH = _band(H, r)
    SW = _band(W, r)
    SHn = SH / jnp.sum(SH, axis=1, keepdims=True)
    SWn = SW / jnp.sum(SW, axis=0, keepdims=True)

    # Flattened f32 parameters -> SMEM scalars inside the kernel.
    w1f = jnp.asarray(w1, jnp.float32).reshape(-1)                 # (3*cmid,)
    b1f = jnp.asarray(b1, jnp.float32).reshape(-1)                 # (cmid,)
    w2f = jnp.asarray(w2, jnp.float32).reshape(-1)                 # (cmid,)
    b2f = jnp.asarray(b2, jnp.float32).reshape(-1)                 # (1,)

    # 48 MiB scoped VMEM works on every generation (v7x: 64 MiB physical;
    # v5e/v6e could raise to ~96 MiB for even bigger tb on large images).
    vmem_limit = 48 * 1024 * 1024
    tb = _pick_tb(N, H, W, vmem_limit // 2)

    kern = partial(_fused_kernel, eps=float(eps), tb=tb, H=H, W=W, cmid=cmid)
    out = pl.pallas_call(
        kern,
        out_shape=jax.ShapeDtypeStruct((N, H, W), jnp.float32),
        grid=(N // tb,),
        in_specs=[
            pl.BlockSpec(memory_space=pltpu.MemorySpace.SMEM),     # w1 flat
            pl.BlockSpec(memory_space=pltpu.MemorySpace.SMEM),     # b1
            pl.BlockSpec(memory_space=pltpu.MemorySpace.SMEM),     # w2
            pl.BlockSpec(memory_space=pltpu.MemorySpace.SMEM),     # b2
            pl.BlockSpec((tb, C, H, W), lambda n: (n, 0, 0, 0)),   # x
            pl.BlockSpec((tb, H, W), lambda n: (n, 0, 0)),         # guide
            pl.BlockSpec((H, H), lambda n: (0, 0)),                # SHn resident
            pl.BlockSpec((W, W), lambda n: (0, 0)),                # SWn resident
        ],
        out_specs=pl.BlockSpec((tb, H, W), lambda n: (n, 0, 0)),
        compiler_params=pltpu.CompilerParams(
            dimension_semantics=("parallel",),
            vmem_limit_bytes=vmem_limit,
        ),
    )(w1f, b1f, w2f, b2f, x, y, SHn, SWn)
    return out[:, None, :, :]                                      # (N, 1, H, W)


# ----------------------------- Pure-JAX reference ----------------------------
def reference(x, guide, w1, b1, w2, b2, r, eps):
    h = jnp.einsum('oc,nchw->nohw', w1, x) + b1.reshape(1, -1, 1, 1)
    h = jnp.maximum(h, 0.0)
    g = jnp.einsum('o,nohw->nhw', w2, h) + b2.reshape(1, 1, 1)
    y = guide[:, 0]

    def box(v):
        return lax.reduce_window(v, 0.0, lax.add,
                                 (1, 2 * r + 1, 2 * r + 1), (1, 1, 1), "SAME")

    Ncnt = box(jnp.ones_like(g))
    mean_x = box(g) / Ncnt
    mean_y = box(y) / Ncnt
    cov_xy = box(g * y) / Ncnt - mean_x * mean_y
    var_x = box(g * g) / Ncnt - mean_x * mean_x
    A = cov_xy / (var_x + eps)
    b = mean_y - A * mean_x
    mean_A = box(A) / Ncnt
    mean_b = box(b) / Ncnt
    return (mean_A * g + mean_b)[:, None]


if __name__ == "__main__":
    key = jax.random.PRNGKey(0)
    k1, k2, k3, k4, k5, k6 = jax.random.split(key, 6)

    N, H, W = 2, 16, 16
    r, eps = 2, 1e-2

    x = jax.random.normal(k1, (N, 3, H, W), jnp.float32)
    guide = jax.random.uniform(k2, (N, 1, H, W), jnp.float32)

    # Deterministic synthetic parameters for Conv2d(3,64,1) and Conv2d(64,1,1).
    w1 = jax.random.normal(k3, (64, 3), jnp.float32) * 0.1
    b1 = jax.random.normal(k4, (64,), jnp.float32) * 0.1
    w2 = jax.random.normal(k5, (64,), jnp.float32) * 0.1
    b2 = jax.random.normal(k6, (1,), jnp.float32) * 0.1

    out = saliency_guided_filter(x, guide, w1, b1, w2, b2, r, eps)
    out = jax.block_until_ready(out)

    ref = reference(x, guide, w1, b1, w2, b2, r, eps)
    assert out.shape == (N, 1, H, W)
    assert jnp.allclose(out, ref, rtol=1e-4, atol=1e-4), float(jnp.max(jnp.abs(out - ref)))
    print("KERNEL_OK")
</pallas_src>

<mosaic_0001>
module attributes {stable_mosaic.version = 11 : i64} {
  func.func @_fused_kernel(%arg0: i32, %arg1: memref<192xf32, #tpu.memory_space<smem>>, %arg2: memref<64xf32, #tpu.memory_space<smem>>, %arg3: memref<64xf32, #tpu.memory_space<smem>>, %arg4: memref<1xf32, #tpu.memory_space<smem>>, %arg5: memref<1x3x16x16xf32, #tpu.memory_space<vmem>>, %arg6: memref<1x16x16xf32, #tpu.memory_space<vmem>>, %arg7: memref<16x16xf32, #tpu.memory_space<vmem>>, %arg8: memref<16x16xf32, #tpu.memory_space<vmem>>, %arg9: memref<1x16x16xf32, #tpu.memory_space<vmem>>) attributes {dimension_semantics = [#tpu.dimension_semantics<parallel>], iteration_bounds = array<i64: 2>, scalar_prefetch = 0 : i64, scratch_operands = 0 : i64, tpu.core_type = #tpu.core_type<tc>, window_params = [{transform_indices = @transform_0, window_bounds = array<i64: 192>}, {transform_indices = @transform_1, window_bounds = array<i64: 64>}, {transform_indices = @transform_2, window_bounds = array<i64: 64>}, {transform_indices = @transform_3, window_bounds = array<i64: 1>}, {transform_indices = @transform_4, window_bounds = array<i64: 1, 3, 16, 16>}, {transform_indices = @transform_5, window_bounds = array<i64: 1, 16, 16>}, {pipeline_mode = #tpu.pipeline_mode<synchronous>, transform_indices = @transform_6, window_bounds = array<i64: 16, 16>}, {pipeline_mode = #tpu.pipeline_mode<synchronous>, transform_indices = @transform_7, window_bounds = array<i64: 16, 16>}, {transform_indices = @transform_8, window_bounds = array<i64: 1, 16, 16>}]} {
    %c0 = arith.constant 0 : index
    %c0_0 = arith.constant 0 : index
    %c0_1 = arith.constant 0 : index
    %c0_2 = arith.constant 0 : index
    %0 = vector.load %arg5[%c0, %c0_0, %c0_1, %c0_2] : memref<1x3x16x16xf32, #tpu.memory_space<vmem>>, vector<1x3x16x16xf32>
    %1 = vector.extract_strided_slice %0 {offsets = [0, 0, 0, 0], sizes = [1, 1, 16, 16], strides = [1, 1, 1, 1]} : vector<1x3x16x16xf32> to vector<1x1x16x16xf32>
    %2 = vector.shape_cast %1 : vector<1x1x16x16xf32> to vector<1x16x16xf32>
    %3 = vector.extract_strided_slice %0 {offsets = [0, 1, 0, 0], sizes = [1, 1, 16, 16], strides = [1, 1, 1, 1]} : vector<1x3x16x16xf32> to vector<1x1x16x16xf32>
    %4 = vector.shape_cast %3 : vector<1x1x16x16xf32> to vector<1x16x16xf32>
    %5 = vector.extract_strided_slice %0 {offsets = [0, 2, 0, 0], sizes = [1, 1, 16, 16], strides = [1, 1, 1, 1]} : vector<1x3x16x16xf32> to vector<1x1x16x16xf32>
    %6 = vector.shape_cast %5 : vector<1x1x16x16xf32> to vector<1x16x16xf32>
    %cst = arith.constant 0.000000e+00 : f32
    %7 = vector.broadcast %cst : f32 to vector<1x16x16xf32>
    %c0_3 = arith.constant 0 : index
    %8 = memref.load %arg1[%c0_3] : memref<192xf32, #tpu.memory_space<smem>>
    %9 = vector.broadcast %8 : f32 to vector<1x16x16xf32>
    %10 = arith.mulf %9, %2 : vector<1x16x16xf32>
    %c1 = arith.constant 1 : index
    %11 = memref.load %arg1[%c1] : memref<192xf32, #tpu.memory_space<smem>>
    %12 = vector.broadcast %11 : f32 to vector<1x16x16xf32>
    %13 = arith.mulf %12, %4 : vector<1x16x16xf32>
    %14 = arith.addf %10, %13 : vector<1x16x16xf32>
    %c2 = arith.constant 2 : index
    %15 = memref.load %arg1[%c2] : memref<192xf32, #tpu.memory_space<smem>>
    %16 = vector.broadcast %15 : f32 to vector<1x16x16xf32>
    %17 = arith.mulf %16, %6 : vector<1x16x16xf32>
    %18 = arith.addf %14, %17 : vector<1x16x16xf32>
    %c0_4 = arith.constant 0 : index
    %19 = memref.load %arg2[%c0_4] : memref<64xf32, #tpu.memory_space<smem>>
    %20 = vector.broadcast %19 : f32 to vector<1x16x16xf32>
    %21 = arith.addf %18, %20 : vector<1x16x16xf32>
    %c0_5 = arith.constant 0 : index
    %22 = memref.load %arg3[%c0_5] : memref<64xf32, #tpu.memory_space<smem>>
    %cst_6 = arith.constant 0.000000e+00 : f32
    %23 = vector.broadcast %cst_6 : f32 to vector<1x16x16xf32>
    %24 = arith.maximumf %21, %23 : vector<1x16x16xf32>
    %25 = vector.broadcast %22 : f32 to vector<1x16x16xf32>
    %26 = arith.mulf %25, %24 : vector<1x16x16xf32>
    %27 = arith.addf %7, %26 : vector<1x16x16xf32>
    %c3 = arith.constant 3 : index
    %28 = memref.load %arg1[%c3] : memref<192xf32, #tpu.memory_space<smem>>
    %29 = vector.broadcast %28 : f32 to vector<1x16x16xf32>
    %30 = arith.mulf %29, %2 : vector<1x16x16xf32>
    %c4 = arith.constant 4 : index
    %31 = memref.load %arg1[%c4] : memref<192xf32, #tpu.memory_space<smem>>
    %32 = vector.broadcast %31 : f32 to vector<1x16x16xf32>
    %33 = arith.mulf %32, %4 : vector<1x16x16xf32>
    %34 = arith.addf %30, %33 : vector<1x16x16xf32>
    %c5 = arith.constant 5 : index
    %35 = memref.load %arg1[%c5] : memref<192xf32, #tpu.memory_space<smem>>
    %36 = vector.broadcast %35 : f32 to vector<1x16x16xf32>
    %37 = arith.mulf %36, %6 : vector<1x16x16xf32>
    %38 = arith.addf %34, %37 : vector<1x16x16xf32>
    %c1_7 = arith.constant 1 : index
    %39 = memref.load %arg2[%c1_7] : memref<64xf32, #tpu.memory_space<smem>>
    %40 = vector.broadcast %39 : f32 to vector<1x16x16xf32>
    %41 = arith.addf %38, %40 : vector<1x16x16xf32>
    %c1_8 = arith.constant 1 : index
    %42 = memref.load %arg3[%c1_8] : memref<64xf32, #tpu.memory_space<smem>>
    %cst_9 = arith.constant 0.000000e+00 : f32
    %43 = vector.broadcast %cst_9 : f32 to vector<1x16x16xf32>
    %44 = arith.maximumf %41, %43 : vector<1x16x16xf32>
    %45 = vector.broadcast %42 : f32 to vector<1x16x16xf32>
    %46 = arith.mulf %45, %44 : vector<1x16x16xf32>
    %47 = arith.addf %27, %46 : vector<1x16x16xf32>
    %c6 = arith.constant 6 : index
    %48 = memref.load %arg1[%c6] : memref<192xf32, #tpu.memory_space<smem>>
    %49 = vector.broadcast %48 : f32 to vector<1x16x16xf32>
    %50 = arith.mulf %49, %2 : vector<1x16x16xf32>
    %c7 = arith.constant 7 : index
    %51 = memref.load %arg1[%c7] : memref<192xf32, #tpu.memory_space<smem>>
    %52 = vector.broadcast %51 : f32 to vector<1x16x16xf32>
    %53 = arith.mulf %52, %4 : vector<1x16x16xf32>
    %54 = arith.addf %50, %53 : vector<1x16x16xf32>
    %c8 = arith.constant 8 : index
    %55 = memref.load %arg1[%c8] : memref<192xf32, #tpu.memory_space<smem>>
    %56 = vector.broadcast %55 : f32 to vector<1x16x16xf32>
    %57 = arith.mulf %56, %6 : vector<1x16x16xf32>
    %58 = arith.addf %54, %57 : vector<1x16x16xf32>
    %c2_10 = arith.constant 2 : index
    %59 = memref.load %arg2[%c2_10] : memref<64xf32, #tpu.memory_space<smem>>
    %60 = vector.broadcast %59 : f32 to vector<1x16x16xf32>
    %61 = arith.addf %58, %60 : vector<1x16x16xf32>
    %c2_11 = arith.constant 2 : index
    %62 = memref.load %arg3[%c2_11] : memref<64xf32, #tpu.memory_space<smem>>
    %cst_12 = arith.constant 0.000000e+00 : f32
    %63 = vector.broadcast %cst_12 : f32 to vector<1x16x16xf32>
    %64 = arith.maximumf %61, %63 : vector<1x16x16xf32>
    %65 = vector.broadcast %62 : f32 to vector<1x16x16xf32>
    %66 = arith.mulf %65, %64 : vector<1x16x16xf32>
    %67 = arith.addf %47, %66 : vector<1x16x16xf32>
    %c9 = arith.constant 9 : index
    %68 = memref.load %arg1[%c9] : memref<192xf32, #tpu.memory_space<smem>>
    %69 = vector.broadcast %68 : f32 to vector<1x16x16xf32>
    %70 = arith.mulf %69, %2 : vector<1x16x16xf32>
    %c10 = arith.constant 10 : index
    %71 = memref.load %arg1[%c10] : memref<192xf32, #tpu.memory_space<smem>>
    %72 = vector.broadcast %71 : f32 to vector<1x16x16xf32>
    %73 = arith.mulf %72, %4 : vector<1x16x16xf32>
    %74 = arith.addf %70, %73 : vector<1x16x16xf32>
    %c11 = arith.constant 11 : index
    %75 = memref.load %arg1[%c11] : memref<192xf32, #tpu.memory_space<smem>>
    %76 = vector.broadcast %75 : f32 to vector<1x16x16xf32>
    %77 = arith.mulf %76, %6 : vector<1x16x16xf32>
    %78 = arith.addf %74, %77 : vector<1x16x16xf32>
    %c3_13 = arith.constant 3 : index
    %79 = memref.load %arg2[%c3_13] : memref<64xf32, #tpu.memory_space<smem>>
    %80 = vector.broadcast %79 : f32 to vector<1x16x16xf32>
    %81 = arith.addf %78, %80 : vector<1x16x16xf32>
    %c3_14 = arith.constant 3 : index
    %82 = memref.load %arg3[%c3_14] : memref<64xf32, #tpu.memory_space<smem>>
    %cst_15 = arith.constant 0.000000e+00 : f32
    %83 = vector.broadcast %cst_15 : f32 to vector<1x16x16xf32>
    %84 = arith.maximumf %81, %83 : vector<1x16x16xf32>
    %85 = vector.broadcast %82 : f32 to vector<1x16x16xf32>
    %86 = arith.mulf %85, %84 : vector<1x16x16xf32>
    %87 = arith.addf %67, %86 : vector<1x16x16xf32>
    %c12 = arith.constant 12 : index
    %88 = memref.load %arg1[%c12] : memref<192xf32, #tpu.memory_space<smem>>
    %89 = vector.broadcast %88 : f32 to vector<1x16x16xf32>
    %90 = arith.mulf %89, %2 : vector<1x16x16xf32>
    %c13 = arith.constant 13 : index
    %91 = memref.load %arg1[%c13] : memref<192xf32, #tpu.memory_space<smem>>
    %92 = vector.broadcast %91 : f32 to vector<1x16x16xf32>
    %93 = arith.mulf %92, %4 : vector<1x16x16xf32>
    %94 = arith.addf %90, %93 : vector<1x16x16xf32>
    %c14 = arith.constant 14 : index
    %95 = memref.load %arg1[%c14] : memref<192xf32, #tpu.memory_space<smem>>
    %96 = vector.broadcast %95 : f32 to vector<1x16x16xf32>
    %97 = arith.mulf %96, %6 : vector<1x16x16xf32>
    %98 = arith.addf %94, %97 : vector<1x16x16xf32>
    %c4_16 = arith.constant 4 : index
    %99 = memref.load %arg2[%c4_16] : memref<64xf32, #tpu.memory_space<smem>>
    %100 = vector.broadcast %99 : f32 to vector<1x16x16xf32>
    %101 = arith.addf %98, %100 : vector<1x16x16xf32>
    %c4_17 = arith.constant 4 : index
    %102 = memref.load %arg3[%c4_17] : memref<64xf32, #tpu.memory_space<smem>>
    %cst_18 = arith.constant 0.000000e+00 : f32
    %103 = vector.broadcast %cst_18 : f32 to vector<1x16x16xf32>
    %104 = arith.maximumf %101, %103 : vector<1x16x16xf32>
    %105 = vector.broadcast %102 : f32 to vector<1x16x16xf32>
    %106 = arith.mulf %105, %104 : vector<1x16x16xf32>
    %107 = arith.addf %87, %106 : vector<1x16x16xf32>
    %c15 = arith.constant 15 : index
    %108 = memref.load %arg1[%c15] : memref<192xf32, #tpu.memory_space<smem>>
    %109 = vector.broadcast %108 : f32 to vector<1x16x16xf32>
    %110 = arith.mulf %109, %2 : vector<1x16x16xf32>
    %c16 = arith.constant 16 : index
    %111 = memref.load %arg1[%c16] : memref<192xf32, #tpu.memory_space<smem>>
    %112 = vector.broadcast %111 : f32 to vector<1x16x16xf32>
    %113 = arith.mulf %112, %4 : vector<1x16x16xf32>
    %114 = arith.addf %110, %113 : vector<1x16x16xf32>
    %c17 = arith.constant 17 : index
    %115 = memref.load %arg1[%c17] : memref<192xf32, #tpu.memory_space<smem>>
    %116 = vector.broadcast %115 : f32 to vector<1x16x16xf32>
    %117 = arith.mulf %116, %6 : vector<1x16x16xf32>
    %118 = arith.addf %114, %117 : vector<1x16x16xf32>
    %c5_19 = arith.constant 5 : index
    %119 = memref.load %arg2[%c5_19] : memref<64xf32, #tpu.memory_space<smem>>
    %120 = vector.broadcast %119 : f32 to vector<1x16x16xf32>
    %121 = arith.addf %118, %120 : vector<1x16x16xf32>
    %c5_20 = arith.constant 5 : index
    %122 = memref.load %arg3[%c5_20] : memref<64xf32, #tpu.memory_space<smem>>
    %cst_21 = arith.constant 0.000000e+00 : f32
    %123 = vector.broadcast %cst_21 : f32 to vector<1x16x16xf32>
    %124 = arith.maximumf %121, %123 : vector<1x16x16xf32>
    %125 = vector.broadcast %122 : f32 to vector<1x16x16xf32>
    %126 = arith.mulf %125, %124 : vector<1x16x16xf32>
    %127 = arith.addf %107, %126 : vector<1x16x16xf32>
    %c18 = arith.constant 18 : index
    %128 = memref.load %arg1[%c18] : memref<192xf32, #tpu.memory_space<smem>>
    %129 = vector.broadcast %128 : f32 to vector<1x16x16xf32>
    %130 = arith.mulf %129, %2 : vector<1x16x16xf32>
    %c19 = arith.constant 19 : index
    %131 = memref.load %arg1[%c19] : memref<192xf32, #tpu.memory_space<smem>>
    %132 = vector.broadcast %131 : f32 to vector<1x16x16xf32>
    %133 = arith.mulf %132, %4 : vector<1x16x16xf32>
    %134 = arith.addf %130, %133 : vector<1x16x16xf32>
    %c20 = arith.constant 20 : index
    %135 = memref.load %arg1[%c20] : memref<192xf32, #tpu.memory_space<smem>>
    %136 = vector.broadcast %135 : f32 to vector<1x16x16xf32>
    %137 = arith.mulf %136, %6 : vector<1x16x16xf32>
    %138 = arith.addf %134, %137 : vector<1x16x16xf32>
    %c6_22 = arith.constant 6 : index
    %139 = memref.load %arg2[%c6_22] : memref<64xf32, #tpu.memory_space<smem>>
    %140 = vector.broadcast %139 : f32 to vector<1x16x16xf32>
    %141 = arith.addf %138, %140 : vector<1x16x16xf32>
    %c6_23 = arith.constant 6 : index
    %142 = memref.load %arg3[%c6_23] : memref<64xf32, #tpu.memory_space<smem>>
    %cst_24 = arith.constant 0.000000e+00 : f32
    %143 = vector.broadcast %cst_24 : f32 to vector<1x16x16xf32>
    %144 = arith.maximumf %141, %143 : vector<1x16x16xf32>
    %145 = vector.broadcast %142 : f32 to vector<1x16x16xf32>
    %146 = arith.mulf %145, %144 : vector<1x16x16xf32>
    %147 = arith.addf %127, %146 : vector<1x16x16xf32>
    %c21 = arith.constant 21 : index
    %148 = memref.load %arg1[%c21] : memref<192xf32, #tpu.memory_space<smem>>
    %149 = vector.broadcast %148 : f32 to vector<1x16x16xf32>
    %150 = arith.mulf %149, %2 : vector<1x16x16xf32>
    %c22 = arith.constant 22 : index
    %151 = memref.load %arg1[%c22] : memref<192xf32, #tpu.memory_space<smem>>
    %152 = vector.broadcast %151 : f32 to vector<1x16x16xf32>
    %153 = arith.mulf %152, %4 : vector<1x16x16xf32>
    %154 = arith.addf %150, %153 : vector<1x16x16xf32>
    %c23 = arith.constant 23 : index
    %155 = memref.load %arg1[%c23] : memref<192xf32, #tpu.memory_space<smem>>
    %156 = vector.broadcast %155 : f32 to vector<1x16x16xf32>
    %157 = arith.mulf %156, %6 : vector<1x16x16xf32>
    %158 = arith.addf %154, %157 : vector<1x16x16xf32>
    %c7_25 = arith.constant 7 : index
    %159 = memref.load %arg2[%c7_25] : memref<64xf32, #tpu.memory_space<smem>>
    %160 = vector.broadcast %159 : f32 to vector<1x16x16xf32>
    %161 = arith.addf %158, %160 : vector<1x16x16xf32>
    %c7_26 = arith.constant 7 : index
    %162 = memref.load %arg3[%c7_26] : memref<64xf32, #tpu.memory_space<smem>>
    %cst_27 = arith.constant 0.000000e+00 : f32
    %163 = vector.broadcast %cst_27 : f32 to vector<1x16x16xf32>
    %164 = arith.maximumf %161, %163 : vector<1x16x16xf32>
    %165 = vector.broadcast %162 : f32 to vector<1x16x16xf32>
    %166 = arith.mulf %165, %164 : vector<1x16x16xf32>
    %167 = arith.addf %147, %166 : vector<1x16x16xf32>
    %c24 = arith.constant 24 : index
    %168 = memref.load %arg1[%c24] : memref<192xf32, #tpu.memory_space<smem>>
    %169 = vector.broadcast %168 : f32 to vector<1x16x16xf32>
    %170 = arith.mulf %169, %2 : vector<1x16x16xf32>
    %c25 = arith.constant 25 : index
    %171 = memref.load %arg1[%c25] : memref<192xf32, #tpu.memory_space<smem>>
    %172 = vector.broadcast %171 : f32 to vector<1x16x16xf32>
    %173 = arith.mulf %172, %4 : vector<1x16x16xf32>
    %174 = arith.addf %170, %173 : vector<1x16x16xf32>
    %c26 = arith.constant 26 : index
    %175 = memref.load %arg1[%c26] : memref<192xf32, #tpu.memory_space<smem>>
    %176 = vector.broadcast %175 : f32 to vector<1x16x16xf32>
    %177 = arith.mulf %176, %6 : vector<1x16x16xf32>
    %178 = arith.addf %174, %177 : vector<1x16x16xf32>
    %c8_28 = arith.constant 8 : index
    %179 = memref.load %arg2[%c8_28] : memref<64xf32, #tpu.memory_space<smem>>
    %180 = vector.broadcast %179 : f32 to vector<1x16x16xf32>
    %181 = arith.addf %178, %180 : vector<1x16x16xf32>
    %c8_29 = arith.constant 8 : index
    %182 = memref.load %arg3[%c8_29] : memref<64xf32, #tpu.memory_space<smem>>
    %cst_30 = arith.constant 0.000000e+00 : f32
    %183 = vector.broadcast %cst_30 : f32 to vector<1x16x16xf32>
    %184 = arith.maximumf %181, %183 : vector<1x16x16xf32>
    %185 = vector.broadcast %182 : f32 to vector<1x16x16xf32>
    %186 = arith.mulf %185, %184 : vector<1x16x16xf32>
    %187 = arith.addf %167, %186 : vector<1x16x16xf32>
    %c27 = arith.constant 27 : index
    %188 = memref.load %arg1[%c27] : memref<192xf32, #tpu.memory_space<smem>>
    %189 = vector.broadcast %188 : f32 to vector<1x16x16xf32>
    %190 = arith.mulf %189, %2 : vector<1x16x16xf32>
    %c28 = arith.constant 28 : index
    %191 = memref.load %arg1[%c28] : memref<192xf32, #tpu.memory_space<smem>>
    %192 = vector.broadcast %191 : f32 to vector<1x16x16xf32>
    %193 = arith.mulf %192, %4 : vector<1x16x16xf32>
    %194 = arith.addf %190, %193 : vector<1x16x16xf32>
    %c29 = arith.constant 29 : index
    %195 = memref.load %arg1[%c29] : memref<192xf32, #tpu.memory_space<smem>>
    %196 = vector.broadcast %195 : f32 to vector<1x16x16xf32>
    %197 = arith.mulf %196, %6 : vector<1x16x16xf32>
    %198 = arith.addf %194, %197 : vector<1x16x16xf32>
    %c9_31 = arith.constant 9 : index
    %199 = memref.load %arg2[%c9_31] : memref<64xf32, #tpu.memory_space<smem>>
    %200 = vector.broadcast %199 : f32 to vector<1x16x16xf32>
    %201 = arith.addf %198, %200 : vector<1x16x16xf32>
    %c9_32 = arith.constant 9 : index
    %202 = memref.load %arg3[%c9_32] : memref<64xf32, #tpu.memory_space<smem>>
    %cst_33 = arith.constant 0.000000e+00 : f32
    %203 = vector.broadcast %cst_33 : f32 to vector<1x16x16xf32>
    %204 = arith.maximumf %201, %203 : vector<1x16x16xf32>
    %205 = vector.broadcast %202 : f32 to vector<1x16x16xf32>
    %206 = arith.mulf %205, %204 : vector<1x16x16xf32>
    %207 = arith.addf %187, %206 : vector<1x16x16xf32>
    %c30 = arith.constant 30 : index
    %208 = memref.load %arg1[%c30] : memref<192xf32, #tpu.memory_space<smem>>
    %209 = vector.broadcast %208 : f32 to vector<1x16x16xf32>
    %210 = arith.mulf %209, %2 : vector<1x16x16xf32>
    %c31 = arith.constant 31 : index
    %211 = memref.load %arg1[%c31] : memref<192xf32, #tpu.memory_space<smem>>
    %212 = vector.broadcast %211 : f32 to vector<1x16x16xf32>
    %213 = arith.mulf %212, %4 : vector<1x16x16xf32>
    %214 = arith.addf %210, %213 : vector<1x16x16xf32>
    %c32 = arith.constant 32 : index
    %215 = memref.load %arg1[%c32] : memref<192xf32, #tpu.memory_space<smem>>
    %216 = vector.broadcast %215 : f32 to vector<1x16x16xf32>
    %217 = arith.mulf %216, %6 : vector<1x16x16xf32>
    %218 = arith.addf %214, %217 : vector<1x16x16xf32>
    %c10_34 = arith.constant 10 : index
    %219 = memref.load %arg2[%c10_34] : memref<64xf32, #tpu.memory_space<smem>>
    %220 = vector.broadcast %219 : f32 to vector<1x16x16xf32>
    %221 = arith.addf %218, %220 : vector<1x16x16xf32>
    %c10_35 = arith.constant 10 : index
    %222 = memref.load %arg3[%c10_35] : memref<64xf32, #tpu.memory_space<smem>>
    %cst_36 = arith.constant 0.000000e+00 : f32
    %223 = vector.broadcast %cst_36 : f32 to vector<1x16x16xf32>
    %224 = arith.maximumf %221, %223 : vector<1x16x16xf32>
    %225 = vector.broadcast %222 : f32 to vector<1x16x16xf32>
    %226 = arith.mulf %225, %224 : vector<1x16x16xf32>
    %227 = arith.addf %207, %226 : vector<1x16x16xf32>
    %c33 = arith.constant 33 : index
    %228 = memref.load %arg1[%c33] : memref<192xf32, #tpu.memory_space<smem>>
    %229 = vector.broadcast %228 : f32 to vector<1x16x16xf32>
    %230 = arith.mulf %229, %2 : vector<1x16x16xf32>
    %c34 = arith.constant 34 : index
    %231 = memref.load %arg1[%c34] : memref<192xf32, #tpu.memory_space<smem>>
    %232 = vector.broadcast %231 : f32 to vector<1x16x16xf32>
    %233 = arith.mulf %232, %4 : vector<1x16x16xf32>
    %234 = arith.addf %230, %233 : vector<1x16x16xf32>
    %c35 = arith.constant 35 : index
    %235 = memref.load %arg1[%c35] : memref<192xf32, #tpu.memory_space<smem>>
    %236 = vector.broadcast %235 : f32 to vector<1x16x16xf32>
    %237 = arith.mulf %236, %6 : vector<1x16x16xf32>
    %238 = arith.addf %234, %237 : vector<1x16x16xf32>
    %c11_37 = arith.constant 11 : index
    %239 = memref.load %arg2[%c11_37] : memref<64xf32, #tpu.memory_space<smem>>
    %240 = vector.broadcast %239 : f32 to vector<1x16x16xf32>
    %241 = arith.addf %238, %240 : vector<1x16x16xf32>
    %c11_38 = arith.constant 11 : index
    %242 = memref.load %arg3[%c11_38] : memref<64xf32, #tpu.memory_space<smem>>
    %cst_39 = arith.constant 0.000000e+00 : f32
    %243 = vector.broadcast %cst_39 : f32 to vector<1x16x16xf32>
    %244 = arith.maximumf %241, %243 : vector<1x16x16xf32>
    %245 = vector.broadcast %242 : f32 to vector<1x16x16xf32>
    %246 = arith.mulf %245, %244 : vector<1x16x16xf32>
    %247 = arith.addf %227, %246 : vector<1x16x16xf32>
    %c36 = arith.constant 36 : index
    %248 = memref.load %arg1[%c36] : memref<192xf32, #tpu.memory_space<smem>>
    %249 = vector.broadcast %248 : f32 to vector<1x16x16xf32>
    %250 = arith.mulf %249, %2 : vector<1x16x16xf32>
    %c37 = arith.constant 37 : index
    %251 = memref.load %arg1[%c37] : memref<192xf32, #tpu.memory_space<smem>>
    %252 = vector.broadcast %251 : f32 to vector<1x16x16xf32>
    %253 = arith.mulf %252, %4 : vector<1x16x16xf32>
    %254 = arith.addf %250, %253 : vector<1x16x16xf32>
    %c38 = arith.constant 38 : index
    %255 = memref.load %arg1[%c38] : memref<192xf32, #tpu.memory_space<smem>>
    %256 = vector.broadcast %255 : f32 to vector<1x16x16xf32>
    %257 = arith.mulf %256, %6 : vector<1x16x16xf32>
    %258 = arith.addf %254, %257 : vector<1x16x16xf32>
    %c12_40 = arith.constant 12 : index
    %259 = memref.load %arg2[%c12_40] : memref<64xf32, #tpu.memory_space<smem>>
    %260 = vector.broadcast %259 : f32 to vector<1x16x16xf32>
    %261 = arith.addf %258, %260 : vector<1x16x16xf32>
    %c12_41 = arith.constant 12 : index
    %262 = memref.load %arg3[%c12_41] : memref<64xf32, #tpu.memory_space<smem>>
    %cst_42 = arith.constant 0.000000e+00 : f32
    %263 = vector.broadcast %cst_42 : f32 to vector<1x16x16xf32>
    %264 = arith.maximumf %261, %263 : vector<1x16x16xf32>
    %265 = vector.broadcast %262 : f32 to vector<1x16x16xf32>
    %266 = arith.mulf %265, %264 : vector<1x16x16xf32>
    %267 = arith.addf %247, %266 : vector<1x16x16xf32>
    %c39 = arith.constant 39 : index
    %268 = memref.load %arg1[%c39] : memref<192xf32, #tpu.memory_space<smem>>
    %269 = vector.broadcast %268 : f32 to vector<1x16x16xf32>
    %270 = arith.mulf %269, %2 : vector<1x16x16xf32>
    %c40 = arith.constant 40 : index
    %271 = memref.load %arg1[%c40] : memref<192xf32, #tpu.memory_space<smem>>
    %272 = vector.broadcast %271 : f32 to vector<1x16x16xf32>
    %273 = arith.mulf %272, %4 : vector<1x16x16xf32>
    %274 = arith.addf %270, %273 : vector<1x16x16xf32>
    %c41 = arith.constant 41 : index
    %275 = memref.load %arg1[%c41] : memref<192xf32, #tpu.memory_space<smem>>
    %276 = vector.broadcast %275 : f32 to vector<1x16x16xf32>
    %277 = arith.mulf %276, %6 : vector<1x16x16xf32>
    %278 = arith.addf %274, %277 : vector<1x16x16xf32>
    %c13_43 = arith.constant 13 : index
    %279 = memref.load %arg2[%c13_43] : memref<64xf32, #tpu.memory_space<smem>>
    %280 = vector.broadcast %279 : f32 to vector<1x16x16xf32>
    %281 = arith.addf %278, %280 : vector<1x16x16xf32>
    %c13_44 = arith.constant 13 : index
    %282 = memref.load %arg3[%c13_44] : memref<64xf32, #tpu.memory_space<smem>>
    %cst_45 = arith.constant 0.000000e+00 : f32
    %283 = vector.broadcast %cst_45 : f32 to vector<1x16x16xf32>
    %284 = arith.maximumf %281, %283 : vector<1x16x16xf32>
    %285 = vector.broadcast %282 : f32 to vector<1x16x16xf32>
    %286 = arith.mulf %285, %284 : vector<1x16x16xf32>
    %287 = arith.addf %267, %286 : vector<1x16x16xf32>
    %c42 = arith.constant 42 : index
    %288 = memref.load %arg1[%c42] : memref<192xf32, #tpu.memory_space<smem>>
    %289 = vector.broadcast %288 : f32 to vector<1x16x16xf32>
    %290 = arith.mulf %289, %2 : vector<1x16x16xf32>
    %c43 = arith.constant 43 : index
    %291 = memref.load %arg1[%c43] : memref<192xf32, #tpu.memory_space<smem>>
    %292 = vector.broadcast %291 : f32 to vector<1x16x16xf32>
    %293 = arith.mulf %292, %4 : vector<1x16x16xf32>
    %294 = arith.addf %290, %293 : vector<1x16x16xf32>
    %c44 = arith.constant 44 : index
    %295 = memref.load %arg1[%c44] : memref<192xf32, #tpu.memory_space<smem>>
    %296 = vector.broadcast %295 : f32 to vector<1x16x16xf32>
    %297 = arith.mulf %296, %6 : vector<1x16x16xf32>
    %298 = arith.addf %294, %297 : vector<1x16x16xf32>
    %c14_46 = arith.constant 14 : index
    %299 = memref.load %arg2[%c14_46] : memref<64xf32, #tpu.memory_space<smem>>
    %300 = vector.broadcast %299 : f32 to vector<1x16x16xf32>
    %301 = arith.addf %298, %300 : vector<1x16x16xf32>
    %c14_47 = arith.constant 14 : index
    %302 = memref.load %arg3[%c14_47] : memref<64xf32, #tpu.memory_space<smem>>
    %cst_48 = arith.constant 0.000000e+00 : f32
    %303 = vector.broadcast %cst_48 : f32 to vector<1x16x16xf32>
    %304 = arith.maximumf %301, %303 : vector<1x16x16xf32>
    %305 = vector.broadcast %302 : f32 to vector<1x16x16xf32>
    %306 = arith.mulf %305, %304 : vector<1x16x16xf32>
    %307 = arith.addf %287, %306 : vector<1x16x16xf32>
    %c45 = arith.constant 45 : index
    %308 = memref.load %arg1[%c45] : memref<192xf32, #tpu.memory_space<smem>>
    %309 = vector.broadcast %308 : f32 to vector<1x16x16xf32>
    %310 = arith.mulf %309, %2 : vector<1x16x16xf32>
    %c46 = arith.constant 46 : index
    %311 = memref.load %arg1[%c46] : memref<192xf32, #tpu.memory_space<smem>>
    %312 = vector.broadcast %311 : f32 to vector<1x16x16xf32>
    %313 = arith.mulf %312, %4 : vector<1x16x16xf32>
    %314 = arith.addf %310, %313 : vector<1x16x16xf32>
    %c47 = arith.constant 47 : index
    %315 = memref.load %arg1[%c47] : memref<192xf32, #tpu.memory_space<smem>>
    %316 = vector.broadcast %315 : f32 to vector<1x16x16xf32>
    %317 = arith.mulf %316, %6 : vector<1x16x16xf32>
    %318 = arith.addf %314, %317 : vector<1x16x16xf32>
    %c15_49 = arith.constant 15 : index
    %319 = memref.load %arg2[%c15_49] : memref<64xf32, #tpu.memory_space<smem>>
    %320 = vector.broadcast %319 : f32 to vector<1x16x16xf32>
    %321 = arith.addf %318, %320 : vector<1x16x16xf32>
    %c15_50 = arith.constant 15 : index
    %322 = memref.load %arg3[%c15_50] : memref<64xf32, #tpu.memory_space<smem>>
    %cst_51 = arith.constant 0.000000e+00 : f32
    %323 = vector.broadcast %cst_51 : f32 to vector<1x16x16xf32>
    %324 = arith.maximumf %321, %323 : vector<1x16x16xf32>
    %325 = vector.broadcast %322 : f32 to vector<1x16x16xf32>
    %326 = arith.mulf %325, %324 : vector<1x16x16xf32>
    %327 = arith.addf %307, %326 : vector<1x16x16xf32>
    %c48 = arith.constant 48 : index
    %328 = memref.load %arg1[%c48] : memref<192xf32, #tpu.memory_space<smem>>
    %329 = vector.broadcast %328 : f32 to vector<1x16x16xf32>
    %330 = arith.mulf %329, %2 : vector<1x16x16xf32>
    %c49 = arith.constant 49 : index
    %331 = memref.load %arg1[%c49] : memref<192xf32, #tpu.memory_space<smem>>
    %332 = vector.broadcast %331 : f32 to vector<1x16x16xf32>
    %333 = arith.mulf %332, %4 : vector<1x16x16xf32>
    %334 = arith.addf %330, %333 : vector<1x16x16xf32>
    %c50 = arith.constant 50 : index
    %335 = memref.load %arg1[%c50] : memref<192xf32, #tpu.memory_space<smem>>
    %336 = vector.broadcast %335 : f32 to vector<1x16x16xf32>
    %337 = arith.mulf %336, %6 : vector<1x16x16xf32>
    %338 = arith.addf %334, %337 : vector<1x16x16xf32>
    %c16_52 = arith.constant 16 : index
    %339 = memref.load %arg2[%c16_52] : memref<64xf32, #tpu.memory_space<smem>>
    %340 = vector.broadcast %339 : f32 to vector<1x16x16xf32>
    %341 = arith.addf %338, %340 : vector<1x16x16xf32>
    %c16_53 = arith.constant 16 : index
    %342 = memref.load %arg3[%c16_53] : memref<64xf32, #tpu.memory_space<smem>>
    %cst_54 = arith.constant 0.000000e+00 : f32
    %343 = vector.broadcast %cst_54 : f32 to vector<1x16x16xf32>
    %344 = arith.maximumf %341, %343 : vector<1x16x16xf32>
    %345 = vector.broadcast %342 : f32 to vector<1x16x16xf32>
    %346 = arith.mulf %345, %344 : vector<1x16x16xf32>
    %347 = arith.addf %327, %346 : vector<1x16x16xf32>
    %c51 = arith.constant 51 : index
    %348 = memref.load %arg1[%c51] : memref<192xf32, #tpu.memory_space<smem>>
    %349 = vector.broadcast %348 : f32 to vector<1x16x16xf32>
    %350 = arith.mulf %349, %2 : vector<1x16x16xf32>
    %c52 = arith.constant 52 : index
    %351 = memref.load %arg1[%c52] : memref<192xf32, #tpu.memory_space<smem>>
    %352 = vector.broadcast %351 : f32 to vector<1x16x16xf32>
    %353 = arith.mulf %352, %4 : vector<1x16x16xf32>
    %354 = arith.addf %350, %353 : vector<1x16x16xf32>
    %c53 = arith.constant 53 : index
    %355 = memref.load %arg1[%c53] : memref<192xf32, #tpu.memory_space<smem>>
    %356 = vector.broadcast %355 : f32 to vector<1x16x16xf32>
    %357 = arith.mulf %356, %6 : vector<1x16x16xf32>
    %358 = arith.addf %354, %357 : vector<1x16x16xf32>
    %c17_55 = arith.constant 17 : index
    %359 = memref.load %arg2[%c17_55] : memref<64xf32, #tpu.memory_space<smem>>
    %360 = vector.broadcast %359 : f32 to vector<1x16x16xf32>
    %361 = arith.addf %358, %360 : vector<1x16x16xf32>
    %c17_56 = arith.constant 17 : index
    %362 = memref.load %arg3[%c17_56] : memref<64xf32, #tpu.memory_space<smem>>
    %cst_57 = arith.constant 0.000000e+00 : f32
    %363 = vector.broadcast %cst_57 : f32 to vector<1x16x16xf32>
    %364 = arith.maximumf %361, %363 : vector<1x16x16xf32>
    %365 = vector.broadcast %362 : f32 to vector<1x16x16xf32>
    %366 = arith.mulf %365, %364 : vector<1x16x16xf32>
    %367 = arith.addf %347, %366 : vector<1x16x16xf32>
    %c54 = arith.constant 54 : index
    %368 = memref.load %arg1[%c54] : memref<192xf32, #tpu.memory_space<smem>>
    %369 = vector.broadcast %368 : f32 to vector<1x16x16xf32>
    %370 = arith.mulf %369, %2 : vector<1x16x16xf32>
    %c55 = arith.constant 55 : index
    %371 = memref.load %arg1[%c55] : memref<192xf32, #tpu.memory_space<smem>>
    %372 = vector.broadcast %371 : f32 to vector<1x16x16xf32>
    %373 = arith.mulf %372, %4 : vector<1x16x16xf32>
    %374 = arith.addf %370, %373 : vector<1x16x16xf32>
    %c56 = arith.constant 56 : index
    %375 = memref.load %arg1[%c56] : memref<192xf32, #tpu.memory_space<smem>>
    %376 = vector.broadcast %375 : f32 to vector<1x16x16xf32>
    %377 = arith.mulf %376, %6 : vector<1x16x16xf32>
    %378 = arith.addf %374, %377 : vector<1x16x16xf32>
    %c18_58 = arith.constant 18 : index
    %379 = memref.load %arg2[%c18_58] : memref<64xf32, #tpu.memory_space<smem>>
    %380 = vector.broadcast %379 : f32 to vector<1x16x16xf32>
    %381 = arith.addf %378, %380 : vector<1x16x16xf32>
    %c18_59 = arith.constant 18 : index
    %382 = memref.load %arg3[%c18_59] : memref<64xf32, #tpu.memory_space<smem>>
    %cst_60 = arith.constant 0.000000e+00 : f32
    %383 = vector.broadcast %cst_60 : f32 to vector<1x16x16xf32>
    %384 = arith.maximumf %381, %383 : vector<1x16x16xf32>
    %385 = vector.broadcast %382 : f32 to vector<1x16x16xf32>
    %386 = arith.mulf %385, %384 : vector<1x16x16xf32>
    %387 = arith.addf %367, %386 : vector<1x16x16xf32>
    %c57 = arith.constant 57 : index
    %388 = memref.load %arg1[%c57] : memref<192xf32, #tpu.memory_space<smem>>
    %389 = vector.broadcast %388 : f32 to vector<1x16x16xf32>
    %390 = arith.mulf %389, %2 : vector<1x16x16xf32>
    %c58 = arith.constant 58 : index
    %391 = memref.load %arg1[%c58] : memref<192xf32, #tpu.memory_space<smem>>
    %392 = vector.broadcast %391 : f32 to vector<1x16x16xf32>
    %393 = arith.mulf %392, %4 : vector<1x16x16xf32>
    %394 = arith.addf %390, %393 : vector<1x16x16xf32>
    %c59 = arith.constant 59 : index
    %395 = memref.load %arg1[%c59] : memref<192xf32, #tpu.memory_space<smem>>
    %396 = vector.broadcast %395 : f32 to vector<1x16x16xf32>
    %397 = arith.mulf %396, %6 : vector<1x16x16xf32>
    %398 = arith.addf %394, %397 : vector<1x16x16xf32>
    %c19_61 = arith.constant 19 : index
    %399 = memref.load %arg2[%c19_61] : memref<64xf32, #tpu.memory_space<smem>>
    %400 = vector.broadcast %399 : f32 to vector<1x16x16xf32>
    %401 = arith.addf %398, %400 : vector<1x16x16xf32>
    %c19_62 = arith.constant 19 : index
    %402 = memref.load %arg3[%c19_62] : memref<64xf32, #tpu.memory_space<smem>>
    %cst_63 = arith.constant 0.000000e+00 : f32
    %403 = vector.broadcast %cst_63 : f32 to vector<1x16x16xf32>
    %404 = arith.maximumf %401, %403 : vector<1x16x16xf32>
    %405 = vector.broadcast %402 : f32 to vector<1x16x16xf32>
    %406 = arith.mulf %405, %404 : vector<1x16x16xf32>
    %407 = arith.addf %387, %406 : vector<1x16x16xf32>
    %c60 = arith.constant 60 : index
    %408 = memref.load %arg1[%c60] : memref<192xf32, #tpu.memory_space<smem>>
    %409 = vector.broadcast %408 : f32 to vector<1x16x16xf32>
    %410 = arith.mulf %409, %2 : vector<1x16x16xf32>
    %c61 = arith.constant 61 : index
    %411 = memref.load %arg1[%c61] : memref<192xf32, #tpu.memory_space<smem>>
    %412 = vector.broadcast %411 : f32 to vector<1x16x16xf32>
    %413 = arith.mulf %412, %4 : vector<1x16x16xf32>
    %414 = arith.addf %410, %413 : vector<1x16x16xf32>
    %c62 = arith.constant 62 : index
    %415 = memref.load %arg1[%c62] : memref<192xf32, #tpu.memory_space<smem>>
    %416 = vector.broadcast %415 : f32 to vector<1x16x16xf32>
    %417 = arith.mulf %416, %6 : vector<1x16x16xf32>
    %418 = arith.addf %414, %417 : vector<1x16x16xf32>
    %c20_64 = arith.constant 20 : index
    %419 = memref.load %arg2[%c20_64] : memref<64xf32, #tpu.memory_space<smem>>
    %420 = vector.broadcast %419 : f32 to vector<1x16x16xf32>
    %421 = arith.addf %418, %420 : vector<1x16x16xf32>
    %c20_65 = arith.constant 20 : index
    %422 = memref.load %arg3[%c20_65] : memref<64xf32, #tpu.memory_space<smem>>
    %cst_66 = arith.constant 0.000000e+00 : f32
    %423 = vector.broadcast %cst_66 : f32 to vector<1x16x16xf32>
    %424 = arith.maximumf %421, %423 : vector<1x16x16xf32>
    %425 = vector.broadcast %422 : f32 to vector<1x16x16xf32>
    %426 = arith.mulf %425, %424 : vector<1x16x16xf32>
    %427 = arith.addf %407, %426 : vector<1x16x16xf32>
    %c63 = arith.constant 63 : index
    %428 = memref.load %arg1[%c63] : memref<192xf32, #tpu.memory_space<smem>>
    %429 = vector.broadcast %428 : f32 to vector<1x16x16xf32>
    %430 = arith.mulf %429, %2 : vector<1x16x16xf32>
    %c64 = arith.constant 64 : index
    %431 = memref.load %arg1[%c64] : memref<192xf32, #tpu.memory_space<smem>>
    %432 = vector.broadcast %431 : f32 to vector<1x16x16xf32>
    %433 = arith.mulf %432, %4 : vector<1x16x16xf32>
    %434 = arith.addf %430, %433 : vector<1x16x16xf32>
    %c65 = arith.constant 65 : index
    %435 = memref.load %arg1[%c65] : memref<192xf32, #tpu.memory_space<smem>>
    %436 = vector.broadcast %435 : f32 to vector<1x16x16xf32>
    %437 = arith.mulf %436, %6 : vector<1x16x16xf32>
    %438 = arith.addf %434, %437 : vector<1x16x16xf32>
    %c21_67 = arith.constant 21 : index
    %439 = memref.load %arg2[%c21_67] : memref<64xf32, #tpu.memory_space<smem>>
    %440 = vector.broadcast %439 : f32 to vector<1x16x16xf32>
    %441 = arith.addf %438, %440 : vector<1x16x16xf32>
    %c21_68 = arith.constant 21 : index
    %442 = memref.load %arg3[%c21_68] : memref<64xf32, #tpu.memory_space<smem>>
    %cst_69 = arith.constant 0.000000e+00 : f32
    %443 = vector.broadcast %cst_69 : f32 to vector<1x16x16xf32>
    %444 = arith.maximumf %441, %443 : vector<1x16x16xf32>
    %445 = vector.broadcast %442 : f32 to vector<1x16x16xf32>
    %446 = arith.mulf %445, %444 : vector<1x16x16xf32>
    %447 = arith.addf %427, %446 : vector<1x16x16xf32>
    %c66 = arith.constant 66 : index
    %448 = memref.load %arg1[%c66] : memref<192xf32, #tpu.memory_space<smem>>
    %449 = vector.broadcast %448 : f32 to vector<1x16x16xf32>
    %450 = arith.mulf %449, %2 : vector<1x16x16xf32>
    %c67 = arith.constant 67 : index
    %451 = memref.load %arg1[%c67] : memref<192xf32, #tpu.memory_space<smem>>
    %452 = vector.broadcast %451 : f32 to vector<1x16x16xf32>
    %453 = arith.mulf %452, %4 : vector<1x16x16xf32>
    %454 = arith.addf %450, %453 : vector<1x16x16xf32>
    %c68 = arith.constant 68 : index
    %455 = memref.load %arg1[%c68] : memref<192xf32, #tpu.memory_space<smem>>
    %456 = vector.broadcast %455 : f32 to vector<1x16x16xf32>
    %457 = arith.mulf %456, %6 : vector<1x16x16xf32>
    %458 = arith.addf %454, %457 : vector<1x16x16xf32>
    %c22_70 = arith.constant 22 : index
    %459 = memref.load %arg2[%c22_70] : memref<64xf32, #tpu.memory_space<smem>>
    %460 = vector.broadcast %459 : f32 to vector<1x16x16xf32>
    %461 = arith.addf %458, %460 : vector<1x16x16xf32>
    %c22_71 = arith.constant 22 : index
    %462 = memref.load %arg3[%c22_71] : memref<64xf32, #tpu.memory_space<smem>>
    %cst_72 = arith.constant 0.000000e+00 : f32
    %463 = vector.broadcast %cst_72 : f32 to vector<1x16x16xf32>
    %464 = arith.maximumf %461, %463 : vector<1x16x16xf32>
    %465 = vector.broadcast %462 : f32 to vector<1x16x16xf32>
    %466 = arith.mulf %465, %464 : vector<1x16x16xf32>
    %467 = arith.addf %447, %466 : vector<1x16x16xf32>
    %c69 = arith.constant 69 : index
    %468 = memref.load %arg1[%c69] : memref<192xf32, #tpu.memory_space<smem>>
    %469 = vector.broadcast %468 : f32 to vector<1x16x16xf32>
    %470 = arith.mulf %469, %2 : vector<1x16x16xf32>
    %c70 = arith.constant 70 : index
    %471 = memref.load %arg1[%c70] : memref<192xf32, #tpu.memory_space<smem>>
    %472 = vector.broadcast %471 : f32 to vector<1x16x16xf32>
    %473 = arith.mulf %472, %4 : vector<1x16x16xf32>
    %474 = arith.addf %470, %473 : vector<1x16x16xf32>
    %c71 = arith.constant 71 : index
    %475 = memref.load %arg1[%c71] : memref<192xf32, #tpu.memory_space<smem>>
    %476 = vector.broadcast %475 : f32 to vector<1x16x16xf32>
    %477 = arith.mulf %476, %6 : vector<1x16x16xf32>
    %478 = arith.addf %474, %477 : vector<1x16x16xf32>
    %c23_73 = arith.constant 23 : index
    %479 = memref.load %arg2[%c23_73] : memref<64xf32, #tpu.memory_space<smem>>
    %480 = vector.broadcast %479 : f32 to vector<1x16x16xf32>
    %481 = arith.addf %478, %480 : vector<1x16x16xf32>
    %c23_74 = arith.constant 23 : index
    %482 = memref.load %arg3[%c23_74] : memref<64xf32, #tpu.memory_space<smem>>
    %cst_75 = arith.constant 0.000000e+00 : f32
    %483 = vector.broadcast %cst_75 : f32 to vector<1x16x16xf32>
    %484 = arith.maximumf %481, %483 : vector<1x16x16xf32>
    %485 = vector.broadcast %482 : f32 to vector<1x16x16xf32>
    %486 = arith.mulf %485, %484 : vector<1x16x16xf32>
    %487 = arith.addf %467, %486 : vector<1x16x16xf32>
    %c72 = arith.constant 72 : index
    %488 = memref.load %arg1[%c72] : memref<192xf32, #tpu.memory_space<smem>>
    %489 = vector.broadcast %488 : f32 to vector<1x16x16xf32>
    %490 = arith.mulf %489, %2 : vector<1x16x16xf32>
    %c73 = arith.constant 73 : index
    %491 = memref.load %arg1[%c73] : memref<192xf32, #tpu.memory_space<smem>>
    %492 = vector.broadcast %491 : f32 to vector<1x16x16xf32>
    %493 = arith.mulf %492, %4 : vector<1x16x16xf32>
    %494 = arith.addf %490, %493 : vector<1x16x16xf32>
    %c74 = arith.constant 74 : index
    %495 = memref.load %arg1[%c74] : memref<192xf32, #tpu.memory_space<smem>>
    %496 = vector.broadcast %495 : f32 to vector<1x16x16xf32>
    %497 = arith.mulf %496, %6 : vector<1x16x16xf32>
    %498 = arith.addf %494, %497 : vector<1x16x16xf32>
    %c24_76 = arith.constant 24 : index
    %499 = memref.load %arg2[%c24_76] : memref<64xf32, #tpu.memory_space<smem>>
    %500 = vector.broadcast %499 : f32 to vector<1x16x16xf32>
    %501 = arith.addf %498, %500 : vector<1x16x16xf32>
    %c24_77 = arith.constant 24 : index
    %502 = memref.load %arg3[%c24_77] : memref<64xf32, #tpu.memory_space<smem>>
    %cst_78 = arith.constant 0.000000e+00 : f32
    %503 = vector.broadcast %cst_78 : f32 to vector<1x16x16xf32>
    %504 = arith.maximumf %501, %503 : vector<1x16x16xf32>
    %505 = vector.broadcast %502 : f32 to vector<1x16x16xf32>
    %506 = arith.mulf %505, %504 : vector<1x16x16xf32>
    %507 = arith.addf %487, %506 : vector<1x16x16xf32>
    %c75 = arith.constant 75 : index
    %508 = memref.load %arg1[%c75] : memref<192xf32, #tpu.memory_space<smem>>
    %509 = vector.broadcast %508 : f32 to vector<1x16x16xf32>
    %510 = arith.mulf %509, %2 : vector<1x16x16xf32>
    %c76 = arith.constant 76 : index
    %511 = memref.load %arg1[%c76] : memref<192xf32, #tpu.memory_space<smem>>
    %512 = vector.broadcast %511 : f32 to vector<1x16x16xf32>
    %513 = arith.mulf %512, %4 : vector<1x16x16xf32>
    %514 = arith.addf %510, %513 : vector<1x16x16xf32>
    %c77 = arith.constant 77 : index
    %515 = memref.load %arg1[%c77] : memref<192xf32, #tpu.memory_space<smem>>
    %516 = vector.broadcast %515 : f32 to vector<1x16x16xf32>
    %517 = arith.mulf %516, %6 : vector<1x16x16xf32>
    %518 = arith.addf %514, %517 : vector<1x16x16xf32>
    %c25_79 = arith.constant 25 : index
    %519 = memref.load %arg2[%c25_79] : memref<64xf32, #tpu.memory_space<smem>>
    %520 = vector.broadcast %519 : f32 to vector<1x16x16xf32>
    %521 = arith.addf %518, %520 : vector<1x16x16xf32>
    %c25_80 = arith.constant 25 : index
    %522 = memref.load %arg3[%c25_80] : memref<64xf32, #tpu.memory_space<smem>>
    %cst_81 = arith.constant 0.000000e+00 : f32
    %523 = vector.broadcast %cst_81 : f32 to vector<1x16x16xf32>
    %524 = arith.maximumf %521, %523 : vector<1x16x16xf32>
    %525 = vector.broadcast %522 : f32 to vector<1x16x16xf32>
    %526 = arith.mulf %525, %524 : vector<1x16x16xf32>
    %527 = arith.addf %507, %526 : vector<1x16x16xf32>
    %c78 = arith.constant 78 : index
    %528 = memref.load %arg1[%c78] : memref<192xf32, #tpu.memory_space<smem>>
    %529 = vector.broadcast %528 : f32 to vector<1x16x16xf32>
    %530 = arith.mulf %529, %2 : vector<1x16x16xf32>
    %c79 = arith.constant 79 : index
    %531 = memref.load %arg1[%c79] : memref<192xf32, #tpu.memory_space<smem>>
    %532 = vector.broadcast %531 : f32 to vector<1x16x16xf32>
    %533 = arith.mulf %532, %4 : vector<1x16x16xf32>
    %534 = arith.addf %530, %533 : vector<1x16x16xf32>
    %c80 = arith.constant 80 : index
    %535 = memref.load %arg1[%c80] : memref<192xf32, #tpu.memory_space<smem>>
    %536 = vector.broadcast %535 : f32 to vector<1x16x16xf32>
    %537 = arith.mulf %536, %6 : vector<1x16x16xf32>
    %538 = arith.addf %534, %537 : vector<1x16x16xf32>
    %c26_82 = arith.constant 26 : index
    %539 = memref.load %arg2[%c26_82] : memref<64xf32, #tpu.memory_space<smem>>
    %540 = vector.broadcast %539 : f32 to vector<1x16x16xf32>
    %541 = arith.addf %538, %540 : vector<1x16x16xf32>
    %c26_83 = arith.constant 26 : index
    %542 = memref.load %arg3[%c26_83] : memref<64xf32, #tpu.memory_space<smem>>
    %cst_84 = arith.constant 0.000000e+00 : f32
    %543 = vector.broadcast %cst_84 : f32 to vector<1x16x16xf32>
    %544 = arith.maximumf %541, %543 : vector<1x16x16xf32>
    %545 = vector.broadcast %542 : f32 to vector<1x16x16xf32>
    %546 = arith.mulf %545, %544 : vector<1x16x16xf32>
    %547 = arith.addf %527, %546 : vector<1x16x16xf32>
    %c81 = arith.constant 81 : index
    %548 = memref.load %arg1[%c81] : memref<192xf32, #tpu.memory_space<smem>>
    %549 = vector.broadcast %548 : f32 to vector<1x16x16xf32>
    %550 = arith.mulf %549, %2 : vector<1x16x16xf32>
    %c82 = arith.constant 82 : index
    %551 = memref.load %arg1[%c82] : memref<192xf32, #tpu.memory_space<smem>>
    %552 = vector.broadcast %551 : f32 to vector<1x16x16xf32>
    %553 = arith.mulf %552, %4 : vector<1x16x16xf32>
    %554 = arith.addf %550, %553 : vector<1x16x16xf32>
    %c83 = arith.constant 83 : index
    %555 = memref.load %arg1[%c83] : memref<192xf32, #tpu.memory_space<smem>>
    %556 = vector.broadcast %555 : f32 to vector<1x16x16xf32>
    %557 = arith.mulf %556, %6 : vector<1x16x16xf32>
    %558 = arith.addf %554, %557 : vector<1x16x16xf32>
    %c27_85 = arith.constant 27 : index
    %559 = memref.load %arg2[%c27_85] : memref<64xf32, #tpu.memory_space<smem>>
    %560 = vector.broadcast %559 : f32 to vector<1x16x16xf32>
    %561 = arith.addf %558, %560 : vector<1x16x16xf32>
    %c27_86 = arith.constant 27 : index
    %562 = memref.load %arg3[%c27_86] : memref<64xf32, #tpu.memory_space<smem>>
    %cst_87 = arith.constant 0.000000e+00 : f32
    %563 = vector.broadcast %cst_87 : f32 to vector<1x16x16xf32>
    %564 = arith.maximumf %561, %563 : vector<1x16x16xf32>
    %565 = vector.broadcast %562 : f32 to vector<1x16x16xf32>
    %566 = arith.mulf %565, %564 : vector<1x16x16xf32>
    %567 = arith.addf %547, %566 : vector<1x16x16xf32>
    %c84 = arith.constant 84 : index
    %568 = memref.load %arg1[%c84] : memref<192xf32, #tpu.memory_space<smem>>
    %569 = vector.broadcast %568 : f32 to vector<1x16x16xf32>
    %570 = arith.mulf %569, %2 : vector<1x16x16xf32>
    %c85 = arith.constant 85 : index
    %571 = memref.load %arg1[%c85] : memref<192xf32, #tpu.memory_space<smem>>
    %572 = vector.broadcast %571 : f32 to vector<1x16x16xf32>
    %573 = arith.mulf %572, %4 : vector<1x16x16xf32>
    %574 = arith.addf %570, %573 : vector<1x16x16xf32>
    %c86 = arith.constant 86 : index
    %575 = memref.load %arg1[%c86] : memref<192xf32, #tpu.memory_space<smem>>
    %576 = vector.broadcast %575 : f32 to vector<1x16x16xf32>
    %577 = arith.mulf %576, %6 : vector<1x16x16xf32>
    %578 = arith.addf %574, %577 : vector<1x16x16xf32>
    %c28_88 = arith.constant 28 : index
    %579 = memref.load %arg2[%c28_88] : memref<64xf32, #tpu.memory_space<smem>>
    %580 = vector.broadcast %579 : f32 to vector<1x16x16xf32>
    %581 = arith.addf %578, %580 : vector<1x16x16xf32>
    %c28_89 = arith.constant 28 : index
    %582 = memref.load %arg3[%c28_89] : memref<64xf32, #tpu.memory_space<smem>>
    %cst_90 = arith.constant 0.000000e+00 : f32
    %583 = vector.broadcast %cst_90 : f32 to vector<1x16x16xf32>
    %584 = arith.maximumf %581, %583 : vector<1x16x16xf32>
    %585 = vector.broadcast %582 : f32 to vector<1x16x16xf32>
    %586 = arith.mulf %585, %584 : vector<1x16x16xf32>
    %587 = arith.addf %567, %586 : vector<1x16x16xf32>
    %c87 = arith.constant 87 : index
    %588 = memref.load %arg1[%c87] : memref<192xf32, #tpu.memory_space<smem>>
    %589 = vector.broadcast %588 : f32 to vector<1x16x16xf32>
    %590 = arith.mulf %589, %2 : vector<1x16x16xf32>
    %c88 = arith.constant 88 : index
    %591 = memref.load %arg1[%c88] : memref<192xf32, #tpu.memory_space<smem>>
    %592 = vector.broadcast %591 : f32 to vector<1x16x16xf32>
    %593 = arith.mulf %592, %4 : vector<1x16x16xf32>
    %594 = arith.addf %590, %593 : vector<1x16x16xf32>
    %c89 = arith.constant 89 : index
    %595 = memref.load %arg1[%c89] : memref<192xf32, #tpu.memory_space<smem>>
    %596 = vector.broadcast %595 : f32 to vector<1x16x16xf32>
    %597 = arith.mulf %596, %6 : vector<1x16x16xf32>
    %598 = arith.addf %594, %597 : vector<1x16x16xf32>
    %c29_91 = arith.constant 29 : index
    %599 = memref.load %arg2[%c29_91] : memref<64xf32, #tpu.memory_space<smem>>
    %600 = vector.broadcast %599 : f32 to vector<1x16x16xf32>
    %601 = arith.addf %598, %600 : vector<1x16x16xf32>
    %c29_92 = arith.constant 29 : index
    %602 = memref.load %arg3[%c29_92] : memref<64xf32, #tpu.memory_space<smem>>
    %cst_93 = arith.constant 0.000000e+00 : f32
    %603 = vector.broadcast %cst_93 : f32 to vector<1x16x16xf32>
    %604 = arith.maximumf %601, %603 : vector<1x16x16xf32>
    %605 = vector.broadcast %602 : f32 to vector<1x16x16xf32>
    %606 = arith.mulf %605, %604 : vector<1x16x16xf32>
    %607 = arith.addf %587, %606 : vector<1x16x16xf32>
    %c90 = arith.constant 90 : index
    %608 = memref.load %arg1[%c90] : memref<192xf32, #tpu.memory_space<smem>>
    %609 = vector.broadcast %608 : f32 to vector<1x16x16xf32>
    %610 = arith.mulf %609, %2 : vector<1x16x16xf32>
    %c91 = arith.constant 91 : index
    %611 = memref.load %arg1[%c91] : memref<192xf32, #tpu.memory_space<smem>>
    %612 = vector.broadcast %611 : f32 to vector<1x16x16xf32>
    %613 = arith.mulf %612, %4 : vector<1x16x16xf32>
    %614 = arith.addf %610, %613 : vector<1x16x16xf32>
    %c92 = arith.constant 92 : index
    %615 = memref.load %arg1[%c92] : memref<192xf32, #tpu.memory_space<smem>>
    %616 = vector.broadcast %615 : f32 to vector<1x16x16xf32>
    %617 = arith.mulf %616, %6 : vector<1x16x16xf32>
    %618 = arith.addf %614, %617 : vector<1x16x16xf32>
    %c30_94 = arith.constant 30 : index
    %619 = memref.load %arg2[%c30_94] : memref<64xf32, #tpu.memory_space<smem>>
    %620 = vector.broadcast %619 : f32 to vector<1x16x16xf32>
    %621 = arith.addf %618, %620 : vector<1x16x16xf32>
    %c30_95 = arith.constant 30 : index
    %622 = memref.load %arg3[%c30_95] : memref<64xf32, #tpu.memory_space<smem>>
    %cst_96 = arith.constant 0.000000e+00 : f32
    %623 = vector.broadcast %cst_96 : f32 to vector<1x16x16xf32>
    %624 = arith.maximumf %621, %623 : vector<1x16x16xf32>
    %625 = vector.broadcast %622 : f32 to vector<1x16x16xf32>
    %626 = arith.mulf %625, %624 : vector<1x16x16xf32>
    %627 = arith.addf %607, %626 : vector<1x16x16xf32>
    %c93 = arith.constant 93 : index
    %628 = memref.load %arg1[%c93] : memref<192xf32, #tpu.memory_space<smem>>
    %629 = vector.broadcast %628 : f32 to vector<1x16x16xf32>
    %630 = arith.mulf %629, %2 : vector<1x16x16xf32>
    %c94 = arith.constant 94 : index
    %631 = memref.load %arg1[%c94] : memref<192xf32, #tpu.memory_space<smem>>
    %632 = vector.broadcast %631 : f32 to vector<1x16x16xf32>
    %633 = arith.mulf %632, %4 : vector<1x16x16xf32>
    %634 = arith.addf %630, %633 : vector<1x16x16xf32>
    %c95 = arith.constant 95 : index
    %635 = memref.load %arg1[%c95] : memref<192xf32, #tpu.memory_space<smem>>
    %636 = vector.broadcast %635 : f32 to vector<1x16x16xf32>
    %637 = arith.mulf %636, %6 : vector<1x16x16xf32>
    %638 = arith.addf %634, %637 : vector<1x16x16xf32>
    %c31_97 = arith.constant 31 : index
    %639 = memref.load %arg2[%c31_97] : memref<64xf32, #tpu.memory_space<smem>>
    %640 = vector.broadcast %639 : f32 to vector<1x16x16xf32>
    %641 = arith.addf %638, %640 : vector<1x16x16xf32>
    %c31_98 = arith.constant 31 : index
    %642 = memref.load %arg3[%c31_98] : memref<64xf32, #tpu.memory_space<smem>>
    %cst_99 = arith.constant 0.000000e+00 : f32
    %643 = vector.broadcast %cst_99 : f32 to vector<1x16x16xf32>
    %644 = arith.maximumf %641, %643 : vector<1x16x16xf32>
    %645 = vector.broadcast %642 : f32 to vector<1x16x16xf32>
    %646 = arith.mulf %645, %644 : vector<1x16x16xf32>
    %647 = arith.addf %627, %646 : vector<1x16x16xf32>
    %c96 = arith.constant 96 : index
    %648 = memref.load %arg1[%c96] : memref<192xf32, #tpu.memory_space<smem>>
    %649 = vector.broadcast %648 : f32 to vector<1x16x16xf32>
    %650 = arith.mulf %649, %2 : vector<1x16x16xf32>
    %c97 = arith.constant 97 : index
    %651 = memref.load %arg1[%c97] : memref<192xf32, #tpu.memory_space<smem>>
    %652 = vector.broadcast %651 : f32 to vector<1x16x16xf32>
    %653 = arith.mulf %652, %4 : vector<1x16x16xf32>
    %654 = arith.addf %650, %653 : vector<1x16x16xf32>
    %c98 = arith.constant 98 : index
    %655 = memref.load %arg1[%c98] : memref<192xf32, #tpu.memory_space<smem>>
    %656 = vector.broadcast %655 : f32 to vector<1x16x16xf32>
    %657 = arith.mulf %656, %6 : vector<1x16x16xf32>
    %658 = arith.addf %654, %657 : vector<1x16x16xf32>
    %c32_100 = arith.constant 32 : index
    %659 = memref.load %arg2[%c32_100] : memref<64xf32, #tpu.memory_space<smem>>
    %660 = vector.broadcast %659 : f32 to vector<1x16x16xf32>
    %661 = arith.addf %658, %660 : vector<1x16x16xf32>
    %c32_101 = arith.constant 32 : index
    %662 = memref.load %arg3[%c32_101] : memref<64xf32, #tpu.memory_space<smem>>
    %cst_102 = arith.constant 0.000000e+00 : f32
    %663 = vector.broadcast %cst_102 : f32 to vector<1x16x16xf32>
    %664 = arith.maximumf %661, %663 : vector<1x16x16xf32>
    %665 = vector.broadcast %662 : f32 to vector<1x16x16xf32>
    %666 = arith.mulf %665, %664 : vector<1x16x16xf32>
    %667 = arith.addf %647, %666 : vector<1x16x16xf32>
    %c99 = arith.constant 99 : index
    %668 = memref.load %arg1[%c99] : memref<192xf32, #tpu.memory_space<smem>>
    %669 = vector.broadcast %668 : f32 to vector<1x16x16xf32>
    %670 = arith.mulf %669, %2 : vector<1x16x16xf32>
    %c100 = arith.constant 100 : index
    %671 = memref.load %arg1[%c100] : memref<192xf32, #tpu.memory_space<smem>>
    %672 = vector.broadcast %671 : f32 to vector<1x16x16xf32>
    %673 = arith.mulf %672, %4 : vector<1x16x16xf32>
    %674 = arith.addf %670, %673 : vector<1x16x16xf32>
    %c101 = arith.constant 101 : index
    %675 = memref.load %arg1[%c101] : memref<192xf32, #tpu.memory_space<smem>>
    %676 = vector.broadcast %675 : f32 to vector<1x16x16xf32>
    %677 = arith.mulf %676, %6 : vector<1x16x16xf32>
    %678 = arith.addf %674, %677 : vector<1x16x16xf32>
    %c33_103 = arith.constant 33 : index
    %679 = memref.load %arg2[%c33_103] : memref<64xf32, #tpu.memory_space<smem>>
    %680 = vector.broadcast %679 : f32 to vector<1x16x16xf32>
    %681 = arith.addf %678, %680 : vector<1x16x16xf32>
    %c33_104 = arith.constant 33 : index
    %682 = memref.load %arg3[%c33_104] : memref<64xf32, #tpu.memory_space<smem>>
    %cst_105 = arith.constant 0.000000e+00 : f32
    %683 = vector.broadcast %cst_105 : f32 to vector<1x16x16xf32>
    %684 = arith.maximumf %681, %683 : vector<1x16x16xf32>
    %685 = vector.broadcast %682 : f32 to vector<1x16x16xf32>
    %686 = arith.mulf %685, %684 : vector<1x16x16xf32>
    %687 = arith.addf %667, %686 : vector<1x16x16xf32>
    %c102 = arith.constant 102 : index
    %688 = memref.load %arg1[%c102] : memref<192xf32, #tpu.memory_space<smem>>
    %689 = vector.broadcast %688 : f32 to vector<1x16x16xf32>
    %690 = arith.mulf %689, %2 : vector<1x16x16xf32>
    %c103 = arith.constant 103 : index
    %691 = memref.load %arg1[%c103] : memref<192xf32, #tpu.memory_space<smem>>
    %692 = vector.broadcast %691 : f32 to vector<1x16x16xf32>
    %693 = arith.mulf %692, %4 : vector<1x16x16xf32>
    %694 = arith.addf %690, %693 : vector<1x16x16xf32>
    %c104 = arith.constant 104 : index
    %695 = memref.load %arg1[%c104] : memref<192xf32, #tpu.memory_space<smem>>
    %696 = vector.broadcast %695 : f32 to vector<1x16x16xf32>
    %697 = arith.mulf %696, %6 : vector<1x16x16xf32>
    %698 = arith.addf %694, %697 : vector<1x16x16xf32>
    %c34_106 = arith.constant 34 : index
    %699 = memref.load %arg2[%c34_106] : memref<64xf32, #tpu.memory_space<smem>>
    %700 = vector.broadcast %699 : f32 to vector<1x16x16xf32>
    %701 = arith.addf %698, %700 : vector<1x16x16xf32>
    %c34_107 = arith.constant 34 : index
    %702 = memref.load %arg3[%c34_107] : memref<64xf32, #tpu.memory_space<smem>>
    %cst_108 = arith.constant 0.000000e+00 : f32
    %703 = vector.broadcast %cst_108 : f32 to vector<1x16x16xf32>
    %704 = arith.maximumf %701, %703 : vector<1x16x16xf32>
    %705 = vector.broadcast %702 : f32 to vector<1x16x16xf32>
    %706 = arith.mulf %705, %704 : vector<1x16x16xf32>
    %707 = arith.addf %687, %706 : vector<1x16x16xf32>
    %c105 = arith.constant 105 : index
    %708 = memref.load %arg1[%c105] : memref<192xf32, #tpu.memory_space<smem>>
    %709 = vector.broadcast %708 : f32 to vector<1x16x16xf32>
    %710 = arith.mulf %709, %2 : vector<1x16x16xf32>
    %c106 = arith.constant 106 : index
    %711 = memref.load %arg1[%c106] : memref<192xf32, #tpu.memory_space<smem>>
    %712 = vector.broadcast %711 : f32 to vector<1x16x16xf32>
    %713 = arith.mulf %712, %4 : vector<1x16x16xf32>
    %714 = arith.addf %710, %713 : vector<1x16x16xf32>
    %c107 = arith.constant 107 : index
    %715 = memref.load %arg1[%c107] : memref<192xf32, #tpu.memory_space<smem>>
    %716 = vector.broadcast %715 : f32 to vector<1x16x16xf32>
    %717 = arith.mulf %716, %6 : vector<1x16x16xf32>
    %718 = arith.addf %714, %717 : vector<1x16x16xf32>
    %c35_109 = arith.constant 35 : index
    %719 = memref.load %arg2[%c35_109] : memref<64xf32, #tpu.memory_space<smem>>
    %720 = vector.broadcast %719 : f32 to vector<1x16x16xf32>
    %721 = arith.addf %718, %720 : vector<1x16x16xf32>
    %c35_110 = arith.constant 35 : index
    %722 = memref.load %arg3[%c35_110] : memref<64xf32, #tpu.memory_space<smem>>
    %cst_111 = arith.constant 0.000000e+00 : f32
    %723 = vector.broadcast %cst_111 : f32 to vector<1x16x16xf32>
    %724 = arith.maximumf %721, %723 : vector<1x16x16xf32>
    %725 = vector.broadcast %722 : f32 to vector<1x16x16xf32>
    %726 = arith.mulf %725, %724 : vector<1x16x16xf32>
    %727 = arith.addf %707, %726 : vector<1x16x16xf32>
    %c108 = arith.constant 108 : index
    %728 = memref.load %arg1[%c108] : memref<192xf32, #tpu.memory_space<smem>>
    %729 = vector.broadcast %728 : f32 to vector<1x16x16xf32>
    %730 = arith.mulf %729, %2 : vector<1x16x16xf32>
    %c109 = arith.constant 109 : index
    %731 = memref.load %arg1[%c109] : memref<192xf32, #tpu.memory_space<smem>>
    %732 = vector.broadcast %731 : f32 to vector<1x16x16xf32>
    %733 = arith.mulf %732, %4 : vector<1x16x16xf32>
    %734 = arith.addf %730, %733 : vector<1x16x16xf32>
    %c110 = arith.constant 110 : index
    %735 = memref.load %arg1[%c110] : memref<192xf32, #tpu.memory_space<smem>>
    %736 = vector.broadcast %735 : f32 to vector<1x16x16xf32>
    %737 = arith.mulf %736, %6 : vector<1x16x16xf32>
    %738 = arith.addf %734, %737 : vector<1x16x16xf32>
    %c36_112 = arith.constant 36 : index
    %739 = memref.load %arg2[%c36_112] : memref<64xf32, #tpu.memory_space<smem>>
    %740 = vector.broadcast %739 : f32 to vector<1x16x16xf32>
    %741 = arith.addf %738, %740 : vector<1x16x16xf32>
    %c36_113 = arith.constant 36 : index
    %742 = memref.load %arg3[%c36_113] : memref<64xf32, #tpu.memory_space<smem>>
    %cst_114 = arith.constant 0.000000e+00 : f32
    %743 = vector.broadcast %cst_114 : f32 to vector<1x16x16xf32>
    %744 = arith.maximumf %741, %743 : vector<1x16x16xf32>
    %745 = vector.broadcast %742 : f32 to vector<1x16x16xf32>
    %746 = arith.mulf %745, %744 : vector<1x16x16xf32>
    %747 = arith.addf %727, %746 : vector<1x16x16xf32>
    %c111 = arith.constant 111 : index
    %748 = memref.load %arg1[%c111] : memref<192xf32, #tpu.memory_space<smem>>
    %749 = vector.broadcast %748 : f32 to vector<1x16x16xf32>
    %750 = arith.mulf %749, %2 : vector<1x16x16xf32>
    %c112 = arith.constant 112 : index
    %751 = memref.load %arg1[%c112] : memref<192xf32, #tpu.memory_space<smem>>
    %752 = vector.broadcast %751 : f32 to vector<1x16x16xf32>
    %753 = arith.mulf %752, %4 : vector<1x16x16xf32>
    %754 = arith.addf %750, %753 : vector<1x16x16xf32>
    %c113 = arith.constant 113 : index
    %755 = memref.load %arg1[%c113] : memref<192xf32, #tpu.memory_space<smem>>
    %756 = vector.broadcast %755 : f32 to vector<1x16x16xf32>
    %757 = arith.mulf %756, %6 : vector<1x16x16xf32>
    %758 = arith.addf %754, %757 : vector<1x16x16xf32>
    %c37_115 = arith.constant 37 : index
    %759 = memref.load %arg2[%c37_115] : memref<64xf32, #tpu.memory_space<smem>>
    %760 = vector.broadcast %759 : f32 to vector<1x16x16xf32>
    %761 = arith.addf %758, %760 : vector<1x16x16xf32>
    %c37_116 = arith.constant 37 : index
    %762 = memref.load %arg3[%c37_116] : memref<64xf32, #tpu.memory_space<smem>>
    %cst_117 = arith.constant 0.000000e+00 : f32
    %763 = vector.broadcast %cst_117 : f32 to vector<1x16x16xf32>
    %764 = arith.maximumf %761, %763 : vector<1x16x16xf32>
    %765 = vector.broadcast %762 : f32 to vector<1x16x16xf32>
    %766 = arith.mulf %765, %764 : vector<1x16x16xf32>
    %767 = arith.addf %747, %766 : vector<1x16x16xf32>
    %c114 = arith.constant 114 : index
    %768 = memref.load %arg1[%c114] : memref<192xf32, #tpu.memory_space<smem>>
    %769 = vector.broadcast %768 : f32 to vector<1x16x16xf32>
    %770 = arith.mulf %769, %2 : vector<1x16x16xf32>
    %c115 = arith.constant 115 : index
    %771 = memref.load %arg1[%c115] : memref<192xf32, #tpu.memory_space<smem>>
    %772 = vector.broadcast %771 : f32 to vector<1x16x16xf32>
    %773 = arith.mulf %772, %4 : vector<1x16x16xf32>
    %774 = arith.addf %770, %773 : vector<1x16x16xf32>
    %c116 = arith.constant 116 : index
    %775 = memref.load %arg1[%c116] : memref<192xf32, #tpu.memory_space<smem>>
    %776 = vector.broadcast %775 : f32 to vector<1x16x16xf32>
    %777 = arith.mulf %776, %6 : vector<1x16x16xf32>
    %778 = arith.addf %774, %777 : vector<1x16x16xf32>
    %c38_118 = arith.constant 38 : index
    %779 = memref.load %arg2[%c38_118] : memref<64xf32, #tpu.memory_space<smem>>
    %780 = vector.broadcast %779 : f32 to vector<1x16x16xf32>
    %781 = arith.addf %778, %780 : vector<1x16x16xf32>
    %c38_119 = arith.constant 38 : index
    %782 = memref.load %arg3[%c38_119] : memref<64xf32, #tpu.memory_space<smem>>
    %cst_120 = arith.constant 0.000000e+00 : f32
    %783 = vector.broadcast %cst_120 : f32 to vector<1x16x16xf32>
    %784 = arith.maximumf %781, %783 : vector<1x16x16xf32>
    %785 = vector.broadcast %782 : f32 to vector<1x16x16xf32>
    %786 = arith.mulf %785, %784 : vector<1x16x16xf32>
    %787 = arith.addf %767, %786 : vector<1x16x16xf32>
    %c117 = arith.constant 117 : index
    %788 = memref.load %arg1[%c117] : memref<192xf32, #tpu.memory_space<smem>>
    %789 = vector.broadcast %788 : f32 to vector<1x16x16xf32>
    %790 = arith.mulf %789, %2 : vector<1x16x16xf32>
    %c118 = arith.constant 118 : index
    %791 = memref.load %arg1[%c118] : memref<192xf32, #tpu.memory_space<smem>>
    %792 = vector.broadcast %791 : f32 to vector<1x16x16xf32>
    %793 = arith.mulf %792, %4 : vector<1x16x16xf32>
    %794 = arith.addf %790, %793 : vector<1x16x16xf32>
    %c119 = arith.constant 119 : index
    %795 = memref.load %arg1[%c119] : memref<192xf32, #tpu.memory_space<smem>>
    %796 = vector.broadcast %795 : f32 to vector<1x16x16xf32>
    %797 = arith.mulf %796, %6 : vector<1x16x16xf32>
    %798 = arith.addf %794, %797 : vector<1x16x16xf32>
    %c39_121 = arith.constant 39 : index
    %799 = memref.load %arg2[%c39_121] : memref<64xf32, #tpu.memory_space<smem>>
    %800 = vector.broadcast %799 : f32 to vector<1x16x16xf32>
    %801 = arith.addf %798, %800 : vector<1x16x16xf32>
    %c39_122 = arith.constant 39 : index
    %802 = memref.load %arg3[%c39_122] : memref<64xf32, #tpu.memory_space<smem>>
    %cst_123 = arith.constant 0.000000e+00 : f32
    %803 = vector.broadcast %cst_123 : f32 to vector<1x16x16xf32>
    %804 = arith.maximumf %801, %803 : vector<1x16x16xf32>
    %805 = vector.broadcast %802 : f32 to vector<1x16x16xf32>
    %806 = arith.mulf %805, %804 : vector<1x16x16xf32>
    %807 = arith.addf %787, %806 : vector<1x16x16xf32>
    %c120 = arith.constant 120 : index
    %808 = memref.load %arg1[%c120] : memref<192xf32, #tpu.memory_space<smem>>
    %809 = vector.broadcast %808 : f32 to vector<1x16x16xf32>
    %810 = arith.mulf %809, %2 : vector<1x16x16xf32>
    %c121 = arith.constant 121 : index
    %811 = memref.load %arg1[%c121] : memref<192xf32, #tpu.memory_space<smem>>
    %812 = vector.broadcast %811 : f32 to vector<1x16x16xf32>
    %813 = arith.mulf %812, %4 : vector<1x16x16xf32>
    %814 = arith.addf %810, %813 : vector<1x16x16xf32>
    %c122 = arith.constant 122 : index
    %815 = memref.load %arg1[%c122] : memref<192xf32, #tpu.memory_space<smem>>
    %816 = vector.broadcast %815 : f32 to vector<1x16x16xf32>
    %817 = arith.mulf %816, %6 : vector<1x16x16xf32>
    %818 = arith.addf %814, %817 : vector<1x16x16xf32>
    %c40_124 = arith.constant 40 : index
    %819 = memref.load %arg2[%c40_124] : memref<64xf32, #tpu.memory_space<smem>>
    %820 = vector.broadcast %819 : f32 to vector<1x16x16xf32>
    %821 = arith.addf %818, %820 : vector<1x16x16xf32>
    %c40_125 = arith.constant 40 : index
    %822 = memref.load %arg3[%c40_125] : memref<64xf32, #tpu.memory_space<smem>>
    %cst_126 = arith.constant 0.000000e+00 : f32
    %823 = vector.broadcast %cst_126 : f32 to vector<1x16x16xf32>
    %824 = arith.maximumf %821, %823 : vector<1x16x16xf32>
    %825 = vector.broadcast %822 : f32 to vector<1x16x16xf32>
    %826 = arith.mulf %825, %824 : vector<1x16x16xf32>
    %827 = arith.addf %807, %826 : vector<1x16x16xf32>
    %c123 = arith.constant 123 : index
    %828 = memref.load %arg1[%c123] : memref<192xf32, #tpu.memory_space<smem>>
    %829 = vector.broadcast %828 : f32 to vector<1x16x16xf32>
    %830 = arith.mulf %829, %2 : vector<1x16x16xf32>
    %c124 = arith.constant 124 : index
    %831 = memref.load %arg1[%c124] : memref<192xf32, #tpu.memory_space<smem>>
    %832 = vector.broadcast %831 : f32 to vector<1x16x16xf32>
    %833 = arith.mulf %832, %4 : vector<1x16x16xf32>
    %834 = arith.addf %830, %833 : vector<1x16x16xf32>
    %c125 = arith.constant 125 : index
    %835 = memref.load %arg1[%c125] : memref<192xf32, #tpu.memory_space<smem>>
    %836 = vector.broadcast %835 : f32 to vector<1x16x16xf32>
    %837 = arith.mulf %836, %6 : vector<1x16x16xf32>
    %838 = arith.addf %834, %837 : vector<1x16x16xf32>
    %c41_127 = arith.constant 41 : index
    %839 = memref.load %arg2[%c41_127] : memref<64xf32, #tpu.memory_space<smem>>
    %840 = vector.broadcast %839 : f32 to vector<1x16x16xf32>
    %841 = arith.addf %838, %840 : vector<1x16x16xf32>
    %c41_128 = arith.constant 41 : index
    %842 = memref.load %arg3[%c41_128] : memref<64xf32, #tpu.memory_space<smem>>
    %cst_129 = arith.constant 0.000000e+00 : f32
    %843 = vector.broadcast %cst_129 : f32 to vector<1x16x16xf32>
    %844 = arith.maximumf %841, %843 : vector<1x16x16xf32>
    %845 = vector.broadcast %842 : f32 to vector<1x16x16xf32>
    %846 = arith.mulf %845, %844 : vector<1x16x16xf32>
    %847 = arith.addf %827, %846 : vector<1x16x16xf32>
    %c126 = arith.constant 126 : index
    %848 = memref.load %arg1[%c126] : memref<192xf32, #tpu.memory_space<smem>>
    %849 = vector.broadcast %848 : f32 to vector<1x16x16xf32>
    %850 = arith.mulf %849, %2 : vector<1x16x16xf32>
    %c127 = arith.constant 127 : index
    %851 = memref.load %arg1[%c127] : memref<192xf32, #tpu.memory_space<smem>>
    %852 = vector.broadcast %851 : f32 to vector<1x16x16xf32>
    %853 = arith.mulf %852, %4 : vector<1x16x16xf32>
    %854 = arith.addf %850, %853 : vector<1x16x16xf32>
    %c128 = arith.constant 128 : index
    %855 = memref.load %arg1[%c128] : memref<192xf32, #tpu.memory_space<smem>>
    %856 = vector.broadcast %855 : f32 to vector<1x16x16xf32>
    %857 = arith.mulf %856, %6 : vector<1x16x16xf32>
    %858 = arith.addf %854, %857 : vector<1x16x16xf32>
    %c42_130 = arith.constant 42 : index
    %859 = memref.load %arg2[%c42_130] : memref<64xf32, #tpu.memory_space<smem>>
    %860 = vector.broadcast %859 : f32 to vector<1x16x16xf32>
    %861 = arith.addf %858, %860 : vector<1x16x16xf32>
    %c42_131 = arith.constant 42 : index
    %862 = memref.load %arg3[%c42_131] : memref<64xf32, #tpu.memory_space<smem>>
    %cst_132 = arith.constant 0.000000e+00 : f32
    %863 = vector.broadcast %cst_132 : f32 to vector<1x16x16xf32>
    %864 = arith.maximumf %861, %863 : vector<1x16x16xf32>
    %865 = vector.broadcast %862 : f32 to vector<1x16x16xf32>
    %866 = arith.mulf %865, %864 : vector<1x16x16xf32>
    %867 = arith.addf %847, %866 : vector<1x16x16xf32>
    %c129 = arith.constant 129 : index
    %868 = memref.load %arg1[%c129] : memref<192xf32, #tpu.memory_space<smem>>
    %869 = vector.broadcast %868 : f32 to vector<1x16x16xf32>
    %870 = arith.mulf %869, %2 : vector<1x16x16xf32>
    %c130 = arith.constant 130 : index
    %871 = memref.load %arg1[%c130] : memref<192xf32, #tpu.memory_space<smem>>
    %872 = vector.broadcast %871 : f32 to vector<1x16x16xf32>
    %873 = arith.mulf %872, %4 : vector<1x16x16xf32>
    %874 = arith.addf %870, %873 : vector<1x16x16xf32>
    %c131 = arith.constant 131 : index
    %875 = memref.load %arg1[%c131] : memref<192xf32, #tpu.memory_space<smem>>
    %876 = vector.broadcast %875 : f32 to vector<1x16x16xf32>
    %877 = arith.mulf %876, %6 : vector<1x16x16xf32>
    %878 = arith.addf %874, %877 : vector<1x16x16xf32>
    %c43_133 = arith.constant 43 : index
    %879 = memref.load %arg2[%c43_133] : memref<64xf32, #tpu.memory_space<smem>>
    %880 = vector.broadcast %879 : f32 to vector<1x16x16xf32>
    %881 = arith.addf %878, %880 : vector<1x16x16xf32>
    %c43_134 = arith.constant 43 : index
    %882 = memref.load %arg3[%c43_134] : memref<64xf32, #tpu.memory_space<smem>>
    %cst_135 = arith.constant 0.000000e+00 : f32
    %883 = vector.broadcast %cst_135 : f32 to vector<1x16x16xf32>
    %884 = arith.maximumf %881, %883 : vector<1x16x16xf32>
    %885 = vector.broadcast %882 : f32 to vector<1x16x16xf32>
    %886 = arith.mulf %885, %884 : vector<1x16x16xf32>
    %887 = arith.addf %867, %886 : vector<1x16x16xf32>
    %c132 = arith.constant 132 : index
    %888 = memref.load %arg1[%c132] : memref<192xf32, #tpu.memory_space<smem>>
    %889 = vector.broadcast %888 : f32 to vector<1x16x16xf32>
    %890 = arith.mulf %889, %2 : vector<1x16x16xf32>
    %c133 = arith.constant 133 : index
    %891 = memref.load %arg1[%c133] : memref<192xf32, #tpu.memory_space<smem>>
    %892 = vector.broadcast %891 : f32 to vector<1x16x16xf32>
    %893 = arith.mulf %892, %4 : vector<1x16x16xf32>
    %894 = arith.addf %890, %893 : vector<1x16x16xf32>
    %c134 = arith.constant 134 : index
    %895 = memref.load %arg1[%c134] : memref<192xf32, #tpu.memory_space<smem>>
    %896 = vector.broadcast %895 : f32 to vector<1x16x16xf32>
    %897 = arith.mulf %896, %6 : vector<1x16x16xf32>
    %898 = arith.addf %894, %897 : vector<1x16x16xf32>
    %c44_136 = arith.constant 44 : index
    %899 = memref.load %arg2[%c44_136] : memref<64xf32, #tpu.memory_space<smem>>
    %900 = vector.broadcast %899 : f32 to vector<1x16x16xf32>
    %901 = arith.addf %898, %900 : vector<1x16x16xf32>
    %c44_137 = arith.constant 44 : index
    %902 = memref.load %arg3[%c44_137] : memref<64xf32, #tpu.memory_space<smem>>
    %cst_138 = arith.constant 0.000000e+00 : f32
    %903 = vector.broadcast %cst_138 : f32 to vector<1x16x16xf32>
    %904 = arith.maximumf %901, %903 : vector<1x16x16xf32>
    %905 = vector.broadcast %902 : f32 to vector<1x16x16xf32>
    %906 = arith.mulf %905, %904 : vector<1x16x16xf32>
    %907 = arith.addf %887, %906 : vector<1x16x16xf32>
    %c135 = arith.constant 135 : index
    %908 = memref.load %arg1[%c135] : memref<192xf32, #tpu.memory_space<smem>>
    %909 = vector.broadcast %908 : f32 to vector<1x16x16xf32>
    %910 = arith.mulf %909, %2 : vector<1x16x16xf32>
    %c136 = arith.constant 136 : index
    %911 = memref.load %arg1[%c136] : memref<192xf32, #tpu.memory_space<smem>>
    %912 = vector.broadcast %911 : f32 to vector<1x16x16xf32>
    %913 = arith.mulf %912, %4 : vector<1x16x16xf32>
    %914 = arith.addf %910, %913 : vector<1x16x16xf32>
    %c137 = arith.constant 137 : index
    %915 = memref.load %arg1[%c137] : memref<192xf32, #tpu.memory_space<smem>>
    %916 = vector.broadcast %915 : f32 to vector<1x16x16xf32>
    %917 = arith.mulf %916, %6 : vector<1x16x16xf32>
    %918 = arith.addf %914, %917 : vector<1x16x16xf32>
    %c45_139 = arith.constant 45 : index
    %919 = memref.load %arg2[%c45_139] : memref<64xf32, #tpu.memory_space<smem>>
    %920 = vector.broadcast %919 : f32 to vector<1x16x16xf32>
    %921 = arith.addf %918, %920 : vector<1x16x16xf32>
    %c45_140 = arith.constant 45 : index
    %922 = memref.load %arg3[%c45_140] : memref<64xf32, #tpu.memory_space<smem>>
    %cst_141 = arith.constant 0.000000e+00 : f32
    %923 = vector.broadcast %cst_141 : f32 to vector<1x16x16xf32>
    %924 = arith.maximumf %921, %923 : vector<1x16x16xf32>
    %925 = vector.broadcast %922 : f32 to vector<1x16x16xf32>
    %926 = arith.mulf %925, %924 : vector<1x16x16xf32>
    %927 = arith.addf %907, %926 : vector<1x16x16xf32>
    %c138 = arith.constant 138 : index
    %928 = memref.load %arg1[%c138] : memref<192xf32, #tpu.memory_space<smem>>
    %929 = vector.broadcast %928 : f32 to vector<1x16x16xf32>
    %930 = arith.mulf %929, %2 : vector<1x16x16xf32>
    %c139 = arith.constant 139 : index
    %931 = memref.load %arg1[%c139] : memref<192xf32, #tpu.memory_space<smem>>
    %932 = vector.broadcast %931 : f32 to vector<1x16x16xf32>
    %933 = arith.mulf %932, %4 : vector<1x16x16xf32>
    %934 = arith.addf %930, %933 : vector<1x16x16xf32>
    %c140 = arith.constant 140 : index
    %935 = memref.load %arg1[%c140] : memref<192xf32, #tpu.memory_space<smem>>
    %936 = vector.broadcast %935 : f32 to vector<1x16x16xf32>
    %937 = arith.mulf %936, %6 : vector<1x16x16xf32>
    %938 = arith.addf %934, %937 : vector<1x16x16xf32>
    %c46_142 = arith.constant 46 : index
    %939 = memref.load %arg2[%c46_142] : memref<64xf32, #tpu.memory_space<smem>>
    %940 = vector.broadcast %939 : f32 to vector<1x16x16xf32>
    %941 = arith.addf %938, %940 : vector<1x16x16xf32>
    %c46_143 = arith.constant 46 : index
    %942 = memref.load %arg3[%c46_143] : memref<64xf32, #tpu.memory_space<smem>>
    %cst_144 = arith.constant 0.000000e+00 : f32
    %943 = vector.broadcast %cst_144 : f32 to vector<1x16x16xf32>
    %944 = arith.maximumf %941, %943 : vector<1x16x16xf32>
    %945 = vector.broadcast %942 : f32 to vector<1x16x16xf32>
    %946 = arith.mulf %945, %944 : vector<1x16x16xf32>
    %947 = arith.addf %927, %946 : vector<1x16x16xf32>
    %c141 = arith.constant 141 : index
    %948 = memref.load %arg1[%c141] : memref<192xf32, #tpu.memory_space<smem>>
    %949 = vector.broadcast %948 : f32 to vector<1x16x16xf32>
    %950 = arith.mulf %949, %2 : vector<1x16x16xf32>
    %c142 = arith.constant 142 : index
    %951 = memref.load %arg1[%c142] : memref<192xf32, #tpu.memory_space<smem>>
    %952 = vector.broadcast %951 : f32 to vector<1x16x16xf32>
    %953 = arith.mulf %952, %4 : vector<1x16x16xf32>
    %954 = arith.addf %950, %953 : vector<1x16x16xf32>
    %c143 = arith.constant 143 : index
    %955 = memref.load %arg1[%c143] : memref<192xf32, #tpu.memory_space<smem>>
    %956 = vector.broadcast %955 : f32 to vector<1x16x16xf32>
    %957 = arith.mulf %956, %6 : vector<1x16x16xf32>
    %958 = arith.addf %954, %957 : vector<1x16x16xf32>
    %c47_145 = arith.constant 47 : index
    %959 = memref.load %arg2[%c47_145] : memref<64xf32, #tpu.memory_space<smem>>
    %960 = vector.broadcast %959 : f32 to vector<1x16x16xf32>
    %961 = arith.addf %958, %960 : vector<1x16x16xf32>
    %c47_146 = arith.constant 47 : index
    %962 = memref.load %arg3[%c47_146] : memref<64xf32, #tpu.memory_space<smem>>
    %cst_147 = arith.constant 0.000000e+00 : f32
    %963 = vector.broadcast %cst_147 : f32 to vector<1x16x16xf32>
    %964 = arith.maximumf %961, %963 : vector<1x16x16xf32>
    %965 = vector.broadcast %962 : f32 to vector<1x16x16xf32>
    %966 = arith.mulf %965, %964 : vector<1x16x16xf32>
    %967 = arith.addf %947, %966 : vector<1x16x16xf32>
    %c144 = arith.constant 144 : index
    %968 = memref.load %arg1[%c144] : memref<192xf32, #tpu.memory_space<smem>>
    %969 = vector.broadcast %968 : f32 to vector<1x16x16xf32>
    %970 = arith.mulf %969, %2 : vector<1x16x16xf32>
    %c145 = arith.constant 145 : index
    %971 = memref.load %arg1[%c145] : memref<192xf32, #tpu.memory_space<smem>>
    %972 = vector.broadcast %971 : f32 to vector<1x16x16xf32>
    %973 = arith.mulf %972, %4 : vector<1x16x16xf32>
    %974 = arith.addf %970, %973 : vector<1x16x16xf32>
    %c146 = arith.constant 146 : index
    %975 = memref.load %arg1[%c146] : memref<192xf32, #tpu.memory_space<smem>>
    %976 = vector.broadcast %975 : f32 to vector<1x16x16xf32>
    %977 = arith.mulf %976, %6 : vector<1x16x16xf32>
    %978 = arith.addf %974, %977 : vector<1x16x16xf32>
    %c48_148 = arith.constant 48 : index
    %979 = memref.load %arg2[%c48_148] : memref<64xf32, #tpu.memory_space<smem>>
    %980 = vector.broadcast %979 : f32 to vector<1x16x16xf32>
    %981 = arith.addf %978, %980 : vector<1x16x16xf32>
    %c48_149 = arith.constant 48 : index
    %982 = memref.load %arg3[%c48_149] : memref<64xf32, #tpu.memory_space<smem>>
    %cst_150 = arith.constant 0.000000e+00 : f32
    %983 = vector.broadcast %cst_150 : f32 to vector<1x16x16xf32>
    %984 = arith.maximumf %981, %983 : vector<1x16x16xf32>
    %985 = vector.broadcast %982 : f32 to vector<1x16x16xf32>
    %986 = arith.mulf %985, %984 : vector<1x16x16xf32>
    %987 = arith.addf %967, %986 : vector<1x16x16xf32>
    %c147 = arith.constant 147 : index
    %988 = memref.load %arg1[%c147] : memref<192xf32, #tpu.memory_space<smem>>
    %989 = vector.broadcast %988 : f32 to vector<1x16x16xf32>
    %990 = arith.mulf %989, %2 : vector<1x16x16xf32>
    %c148 = arith.constant 148 : index
    %991 = memref.load %arg1[%c148] : memref<192xf32, #tpu.memory_space<smem>>
    %992 = vector.broadcast %991 : f32 to vector<1x16x16xf32>
    %993 = arith.mulf %992, %4 : vector<1x16x16xf32>
    %994 = arith.addf %990, %993 : vector<1x16x16xf32>
    %c149 = arith.constant 149 : index
    %995 = memref.load %arg1[%c149] : memref<192xf32, #tpu.memory_space<smem>>
    %996 = vector.broadcast %995 : f32 to vector<1x16x16xf32>
    %997 = arith.mulf %996, %6 : vector<1x16x16xf32>
    %998 = arith.addf %994, %997 : vector<1x16x16xf32>
    %c49_151 = arith.constant 49 : index
    %999 = memref.load %arg2[%c49_151] : memref<64xf32, #tpu.memory_space<smem>>
    %1000 = vector.broadcast %999 : f32 to vector<1x16x16xf32>
    %1001 = arith.addf %998, %1000 : vector<1x16x16xf32>
    %c49_152 = arith.constant 49 : index
    %1002 = memref.load %arg3[%c49_152] : memref<64xf32, #tpu.memory_space<smem>>
    %cst_153 = arith.constant 0.000000e+00 : f32
    %1003 = vector.broadcast %cst_153 : f32 to vector<1x16x16xf32>
    %1004 = arith.maximumf %1001, %1003 : vector<1x16x16xf32>
    %1005 = vector.broadcast %1002 : f32 to vector<1x16x16xf32>
    %1006 = arith.mulf %1005, %1004 : vector<1x16x16xf32>
    %1007 = arith.addf %987, %1006 : vector<1x16x16xf32>
    %c150 = arith.constant 150 : index
    %1008 = memref.load %arg1[%c150] : memref<192xf32, #tpu.memory_space<smem>>
    %1009 = vector.broadcast %1008 : f32 to vector<1x16x16xf32>
    %1010 = arith.mulf %1009, %2 : vector<1x16x16xf32>
    %c151 = arith.constant 151 : index
    %1011 = memref.load %arg1[%c151] : memref<192xf32, #tpu.memory_space<smem>>
    %1012 = vector.broadcast %1011 : f32 to vector<1x16x16xf32>
    %1013 = arith.mulf %1012, %4 : vector<1x16x16xf32>
    %1014 = arith.addf %1010, %1013 : vector<1x16x16xf32>
    %c152 = arith.constant 152 : index
    %1015 = memref.load %arg1[%c152] : memref<192xf32, #tpu.memory_space<smem>>
    %1016 = vector.broadcast %1015 : f32 to vector<1x16x16xf32>
    %1017 = arith.mulf %1016, %6 : vector<1x16x16xf32>
    %1018 = arith.addf %1014, %1017 : vector<1x16x16xf32>
    %c50_154 = arith.constant 50 : index
    %1019 = memref.load %arg2[%c50_154] : memref<64xf32, #tpu.memory_space<smem>>
    %1020 = vector.broadcast %1019 : f32 to vector<1x16x16xf32>
    %1021 = arith.addf %1018, %1020 : vector<1x16x16xf32>
    %c50_155 = arith.constant 50 : index
    %1022 = memref.load %arg3[%c50_155] : memref<64xf32, #tpu.memory_space<smem>>
    %cst_156 = arith.constant 0.000000e+00 : f32
    %1023 = vector.broadcast %cst_156 : f32 to vector<1x16x16xf32>
    %1024 = arith.maximumf %1021, %1023 : vector<1x16x16xf32>
    %1025 = vector.broadcast %1022 : f32 to vector<1x16x16xf32>
    %1026 = arith.mulf %1025, %1024 : vector<1x16x16xf32>
    %1027 = arith.addf %1007, %1026 : vector<1x16x16xf32>
    %c153 = arith.constant 153 : index
    %1028 = memref.load %arg1[%c153] : memref<192xf32, #tpu.memory_space<smem>>
    %1029 = vector.broadcast %1028 : f32 to vector<1x16x16xf32>
    %1030 = arith.mulf %1029, %2 : vector<1x16x16xf32>
    %c154 = arith.constant 154 : index
    %1031 = memref.load %arg1[%c154] : memref<192xf32, #tpu.memory_space<smem>>
    %1032 = vector.broadcast %1031 : f32 to vector<1x16x16xf32>
    %1033 = arith.mulf %1032, %4 : vector<1x16x16xf32>
    %1034 = arith.addf %1030, %1033 : vector<1x16x16xf32>
    %c155 = arith.constant 155 : index
    %1035 = memref.load %arg1[%c155] : memref<192xf32, #tpu.memory_space<smem>>
    %1036 = vector.broadcast %1035 : f32 to vector<1x16x16xf32>
    %1037 = arith.mulf %1036, %6 : vector<1x16x16xf32>
    %1038 = arith.addf %1034, %1037 : vector<1x16x16xf32>
    %c51_157 = arith.constant 51 : index
    %1039 = memref.load %arg2[%c51_157] : memref<64xf32, #tpu.memory_space<smem>>
    %1040 = vector.broadcast %1039 : f32 to vector<1x16x16xf32>
    %1041 = arith.addf %1038, %1040 : vector<1x16x16xf32>
    %c51_158 = arith.constant 51 : index
    %1042 = memref.load %arg3[%c51_158] : memref<64xf32, #tpu.memory_space<smem>>
    %cst_159 = arith.constant 0.000000e+00 : f32
    %1043 = vector.broadcast %cst_159 : f32 to vector<1x16x16xf32>
    %1044 = arith.maximumf %1041, %1043 : vector<1x16x16xf32>
    %1045 = vector.broadcast %1042 : f32 to vector<1x16x16xf32>
    %1046 = arith.mulf %1045, %1044 : vector<1x16x16xf32>
    %1047 = arith.addf %1027, %1046 : vector<1x16x16xf32>
    %c156 = arith.constant 156 : index
    %1048 = memref.load %arg1[%c156] : memref<192xf32, #tpu.memory_space<smem>>
    %1049 = vector.broadcast %1048 : f32 to vector<1x16x16xf32>
    %1050 = arith.mulf %1049, %2 : vector<1x16x16xf32>
    %c157 = arith.constant 157 : index
    %1051 = memref.load %arg1[%c157] : memref<192xf32, #tpu.memory_space<smem>>
    %1052 = vector.broadcast %1051 : f32 to vector<1x16x16xf32>
    %1053 = arith.mulf %1052, %4 : vector<1x16x16xf32>
    %1054 = arith.addf %1050, %1053 : vector<1x16x16xf32>
    %c158 = arith.constant 158 : index
    %1055 = memref.load %arg1[%c158] : memref<192xf32, #tpu.memory_space<smem>>
    %1056 = vector.broadcast %1055 : f32 to vector<1x16x16xf32>
    %1057 = arith.mulf %1056, %6 : vector<1x16x16xf32>
    %1058 = arith.addf %1054, %1057 : vector<1x16x16xf32>
    %c52_160 = arith.constant 52 : index
    %1059 = memref.load %arg2[%c52_160] : memref<64xf32, #tpu.memory_space<smem>>
    %1060 = vector.broadcast %1059 : f32 to vector<1x16x16xf32>
    %1061 = arith.addf %1058, %1060 : vector<1x16x16xf32>
    %c52_161 = arith.constant 52 : index
    %1062 = memref.load %arg3[%c52_161] : memref<64xf32, #tpu.memory_space<smem>>
    %cst_162 = arith.constant 0.000000e+00 : f32
    %1063 = vector.broadcast %cst_162 : f32 to vector<1x16x16xf32>
    %1064 = arith.maximumf %1061, %1063 : vector<1x16x16xf32>
    %1065 = vector.broadcast %1062 : f32 to vector<1x16x16xf32>
    %1066 = arith.mulf %1065, %1064 : vector<1x16x16xf32>
    %1067 = arith.addf %1047, %1066 : vector<1x16x16xf32>
    %c159 = arith.constant 159 : index
    %1068 = memref.load %arg1[%c159] : memref<192xf32, #tpu.memory_space<smem>>
    %1069 = vector.broadcast %1068 : f32 to vector<1x16x16xf32>
    %1070 = arith.mulf %1069, %2 : vector<1x16x16xf32>
    %c160 = arith.constant 160 : index
    %1071 = memref.load %arg1[%c160] : memref<192xf32, #tpu.memory_space<smem>>
    %1072 = vector.broadcast %1071 : f32 to vector<1x16x16xf32>
    %1073 = arith.mulf %1072, %4 : vector<1x16x16xf32>
    %1074 = arith.addf %1070, %1073 : vector<1x16x16xf32>
    %c161 = arith.constant 161 : index
    %1075 = memref.load %arg1[%c161] : memref<192xf32, #tpu.memory_space<smem>>
    %1076 = vector.broadcast %1075 : f32 to vector<1x16x16xf32>
    %1077 = arith.mulf %1076, %6 : vector<1x16x16xf32>
    %1078 = arith.addf %1074, %1077 : vector<1x16x16xf32>
    %c53_163 = arith.constant 53 : index
    %1079 = memref.load %arg2[%c53_163] : memref<64xf32, #tpu.memory_space<smem>>
    %1080 = vector.broadcast %1079 : f32 to vector<1x16x16xf32>
    %1081 = arith.addf %1078, %1080 : vector<1x16x16xf32>
    %c53_164 = arith.constant 53 : index
    %1082 = memref.load %arg3[%c53_164] : memref<64xf32, #tpu.memory_space<smem>>
    %cst_165 = arith.constant 0.000000e+00 : f32
    %1083 = vector.broadcast %cst_165 : f32 to vector<1x16x16xf32>
    %1084 = arith.maximumf %1081, %1083 : vector<1x16x16xf32>
    %1085 = vector.broadcast %1082 : f32 to vector<1x16x16xf32>
    %1086 = arith.mulf %1085, %1084 : vector<1x16x16xf32>
    %1087 = arith.addf %1067, %1086 : vector<1x16x16xf32>
    %c162 = arith.constant 162 : index
    %1088 = memref.load %arg1[%c162] : memref<192xf32, #tpu.memory_space<smem>>
    %1089 = vector.broadcast %1088 : f32 to vector<1x16x16xf32>
    %1090 = arith.mulf %1089, %2 : vector<1x16x16xf32>
    %c163 = arith.constant 163 : index
    %1091 = memref.load %arg1[%c163] : memref<192xf32, #tpu.memory_space<smem>>
    %1092 = vector.broadcast %1091 : f32 to vector<1x16x16xf32>
    %1093 = arith.mulf %1092, %4 : vector<1x16x16xf32>
    %1094 = arith.addf %1090, %1093 : vector<1x16x16xf32>
    %c164 = arith.constant 164 : index
    %1095 = memref.load %arg1[%c164] : memref<192xf32, #tpu.memory_space<smem>>
    %1096 = vector.broadcast %1095 : f32 to vector<1x16x16xf32>
    %1097 = arith.mulf %1096, %6 : vector<1x16x16xf32>
    %1098 = arith.addf %1094, %1097 : vector<1x16x16xf32>
    %c54_166 = arith.constant 54 : index
    %1099 = memref.load %arg2[%c54_166] : memref<64xf32, #tpu.memory_space<smem>>
    %1100 = vector.broadcast %1099 : f32 to vector<1x16x16xf32>
    %1101 = arith.addf %1098, %1100 : vector<1x16x16xf32>
    %c54_167 = arith.constant 54 : index
    %1102 = memref.load %arg3[%c54_167] : memref<64xf32, #tpu.memory_space<smem>>
    %cst_168 = arith.constant 0.000000e+00 : f32
    %1103 = vector.broadcast %cst_168 : f32 to vector<1x16x16xf32>
    %1104 = arith.maximumf %1101, %1103 : vector<1x16x16xf32>
    %1105 = vector.broadcast %1102 : f32 to vector<1x16x16xf32>
    %1106 = arith.mulf %1105, %1104 : vector<1x16x16xf32>
    %1107 = arith.addf %1087, %1106 : vector<1x16x16xf32>
    %c165 = arith.constant 165 : index
    %1108 = memref.load %arg1[%c165] : memref<192xf32, #tpu.memory_space<smem>>
    %1109 = vector.broadcast %1108 : f32 to vector<1x16x16xf32>
    %1110 = arith.mulf %1109, %2 : vector<1x16x16xf32>
    %c166 = arith.constant 166 : index
    %1111 = memref.load %arg1[%c166] : memref<192xf32, #tpu.memory_space<smem>>
    %1112 = vector.broadcast %1111 : f32 to vector<1x16x16xf32>
    %1113 = arith.mulf %1112, %4 : vector<1x16x16xf32>
    %1114 = arith.addf %1110, %1113 : vector<1x16x16xf32>
    %c167 = arith.constant 167 : index
    %1115 = memref.load %arg1[%c167] : memref<192xf32, #tpu.memory_space<smem>>
    %1116 = vector.broadcast %1115 : f32 to vector<1x16x16xf32>
    %1117 = arith.mulf %1116, %6 : vector<1x16x16xf32>
    %1118 = arith.addf %1114, %1117 : vector<1x16x16xf32>
    %c55_169 = arith.constant 55 : index
    %1119 = memref.load %arg2[%c55_169] : memref<64xf32, #tpu.memory_space<smem>>
    %1120 = vector.broadcast %1119 : f32 to vector<1x16x16xf32>
    %1121 = arith.addf %1118, %1120 : vector<1x16x16xf32>
    %c55_170 = arith.constant 55 : index
    %1122 = memref.load %arg3[%c55_170] : memref<64xf32, #tpu.memory_space<smem>>
    %cst_171 = arith.constant 0.000000e+00 : f32
    %1123 = vector.broadcast %cst_171 : f32 to vector<1x16x16xf32>
    %1124 = arith.maximumf %1121, %1123 : vector<1x16x16xf32>
    %1125 = vector.broadcast %1122 : f32 to vector<1x16x16xf32>
    %1126 = arith.mulf %1125, %1124 : vector<1x16x16xf32>
    %1127 = arith.addf %1107, %1126 : vector<1x16x16xf32>
    %c168 = arith.constant 168 : index
    %1128 = memref.load %arg1[%c168] : memref<192xf32, #tpu.memory_space<smem>>
    %1129 = vector.broadcast %1128 : f32 to vector<1x16x16xf32>
    %1130 = arith.mulf %1129, %2 : vector<1x16x16xf32>
    %c169 = arith.constant 169 : index
    %1131 = memref.load %arg1[%c169] : memref<192xf32, #tpu.memory_space<smem>>
    %1132 = vector.broadcast %1131 : f32 to vector<1x16x16xf32>
    %1133 = arith.mulf %1132, %4 : vector<1x16x16xf32>
    %1134 = arith.addf %1130, %1133 : vector<1x16x16xf32>
    %c170 = arith.constant 170 : index
    %1135 = memref.load %arg1[%c170] : memref<192xf32, #tpu.memory_space<smem>>
    %1136 = vector.broadcast %1135 : f32 to vector<1x16x16xf32>
    %1137 = arith.mulf %1136, %6 : vector<1x16x16xf32>
    %1138 = arith.addf %1134, %1137 : vector<1x16x16xf32>
    %c56_172 = arith.constant 56 : index
    %1139 = memref.load %arg2[%c56_172] : memref<64xf32, #tpu.memory_space<smem>>
    %1140 = vector.broadcast %1139 : f32 to vector<1x16x16xf32>
    %1141 = arith.addf %1138, %1140 : vector<1x16x16xf32>
    %c56_173 = arith.constant 56 : index
    %1142 = memref.load %arg3[%c56_173] : memref<64xf32, #tpu.memory_space<smem>>
    %cst_174 = arith.constant 0.000000e+00 : f32
    %1143 = vector.broadcast %cst_174 : f32 to vector<1x16x16xf32>
    %1144 = arith.maximumf %1141, %1143 : vector<1x16x16xf32>
    %1145 = vector.broadcast %1142 : f32 to vector<1x16x16xf32>
    %1146 = arith.mulf %1145, %1144 : vector<1x16x16xf32>
    %1147 = arith.addf %1127, %1146 : vector<1x16x16xf32>
    %c171 = arith.constant 171 : index
    %1148 = memref.load %arg1[%c171] : memref<192xf32, #tpu.memory_space<smem>>
    %1149 = vector.broadcast %1148 : f32 to vector<1x16x16xf32>
    %1150 = arith.mulf %1149, %2 : vector<1x16x16xf32>
    %c172 = arith.constant 172 : index
    %1151 = memref.load %arg1[%c172] : memref<192xf32, #tpu.memory_space<smem>>
    %1152 = vector.broadcast %1151 : f32 to vector<1x16x16xf32>
    %1153 = arith.mulf %1152, %4 : vector<1x16x16xf32>
    %1154 = arith.addf %1150, %1153 : vector<1x16x16xf32>
    %c173 = arith.constant 173 : index
    %1155 = memref.load %arg1[%c173] : memref<192xf32, #tpu.memory_space<smem>>
    %1156 = vector.broadcast %1155 : f32 to vector<1x16x16xf32>
    %1157 = arith.mulf %1156, %6 : vector<1x16x16xf32>
    %1158 = arith.addf %1154, %1157 : vector<1x16x16xf32>
    %c57_175 = arith.constant 57 : index
    %1159 = memref.load %arg2[%c57_175] : memref<64xf32, #tpu.memory_space<smem>>
    %1160 = vector.broadcast %1159 : f32 to vector<1x16x16xf32>
    %1161 = arith.addf %1158, %1160 : vector<1x16x16xf32>
    %c57_176 = arith.constant 57 : index
    %1162 = memref.load %arg3[%c57_176] : memref<64xf32, #tpu.memory_space<smem>>
    %cst_177 = arith.constant 0.000000e+00 : f32
    %1163 = vector.broadcast %cst_177 : f32 to vector<1x16x16xf32>
    %1164 = arith.maximumf %1161, %1163 : vector<1x16x16xf32>
    %1165 = vector.broadcast %1162 : f32 to vector<1x16x16xf32>
    %1166 = arith.mulf %1165, %1164 : vector<1x16x16xf32>
    %1167 = arith.addf %1147, %1166 : vector<1x16x16xf32>
    %c174 = arith.constant 174 : index
    %1168 = memref.load %arg1[%c174] : memref<192xf32, #tpu.memory_space<smem>>
    %1169 = vector.broadcast %1168 : f32 to vector<1x16x16xf32>
    %1170 = arith.mulf %1169, %2 : vector<1x16x16xf32>
    %c175 = arith.constant 175 : index
    %1171 = memref.load %arg1[%c175] : memref<192xf32, #tpu.memory_space<smem>>
    %1172 = vector.broadcast %1171 : f32 to vector<1x16x16xf32>
    %1173 = arith.mulf %1172, %4 : vector<1x16x16xf32>
    %1174 = arith.addf %1170, %1173 : vector<1x16x16xf32>
    %c176 = arith.constant 176 : index
    %1175 = memref.load %arg1[%c176] : memref<192xf32, #tpu.memory_space<smem>>
    %1176 = vector.broadcast %1175 : f32 to vector<1x16x16xf32>
    %1177 = arith.mulf %1176, %6 : vector<1x16x16xf32>
    %1178 = arith.addf %1174, %1177 : vector<1x16x16xf32>
    %c58_178 = arith.constant 58 : index
    %1179 = memref.load %arg2[%c58_178] : memref<64xf32, #tpu.memory_space<smem>>
    %1180 = vector.broadcast %1179 : f32 to vector<1x16x16xf32>
    %1181 = arith.addf %1178, %1180 : vector<1x16x16xf32>
    %c58_179 = arith.constant 58 : index
    %1182 = memref.load %arg3[%c58_179] : memref<64xf32, #tpu.memory_space<smem>>
    %cst_180 = arith.constant 0.000000e+00 : f32
    %1183 = vector.broadcast %cst_180 : f32 to vector<1x16x16xf32>
    %1184 = arith.maximumf %1181, %1183 : vector<1x16x16xf32>
    %1185 = vector.broadcast %1182 : f32 to vector<1x16x16xf32>
    %1186 = arith.mulf %1185, %1184 : vector<1x16x16xf32>
    %1187 = arith.addf %1167, %1186 : vector<1x16x16xf32>
    %c177 = arith.constant 177 : index
    %1188 = memref.load %arg1[%c177] : memref<192xf32, #tpu.memory_space<smem>>
    %1189 = vector.broadcast %1188 : f32 to vector<1x16x16xf32>
    %1190 = arith.mulf %1189, %2 : vector<1x16x16xf32>
    %c178 = arith.constant 178 : index
    %1191 = memref.load %arg1[%c178] : memref<192xf32, #tpu.memory_space<smem>>
    %1192 = vector.broadcast %1191 : f32 to vector<1x16x16xf32>
    %1193 = arith.mulf %1192, %4 : vector<1x16x16xf32>
    %1194 = arith.addf %1190, %1193 : vector<1x16x16xf32>
    %c179 = arith.constant 179 : index
    %1195 = memref.load %arg1[%c179] : memref<192xf32, #tpu.memory_space<smem>>
    %1196 = vector.broadcast %1195 : f32 to vector<1x16x16xf32>
    %1197 = arith.mulf %1196, %6 : vector<1x16x16xf32>
    %1198 = arith.addf %1194, %1197 : vector<1x16x16xf32>
    %c59_181 = arith.constant 59 : index
    %1199 = memref.load %arg2[%c59_181] : memref<64xf32, #tpu.memory_space<smem>>
    %1200 = vector.broadcast %1199 : f32 to vector<1x16x16xf32>
    %1201 = arith.addf %1198, %1200 : vector<1x16x16xf32>
    %c59_182 = arith.constant 59 : index
    %1202 = memref.load %arg3[%c59_182] : memref<64xf32, #tpu.memory_space<smem>>
    %cst_183 = arith.constant 0.000000e+00 : f32
    %1203 = vector.broadcast %cst_183 : f32 to vector<1x16x16xf32>
    %1204 = arith.maximumf %1201, %1203 : vector<1x16x16xf32>
    %1205 = vector.broadcast %1202 : f32 to vector<1x16x16xf32>
    %1206 = arith.mulf %1205, %1204 : vector<1x16x16xf32>
    %1207 = arith.addf %1187, %1206 : vector<1x16x16xf32>
    %c180 = arith.constant 180 : index
    %1208 = memref.load %arg1[%c180] : memref<192xf32, #tpu.memory_space<smem>>
    %1209 = vector.broadcast %1208 : f32 to vector<1x16x16xf32>
    %1210 = arith.mulf %1209, %2 : vector<1x16x16xf32>
    %c181 = arith.constant 181 : index
    %1211 = memref.load %arg1[%c181] : memref<192xf32, #tpu.memory_space<smem>>
    %1212 = vector.broadcast %1211 : f32 to vector<1x16x16xf32>
    %1213 = arith.mulf %1212, %4 : vector<1x16x16xf32>
    %1214 = arith.addf %1210, %1213 : vector<1x16x16xf32>
    %c182 = arith.constant 182 : index
    %1215 = memref.load %arg1[%c182] : memref<192xf32, #tpu.memory_space<smem>>
    %1216 = vector.broadcast %1215 : f32 to vector<1x16x16xf32>
    %1217 = arith.mulf %1216, %6 : vector<1x16x16xf32>
    %1218 = arith.addf %1214, %1217 : vector<1x16x16xf32>
    %c60_184 = arith.constant 60 : index
    %1219 = memref.load %arg2[%c60_184] : memref<64xf32, #tpu.memory_space<smem>>
    %1220 = vector.broadcast %1219 : f32 to vector<1x16x16xf32>
    %1221 = arith.addf %1218, %1220 : vector<1x16x16xf32>
    %c60_185 = arith.constant 60 : index
    %1222 = memref.load %arg3[%c60_185] : memref<64xf32, #tpu.memory_space<smem>>
    %cst_186 = arith.constant 0.000000e+00 : f32
    %1223 = vector.broadcast %cst_186 : f32 to vector<1x16x16xf32>
    %1224 = arith.maximumf %1221, %1223 : vector<1x16x16xf32>
    %1225 = vector.broadcast %1222 : f32 to vector<1x16x16xf32>
    %1226 = arith.mulf %1225, %1224 : vector<1x16x16xf32>
    %1227 = arith.addf %1207, %1226 : vector<1x16x16xf32>
    %c183 = arith.constant 183 : index
    %1228 = memref.load %arg1[%c183] : memref<192xf32, #tpu.memory_space<smem>>
    %1229 = vector.broadcast %1228 : f32 to vector<1x16x16xf32>
    %1230 = arith.mulf %1229, %2 : vector<1x16x16xf32>
    %c184 = arith.constant 184 : index
    %1231 = memref.load %arg1[%c184] : memref<192xf32, #tpu.memory_space<smem>>
    %1232 = vector.broadcast %1231 : f32 to vector<1x16x16xf32>
    %1233 = arith.mulf %1232, %4 : vector<1x16x16xf32>
    %1234 = arith.addf %1230, %1233 : vector<1x16x16xf32>
    %c185 = arith.constant 185 : index
    %1235 = memref.load %arg1[%c185] : memref<192xf32, #tpu.memory_space<smem>>
    %1236 = vector.broadcast %1235 : f32 to vector<1x16x16xf32>
    %1237 = arith.mulf %1236, %6 : vector<1x16x16xf32>
    %1238 = arith.addf %1234, %1237 : vector<1x16x16xf32>
    %c61_187 = arith.constant 61 : index
    %1239 = memref.load %arg2[%c61_187] : memref<64xf32, #tpu.memory_space<smem>>
    %1240 = vector.broadcast %1239 : f32 to vector<1x16x16xf32>
    %1241 = arith.addf %1238, %1240 : vector<1x16x16xf32>
    %c61_188 = arith.constant 61 : index
    %1242 = memref.load %arg3[%c61_188] : memref<64xf32, #tpu.memory_space<smem>>
    %cst_189 = arith.constant 0.000000e+00 : f32
    %1243 = vector.broadcast %cst_189 : f32 to vector<1x16x16xf32>
    %1244 = arith.maximumf %1241, %1243 : vector<1x16x16xf32>
    %1245 = vector.broadcast %1242 : f32 to vector<1x16x16xf32>
    %1246 = arith.mulf %1245, %1244 : vector<1x16x16xf32>
    %1247 = arith.addf %1227, %1246 : vector<1x16x16xf32>
    %c186 = arith.constant 186 : index
    %1248 = memref.load %arg1[%c186] : memref<192xf32, #tpu.memory_space<smem>>
    %1249 = vector.broadcast %1248 : f32 to vector<1x16x16xf32>
    %1250 = arith.mulf %1249, %2 : vector<1x16x16xf32>
    %c187 = arith.constant 187 : index
    %1251 = memref.load %arg1[%c187] : memref<192xf32, #tpu.memory_space<smem>>
    %1252 = vector.broadcast %1251 : f32 to vector<1x16x16xf32>
    %1253 = arith.mulf %1252, %4 : vector<1x16x16xf32>
    %1254 = arith.addf %1250, %1253 : vector<1x16x16xf32>
    %c188 = arith.constant 188 : index
    %1255 = memref.load %arg1[%c188] : memref<192xf32, #tpu.memory_space<smem>>
    %1256 = vector.broadcast %1255 : f32 to vector<1x16x16xf32>
    %1257 = arith.mulf %1256, %6 : vector<1x16x16xf32>
    %1258 = arith.addf %1254, %1257 : vector<1x16x16xf32>
    %c62_190 = arith.constant 62 : index
    %1259 = memref.load %arg2[%c62_190] : memref<64xf32, #tpu.memory_space<smem>>
    %1260 = vector.broadcast %1259 : f32 to vector<1x16x16xf32>
    %1261 = arith.addf %1258, %1260 : vector<1x16x16xf32>
    %c62_191 = arith.constant 62 : index
    %1262 = memref.load %arg3[%c62_191] : memref<64xf32, #tpu.memory_space<smem>>
    %cst_192 = arith.constant 0.000000e+00 : f32
    %1263 = vector.broadcast %cst_192 : f32 to vector<1x16x16xf32>
    %1264 = arith.maximumf %1261, %1263 : vector<1x16x16xf32>
    %1265 = vector.broadcast %1262 : f32 to vector<1x16x16xf32>
    %1266 = arith.mulf %1265, %1264 : vector<1x16x16xf32>
    %1267 = arith.addf %1247, %1266 : vector<1x16x16xf32>
    %c189 = arith.constant 189 : index
    %1268 = memref.load %arg1[%c189] : memref<192xf32, #tpu.memory_space<smem>>
    %1269 = vector.broadcast %1268 : f32 to vector<1x16x16xf32>
    %1270 = arith.mulf %1269, %2 : vector<1x16x16xf32>
    %c190 = arith.constant 190 : index
    %1271 = memref.load %arg1[%c190] : memref<192xf32, #tpu.memory_space<smem>>
    %1272 = vector.broadcast %1271 : f32 to vector<1x16x16xf32>
    %1273 = arith.mulf %1272, %4 : vector<1x16x16xf32>
    %1274 = arith.addf %1270, %1273 : vector<1x16x16xf32>
    %c191 = arith.constant 191 : index
    %1275 = memref.load %arg1[%c191] : memref<192xf32, #tpu.memory_space<smem>>
    %1276 = vector.broadcast %1275 : f32 to vector<1x16x16xf32>
    %1277 = arith.mulf %1276, %6 : vector<1x16x16xf32>
    %1278 = arith.addf %1274, %1277 : vector<1x16x16xf32>
    %c63_193 = arith.constant 63 : index
    %1279 = memref.load %arg2[%c63_193] : memref<64xf32, #tpu.memory_space<smem>>
    %1280 = vector.broadcast %1279 : f32 to vector<1x16x16xf32>
    %1281 = arith.addf %1278, %1280 : vector<1x16x16xf32>
    %c63_194 = arith.constant 63 : index
    %1282 = memref.load %arg3[%c63_194] : memref<64xf32, #tpu.memory_space<smem>>
    %cst_195 = arith.constant 0.000000e+00 : f32
    %1283 = vector.broadcast %cst_195 : f32 to vector<1x16x16xf32>
    %1284 = arith.maximumf %1281, %1283 : vector<1x16x16xf32>
    %1285 = vector.broadcast %1282 : f32 to vector<1x16x16xf32>
    %1286 = arith.mulf %1285, %1284 : vector<1x16x16xf32>
    %1287 = arith.addf %1267, %1286 : vector<1x16x16xf32>
    %c0_196 = arith.constant 0 : index
    %1288 = memref.load %arg4[%c0_196] : memref<1xf32, #tpu.memory_space<smem>>
    %1289 = vector.broadcast %1288 : f32 to vector<1x16x16xf32>
    %1290 = arith.addf %1287, %1289 : vector<1x16x16xf32>
    %c0_197 = arith.constant 0 : index
    %c0_198 = arith.constant 0 : index
    %c0_199 = arith.constant 0 : index
    %1291 = vector.load %arg6[%c0_197, %c0_198, %c0_199] : memref<1x16x16xf32, #tpu.memory_space<vmem>>, vector<1x16x16xf32>
    %c0_200 = arith.constant 0 : index
    %c0_201 = arith.constant 0 : index
    %1292 = vector.load %arg7[%c0_200, %c0_201] : memref<16x16xf32, #tpu.memory_space<vmem>>, vector<16x16xf32>
    %c0_202 = arith.constant 0 : index
    %c0_203 = arith.constant 0 : index
    %1293 = vector.load %arg8[%c0_202, %c0_203] : memref<16x16xf32, #tpu.memory_space<vmem>>, vector<16x16xf32>
    %1294 = arith.mulf %1290, %1291 : vector<1x16x16xf32>
    %1295 = arith.mulf %1290, %1290 : vector<1x16x16xf32>
    %1296 = tpu.concatenate %1290, %1291, %1294, %1295 in 0 : vector<1x16x16xf32>, vector<1x16x16xf32>, vector<1x16x16xf32>, vector<1x16x16xf32> -> vector<4x16x16xf32>
    %1297 = vector.shape_cast %1296 : vector<4x16x16xf32> to vector<64x16xf32>
    %cst_204 = arith.constant dense<0.000000e+00> : vector<64x16xf32>
    %1298 = tpu.matmul %1297, %1293, %cst_204 {dimension_numbers = #tpu.dot_dimension_numbers<[1], [0], [0], [1], [0, 0, 1, 1], [], []>} : vector<64x16xf32>, vector<16x16xf32>, vector<64x16xf32> -> vector<64x16xf32>
    %1299 = vector.shape_cast %1298 : vector<64x16xf32> to vector<4x16x16xf32>
    %1300 = vector.extract_strided_slice %1299 {offsets = [0, 0, 0], sizes = [1, 16, 16], strides = [1, 1, 1]} : vector<4x16x16xf32> to vector<1x16x16xf32>
    %1301 = vector.shape_cast %1300 : vector<1x16x16xf32> to vector<16x16xf32>
    %cst_205 = arith.constant dense<0.000000e+00> : vector<16x16xf32>
    %1302 = tpu.matmul %1292, %1301, %cst_205 {dimension_numbers = #tpu.dot_dimension_numbers<[1], [0], [0], [1], [0, 0, 1, 1], [], []>} : vector<16x16xf32>, vector<16x16xf32>, vector<16x16xf32> -> vector<16x16xf32>
    %1303 = vector.shape_cast %1302 : vector<16x16xf32> to vector<1x16x16xf32>
    %1304 = vector.extract_strided_slice %1299 {offsets = [1, 0, 0], sizes = [1, 16, 16], strides = [1, 1, 1]} : vector<4x16x16xf32> to vector<1x16x16xf32>
    %1305 = vector.shape_cast %1304 : vector<1x16x16xf32> to vector<16x16xf32>
    %cst_206 = arith.constant dense<0.000000e+00> : vector<16x16xf32>
    %1306 = tpu.matmul %1292, %1305, %cst_206 {dimension_numbers = #tpu.dot_dimension_numbers<[1], [0], [0], [1], [0, 0, 1, 1], [], []>} : vector<16x16xf32>, vector<16x16xf32>, vector<16x16xf32> -> vector<16x16xf32>
    %1307 = vector.shape_cast %1306 : vector<16x16xf32> to vector<1x16x16xf32>
    %1308 = vector.extract_strided_slice %1299 {offsets = [2, 0, 0], sizes = [1, 16, 16], strides = [1, 1, 1]} : vector<4x16x16xf32> to vector<1x16x16xf32>
    %1309 = vector.shape_cast %1308 : vector<1x16x16xf32> to vector<16x16xf32>
    %cst_207 = arith.constant dense<0.000000e+00> : vector<16x16xf32>
    %1310 = tpu.matmul %1292, %1309, %cst_207 {dimension_numbers = #tpu.dot_dimension_numbers<[1], [0], [0], [1], [0, 0, 1, 1], [], []>} : vector<16x16xf32>, vector<16x16xf32>, vector<16x16xf32> -> vector<16x16xf32>
    %1311 = vector.shape_cast %1310 : vector<16x16xf32> to vector<1x16x16xf32>
    %1312 = vector.extract_strided_slice %1299 {offsets = [3, 0, 0], sizes = [1, 16, 16], strides = [1, 1, 1]} : vector<4x16x16xf32> to vector<1x16x16xf32>
    %1313 = vector.shape_cast %1312 : vector<1x16x16xf32> to vector<16x16xf32>
    %cst_208 = arith.constant dense<0.000000e+00> : vector<16x16xf32>
    %1314 = tpu.matmul %1292, %1313, %cst_208 {dimension_numbers = #tpu.dot_dimension_numbers<[1], [0], [0], [1], [0, 0, 1, 1], [], []>} : vector<16x16xf32>, vector<16x16xf32>, vector<16x16xf32> -> vector<16x16xf32>
    %1315 = vector.shape_cast %1314 : vector<16x16xf32> to vector<1x16x16xf32>
    %1316 = tpu.concatenate %1303, %1307, %1311, %1315 in 0 : vector<1x16x16xf32>, vector<1x16x16xf32>, vector<1x16x16xf32>, vector<1x16x16xf32> -> vector<4x16x16xf32>
    %1317 = vector.extract_strided_slice %1316 {offsets = [0, 0, 0], sizes = [1, 16, 16], strides = [1, 1, 1]} : vector<4x16x16xf32> to vector<1x16x16xf32>
    %1318 = vector.extract_strided_slice %1316 {offsets = [1, 0, 0], sizes = [1, 16, 16], strides = [1, 1, 1]} : vector<4x16x16xf32> to vector<1x16x16xf32>
    %1319 = vector.extract_strided_slice %1316 {offsets = [2, 0, 0], sizes = [1, 16, 16], strides = [1, 1, 1]} : vector<4x16x16xf32> to vector<1x16x16xf32>
    %1320 = arith.mulf %1317, %1318 : vector<1x16x16xf32>
    %1321 = arith.subf %1319, %1320 : vector<1x16x16xf32>
    %1322 = vector.extract_strided_slice %1316 {offsets = [3, 0, 0], sizes = [1, 16, 16], strides = [1, 1, 1]} : vector<4x16x16xf32> to vector<1x16x16xf32>
    %1323 = arith.mulf %1317, %1317 : vector<1x16x16xf32>
    %1324 = arith.subf %1322, %1323 : vector<1x16x16xf32>
    %cst_209 = arith.constant 0.00999999977 : f32
    %1325 = vector.broadcast %cst_209 : f32 to vector<1x16x16xf32>
    %1326 = arith.addf %1324, %1325 : vector<1x16x16xf32>
    %1327 = tpu.reciprocal %1326 : vector<1x16x16xf32> -> vector<1x16x16xf32>
    %1328 = arith.mulf %1321, %1327 : vector<1x16x16xf32>
    %1329 = arith.mulf %1328, %1317 : vector<1x16x16xf32>
    %1330 = arith.subf %1318, %1329 : vector<1x16x16xf32>
    %1331 = tpu.concatenate %1328, %1330 in 0 : vector<1x16x16xf32>, vector<1x16x16xf32> -> vector<2x16x16xf32>
    %1332 = vector.shape_cast %1331 : vector<2x16x16xf32> to vector<32x16xf32>
    %cst_210 = arith.constant dense<0.000000e+00> : vector<32x16xf32>
    %1333 = tpu.matmul %1332, %1293, %cst_210 {dimension_numbers = #tpu.dot_dimension_numbers<[1], [0], [0], [1], [0, 0, 1, 1], [], []>} : vector<32x16xf32>, vector<16x16xf32>, vector<32x16xf32> -> vector<32x16xf32>
    %1334 = vector.shape_cast %1333 : vector<32x16xf32> to vector<2x16x16xf32>
    %1335 = vector.extract_strided_slice %1334 {offsets = [0, 0, 0], sizes = [1, 16, 16], strides = [1, 1, 1]} : vector<2x16x16xf32> to vector<1x16x16xf32>
    %1336 = vector.shape_cast %1335 : vector<1x16x16xf32> to vector<16x16xf32>
    %cst_211 = arith.constant dense<0.000000e+00> : vector<16x16xf32>
    %1337 = tpu.matmul %1292, %1336, %cst_211 {dimension_numbers = #tpu.dot_dimension_numbers<[1], [0], [0], [1], [0, 0, 1, 1], [], []>} : vector<16x16xf32>, vector<16x16xf32>, vector<16x16xf32> -> vector<16x16xf32>
    %1338 = vector.shape_cast %1337 : vector<16x16xf32> to vector<1x16x16xf32>
    %1339 = vector.extract_strided_slice %1334 {offsets = [1, 0, 0], sizes = [1, 16, 16], strides = [1, 1, 1]} : vector<2x16x16xf32> to vector<1x16x16xf32>
    %1340 = vector.shape_cast %1339 : vector<1x16x16xf32> to vector<16x16xf32>
    %cst_212 = arith.constant dense<0.000000e+00> : vector<16x16xf32>
    %1341 = tpu.matmul %1292, %1340, %cst_212 {dimension_numbers = #tpu.dot_dimension_numbers<[1], [0], [0], [1], [0, 0, 1, 1], [], []>} : vector<16x16xf32>, vector<16x16xf32>, vector<16x16xf32> -> vector<16x16xf32>
    %1342 = vector.shape_cast %1341 : vector<16x16xf32> to vector<1x16x16xf32>
    %1343 = tpu.concatenate %1338, %1342 in 0 : vector<1x16x16xf32>, vector<1x16x16xf32> -> vector<2x16x16xf32>
    %1344 = vector.extract_strided_slice %1343 {offsets = [0, 0, 0], sizes = [1, 16, 16], strides = [1, 1, 1]} : vector<2x16x16xf32> to vector<1x16x16xf32>
    %1345 = arith.mulf %1344, %1290 : vector<1x16x16xf32>
    %1346 = vector.extract_strided_slice %1343 {offsets = [1, 0, 0], sizes = [1, 16, 16], strides = [1, 1, 1]} : vector<2x16x16xf32> to vector<1x16x16xf32>
    %1347 = arith.addf %1345, %1346 : vector<1x16x16xf32>
    %c0_213 = arith.constant 0 : index
    %c0_214 = arith.constant 0 : index
    %c0_215 = arith.constant 0 : index
    %1348 = vector.load %arg9[%c0_213, %c0_214, %c0_215] : memref<1x16x16xf32, #tpu.memory_space<vmem>>, vector<1x16x16xf32>
    tpu.vector_store %arg9[%c0_213, %c0_214, %c0_215], %1347 {strides = array<i32>} : memref<1x16x16xf32, #tpu.memory_space<vmem>>, vector<1x16x16xf32>,
    return
  }
  func.func @transform_0(%arg0: i32) -> i32 {
    %c0_i32 = arith.constant 0 : i32
    %c0_i32_0 = arith.constant 0 : i32
    return %c0_i32 : i32
  }
  func.func @transform_1(%arg0: i32) -> i32 {
    %c0_i32 = arith.constant 0 : i32
    %c0_i32_0 = arith.constant 0 : i32
    return %c0_i32 : i32
  }
  func.func @transform_2(%arg0: i32) -> i32 {
    %c0_i32 = arith.constant 0 : i32
    %c0_i32_0 = arith.constant 0 : i32
    return %c0_i32 : i32
  }
  func.func @transform_3(%arg0: i32) -> i32 {
    %c0_i32 = arith.constant 0 : i32
    %c0_i32_0 = arith.constant 0 : i32
    return %c0_i32 : i32
  }
  func.func @transform_4(%arg0: i32) -> (i32, i32, i32, i32) {
    %c0_i32 = arith.constant 0 : i32
    %c0_i32_0 = arith.constant 0 : i32
    %c0_i32_1 = arith.constant 0 : i32
    %c0_i32_2 = arith.constant 0 : i32
    return %arg0, %c0_i32, %c0_i32_0, %c0_i32_1 : i32, i32, i32, i32
  }
  func.func @transform_5(%arg0: i32) -> (i32, i32, i32) {
    %c0_i32 = arith.constant 0 : i32
    %c0_i32_0 = arith.constant 0 : i32
    %c0_i32_1 = arith.constant 0 : i32
    return %arg0, %c0_i32, %c0_i32_0 : i32, i32, i32
  }
  func.func @transform_6(%arg0: i32) -> (i32, i32) {
    %c0_i32 = arith.constant 0 : i32
    %c0_i32_0 = arith.constant 0 : i32
    %c0_i32_1 = arith.constant 0 : i32
    return %c0_i32, %c0_i32_0 : i32, i32
  }
  func.func @transform_7(%arg0: i32) -> (i32, i32) {
    %c0_i32 = arith.constant 0 : i32
    %c0_i32_0 = arith.constant 0 : i32
    %c0_i32_1 = arith.constant 0 : i32
    return %c0_i32, %c0_i32_0 : i32, i32
  }
  func.func @transform_8(%arg0: i32) -> (i32, i32, i32) {
    %c0_i32 = arith.constant 0 : i32
    %c0_i32_0 = arith.constant 0 : i32
    %c0_i32_1 = arith.constant 0 : i32
    return %arg0, %c0_i32, %c0_i32_0 : i32, i32, i32
  }
}

</mosaic_0001>

<bundles_post_ra>
// kernel: tpu_custom_call.1
= control target key start
LH: loop header
LB: loop body
LE: loop exit
PB: predicated region body
PF: predicated region fallthrough
CT: control target
= control target key end

     0   :  { %s6504_s0 = inlined_call_operand.vmem [shape: f32[192], index: 0, kind: input, shape index: {}]   ;;  %s6505_s1 = inlined_call_operand.hbm [shape: f32[64], index: 1, kind: input, shape index: {}]   ;;  %s6506_s2 = inlined_call_operand.vmem [shape: f32[64], index: 2, kind: input, shape index: {}]   ;;  %s6507_s3 = inlined_call_operand.<no memory space> [shape: f32[1], index: 3, kind: input, shape index: {}]   ;;  %s6508_s4 = inlined_call_operand.hbm [shape: f32[2,3,16,16], index: 4, kind: input, shape index: {}]   ;;  %s6509_s5 = inlined_call_operand.hbm [shape: f32[2,16,16], index: 5, kind: input, shape index: {}]   ;;  %s6510_s6 = inlined_call_operand.hbm [shape: f32[16,16], index: 6, kind: input, shape index: {}]   ;;  %s6511_s7 = inlined_call_operand.hbm [shape: f32[16,16], index: 7, kind: input, shape index: {}]   ;;  %s6512_s8 = inlined_call_operand.hbm [shape: f32[2,16,16], index: 8, kind: output, shape index: {}]  }
   0x1   :  { %7063 = sst [smem:[#allocation242_spill]] %s6504_s0 }
   0x2   :  { %7064 = sst [smem:[#allocation243_spill]] %s6505_s1 }
   0x3   :  { %7065 = sst [smem:[#allocation244_spill]] %s6506_s2 }
   0x4   :  { %7066 = sst [smem:[#allocation245_spill]] %s6508_s4 }
   0x5   :  { %7067 = sst [smem:[#allocation246_spill]] %s6509_s5 }
   0x6   :  { %7068 = sst [smem:[#allocation247_spill]] %s6510_s6 }
   0x7   :  { %7069 = sst [smem:[#allocation248_spill]] %s6511_s7 }
   0x8   :  { %7070 = sst [smem:[#allocation249_spill]] %s6512_s8 }
   0x9   :  { %13 = sst [smem:[#allocation2]] %s6507_s3 }
   0xa   :  { %14 = vsyncpa [#allocation7], 0 }
   0xb   :  { %15 = vsyncpa [#allocation6], 0 }
   0xc   :  { %16 = vsyncpa [#allocation10], 0 }
   0xd   :  { %17 = vsyncpa [#allocation4], 0 }
   0xe   :  { %19 = vsyncpa [#allocation4 + $0x1], 0 }
   0xf   :  { %20 = vsyncpa [#allocation13], 0 }
  0x10   :  { %22 = vsyncpa [#allocation13 + $0x1], 0 }
  0x11   :  { %23 = vsyncpa [#allocation16], 0 }
  0x12   :  { %24 = vsyncpa [#allocation5], 0 }
  0x13   :  { %26 = vsyncpa [#allocation5 + $0x1], 0  ;;  %s3531_s29 = smov 0   ;;  %s3533_s30 = smov 0  }
  0x14   :  { %s3535_s9 = smov 0   ;;  %s3537_s10 = smov 0  }
  0x15 LB: > { %7071 = sst [smem:[#allocation26_spill]] %s3460_s29  ;;  %s3555_s13 = sadd.s32 4294967295, %s3472_s10   ;;  %s3472_s10 = sphi %s3537_s10, %s7925_s10   ;;  %s3468_s9 = sphi %s3535_s9, %s7928_s9   ;;  %s3464_s30 = sphi %s3533_s30, %s7927_s30   ;;  %s3460_s29 = sphi %s3531_s29, %s7926_s29  }
  0x16   : > { %7072 = sst [smem:[#allocation27_spill]] %s3464_s30  ;;  %p2721_p0 = scmp.ge.s32.totalorder %s3472_s10, 1 }
  0x17   : > { %7073 = sst [smem:[#allocation28_spill]] %s3468_s9  ;;  %p137_p1 = scmp.eq.s32.totalorder %s3555_s13, 0 }
  0x18   : > { %7074 = sst [smem:[#allocation29_spill]] %s3472_s10  ;;  %p241_p2 = scmp.lt.s32.totalorder %s3472_s10, 3 }
  0x19   : > { %s7075_s6 = sld [smem:[#allocation247_spill]]  ;;  %s3474_s15 = smov [#allocation14]  }
  0x1a   : > { %7076 = sst [smem:[#allocation30_spill]] %s3555_s13  ;;  %p3560_p3 = pnand %p2721_p0, %p241_p2 }
  0x1b   : > { %s287_s16 = sshll.u32 %s3474_s15, 4  ;;  %s7078_s0 = sld [smem:[#allocation242_spill]]  ;;  %s288_s16 = int_to_ptr.vmem [resolvable:$true] %s287_s16 }
  0x1c   : > { %p3119_p4 = pneg %p3560_p3  ;;  %s7080_s1 = sld [smem:[#allocation243_spill]] }
  0x1d   : > { %s6513_s24 = smov 128   ;;  %s6515_s25 = smov 8  }
  0x1e   : > { %p3572_p6 = pnand %p3119_p4, %p137_p1  ;;  %s3477_s26 = smov [#allocation3]  }
  0x1f   : > { %s285_s12 = sshll.u32 %s7075_s6, 4  ;;  %s7081_s2 = sld [smem:[#allocation244_spill]]  ;;  %s286_s12 = int_to_ptr.hbm [resolvable:$true] %s285_s12 }
  0x20   : > { %3131 = dma.hbm_to_vmem [thread:$0]  (!%p3572_p6), %s286_s12, 256, %s288_s16, [#allocation13], %s6513_s24, %s6513_s24, %s6515_s25  }
  0x21   : > { %s253_s19 = sshll.u32 %s7078_s0, 4  ;;  %s3478_s11 = smov [#allocation8]   ;;  %s254_s19 = int_to_ptr.vmem [resolvable:$true] %s253_s19 }
  0x22   : > { %s263_s23 = sshll.u32 %s7080_s1, 4  ;;  %s3479_s12 = smov [#allocation9]   ;;  %s264_s23 = int_to_ptr.hbm [resolvable:$true] %s263_s23 }
  0x23   : > { %3122 = dma.vmem_to_smem (!%p3572_p6), %s254_s19, 32, %s3477_s26, [#allocation7]  }
  0x24   : > { %3125 = dma.hbm_to_smem (!%p3572_p6), %s264_s23, 16, %s3478_s11, [#allocation6]  }
  0x25   : > { %s273_s3 = sshll.u32 %s7081_s2, 4  ;;  %s7082_s7 = sld [smem:[#allocation248_spill]]  ;;  %s274_s3 = int_to_ptr.vmem [resolvable:$true] %s273_s3 }
  0x26   : > { %3128 = dma.vmem_to_smem (!%p3572_p6), %s274_s3, 16, %s3479_s12, [#allocation10]  }
  0x27   : > { %s3480_s18 = smov [#allocation15]   ;;  %s2720_s21 = sadd.s32 4294967294, %s3472_s10  }
  0x28   : > { %s301_s19 = sshll.u32 %s3480_s18, 4  ;;  %s3603_s22 = sadd.s32 1, %s3472_s10   ;;  %s302_s19 = int_to_ptr.vmem [resolvable:$true] %s301_s19 }
  0x29   : > { %7083 = sst [smem:[#allocation31_spill]] %s3603_s22  ;;  %s123_s23 = sadd.s32 1, %s3468_s9 }
  0x2a   : > { %s120_s26 = ssub.s32 %s3472_s10, %s3603_s22  ;;  %p130_p7 = scmp.ne.s32.totalorder %s3468_s9, %s3464_s30 }
  0x2b   : > { %s299_s17 = sshll.u32 %s7082_s7, 4  ;;  %p121_p8 = scmp.eq.s32.totalorder %s120_s26, 0  ;;  %s300_s17 = int_to_ptr.hbm [resolvable:$true] %s299_s17 }
  0x2c   : > { %3134 = dma.hbm_to_vmem [thread:$0]  (!%p3572_p6), %s300_s17, 256, %s302_s19, [#allocation16], %s6513_s24, %s6513_s24, %s6515_s25  }
  0x2d   : > { %p131_p9 = scmp.eq.s32.totalorder %s3472_s10, 0  ;;  %p136_p10 = scmp.ne.s32.totalorder %s3464_s30, %s3460_s29 }
  0x2e   : > { %p228_p11 = scmp.eq.s32.totalorder %s3555_s13, 1  ;;  %p234_p2 = scmp.eq.s32.totalorder %s2720_s21, 1 }
  0x2f   : > { %s3615_s20 = scalar_select %p121_p8, %s3468_s9, %s123_s23  }
  0x30   : > { %p132_p12 = por %p131_p9, %p130_p7  ;;  %p3619_p13 = por %p137_p1, %p136_p10 }
  0x31   : > { %7084 = sst [smem:[#allocation32_spill]] %s3615_s20  ;;  %p3623_p0 = por %p228_p11, %p130_p7 }
  0x32   : > { %p3151_p4 = scmp.lt.s32.totalorder %s3472_s10, 2  ;;  %s3629_s3 = sand.u32 1, %s3468_s9  }
  0x33   : > { %s7086_s28 = scalar_select %p3623_p0, 1, 0 }
  0x34   : > { %p3631_p6 = por %p234_p2, %p136_p10  ;;  %s3090_s12 = smul.u32 48, %s3629_s3 }
  0x35   : > { %7087 = sst [smem:[#allocation33_spill]] %s7086_s28  ;;  %p3636_p8 = pnand %p3151_p4, %p132_p12 }
  0x36   : > { %s7088_s11 = scalar_select %p3631_p6, 1, 0 }
  0x37   : > { %s3091_s16 = smul.u32 48, %s3472_s10  ;;  %s7091_s4 = sld [smem:[#allocation245_spill]] }
  0x38   : > { %7089 = sst [smem:[#allocation34_spill]] %s7088_s11  ;;  %s319_s23 = scalar_lea.vmem [#allocation11], %s3090_s12 }
  0x39   : > { %s327_s26 = sshll.u32 %s319_s23, 4  ;;  %s316_s25 = scalar_lea.sflag [#allocation4], %s3629_s3  ;;  %s328_s26 = int_to_ptr.vmem [resolvable:$true] %s327_s26 }
  0x3a   : > { %p3326_p9 = pneg %p3636_p8 }
  0x3d   : > { %s324_s21 = scalar_lea.hbm %s7091_s4, %s3091_s16  ;;  %s3329_s16 = scalar_lea.hbm %s7091_s4, 96 }
  0x3e   : > { %s325_s24 = sshll.u32 %s324_s21, 4  ;;  %s326_s24 = int_to_ptr.hbm [resolvable:$true] %s325_s24 }
  0x3f   : > { %s3322_s0 = sshra.s32 %s326_s24, 4  ;;  %s3323_s0 = int_to_ptr.hbm [resolvable:$true] %s3322_s0 }
  0x40   : > { %s3324_s1 = scalar_lea.hbm %s3323_s0, 48  ;;  %p3330_p12 = scmp.lt.s32.totalorder %s3323_s0, %s7091_s4 }
  0x41   : > { %p3325_p7 = scmp.ne.s32.totalorder %s3323_s0, %s3324_s1  ;;  %p3331_p2 = scmp.lt.s32.totalorder %s3329_s16, %s3324_s1 }
  0x43   : > { %p3327_p10 = pnand %p3326_p9, %p3325_p7  ;;  %p3332_p4 = por %p3331_p2, %p3330_p12 }
  0x45   : > { %p3328_p11 = pneg %p3327_p10 }
  0x47   : > { %p3333_p5 = pnand %p3332_p4, %p3328_p11 }
  0x49   : > { %3336 = shalt.err (!%p3333_p5)
}
  0x4a   : > { %s7092_s19 = smov 8   ;;  %s7093_s21 = smov 128  }
  0x4b   : > { %3138 = dma.hbm_to_vmem [thread:$0]  (!%p3636_p8), %s326_s24, 768, %s328_s26, %s316_s25, %s7093_s21, %s7093_s21, %s7092_s19  }
  0x4c   : > { %s2729_s2 = sshll.u32 %s3629_s3, 4  ;;  %s3086_s17 = sshll.u32 %s3472_s10, 4 }
  0x4d   : > { %s7094_s5 = sld [smem:[#allocation246_spill]]  ;;  %s341_s16 = scalar_lea.vmem [#allocation12], %s2729_s2 }
  0x4e   : > { %s349_s12 = sshll.u32 %s341_s16, 4  ;;  %s7095_s18 = sand.u32 1, %s3472_s10   ;;  %s350_s12 = int_to_ptr.vmem [resolvable:$true] %s349_s12 }
  0x4f   : > { %s338_s4 = scalar_lea.sflag [#allocation13], %s7095_s18 }
  0x53   : > { %s346_s0 = scalar_lea.hbm %s7094_s5, %s3086_s17  ;;  %s3359_s6 = scalar_lea.hbm %s7094_s5, 32 }
  0x54   : > { %s347_s1 = sshll.u32 %s346_s0, 4  ;;  %s348_s1 = int_to_ptr.hbm [resolvable:$true] %s347_s1 }
  0x55   : > { %s3352_s7 = sshra.s32 %s348_s1, 4  ;;  %s3353_s7 = int_to_ptr.hbm [resolvable:$true] %s3352_s7 }
  0x56   : > { %s3354_s20 = scalar_lea.hbm %s3353_s7, 16  ;;  %p3360_p11 = scmp.lt.s32.totalorder %s3353_s7, %s7094_s5 }
  0x57   : > { %p3355_p5 = scmp.ne.s32.totalorder %s3353_s7, %s3354_s20  ;;  %p3361_p12 = scmp.lt.s32.totalorder %s3359_s6, %s3354_s20 }
  0x59   : > { %p3357_p7 = pnand %p3355_p5, %p3326_p9  ;;  %p3362_p2 = por %p3361_p12, %p3360_p11 }
  0x5b   : > { %p3358_p10 = pneg %p3357_p7 }
  0x5d   : > { %p3363_p4 = pnand %p3362_p2, %p3358_p10 }
  0x5f   : > { %3366 = shalt.err (!%p3363_p4)
}
  0x60   : > { %3141 = dma.hbm_to_vmem [thread:$0]  (!%p3636_p8), %s348_s1, 256, %s350_s12, %s338_s4, %s7093_s21, %s7093_s21, %s7092_s19  }
  0x61   : > { %361 = sbr.rel (%p3560_p3) target bundleno = 1575 (0x627), region = 52 }
  0x66   : > { %3427 = dma.done.wait (%p137_p1), [#allocation7], 32  }
  0x67   : > { %3429 = vsyncadd (%p137_p1), [#allocation7], 4294967264 }
  0x68   : > { %3431 = dma.done.wait (%p137_p1), [#allocation6], 16  }
  0x69   : > { %3433 = vsyncadd (%p137_p1), [#allocation6], 4294967280 }
  0x6a   : > { %3435 = dma.done.wait (%p137_p1), [#allocation10], 16  }
  0x6b   : > { %3437 = vsyncadd (%p137_p1), [#allocation10], 4294967280  ;;  %s3698_s4 = sand.u32 1, %s3464_s30  }
  0x6c   : > { %7096 = sst [smem:[#allocation35_spill]] %s3698_s4  ;;  %s3092_s7 = smul.u32 48, %s3698_s4 }
  0x6d   : > { %s379_s14 = scalar_lea.sflag [#allocation4], %s3698_s4 }
  0x6e   : > { %s3702_s20 = scalar_lea.vmem [#allocation11], %s3092_s7 }
  0x6f   : > { %7097 = sst [smem:[#allocation36_spill]] %s3702_s20 }
  0x70   : > { %3439 = dma.done.wait (%p3619_p13), %s379_s14, 768  }
  0x71   : > { %3441 = vsyncadd (%p3619_p13), %s379_s14, 4294966528  ;;  %s388_s15 = sand.u32 1, %s3555_s13   ;;  %s6517_s19 = sshll.u32 %s3698_s4, 4 }
  0x72   : > { %s389_s21 = scalar_lea.sflag [#allocation13], %s388_s15  ;;  %s3712_s2 = scalar_lea.vmem [#allocation12], %s6517_s19 }
  0x73   : > { %7098 = sst [smem:[#allocation37_spill]] %s3712_s2 }
  0x74   : > { %3443 = dma.done.wait (%p3619_p13), %s389_s21, 256  }
  0x75   : > { %3445 = vsyncadd (%p3619_p13), %s389_s21, 4294967040 }
  0x76   : > { %3447 = dma.done.wait (%p137_p1), [#allocation13], 256  }
  0x77   : > { %3449 = vsyncadd (%p137_p1), [#allocation13], 4294967040 }
  0x78   : > { %3451 = dma.done.wait (%p137_p1), [#allocation16], 256  }
  0x79   : > { %3453 = vsyncadd (%p137_p1), [#allocation16], 4294967040 }
  0x7a   : > { %408 = sfence }
  0x7b   : > { %v2249_v0 = vld [vmem:[#allocation15 + $0x8] sm:$0xff]  ;;  %v2248_v1 = vld [vmem:[#allocation15] sm:$0xff]  ;;  %s3726_s27 = sld [smem:[#allocation3]]  ;;  %vm2254_vm0 = vcmask 130048  }
  0x7c   : > { %2293 = vmatpush.msra.mxu0 %v2249_v0  ;;  %3088 = vmatpush.msra.mxu3 %v2249_v0  ;;  %s3728_s17 = sld [smem:[#allocation3 + $0x1]]  ;;  %v3735_v2 = vld [vmem:[%s3702_s20] sm:$0xff]  ;;  %v3740_v3 = vld [vmem:[%s3702_s20 + $0x10] sm:$0xff] }
  0x7d   : > { %s3730_s23 = sld [smem:[#allocation3 + $0x2]]  ;;  %v3745_v4 = vld [vmem:[%s3702_s20 + $0x20] sm:$0xff] }
  0x7e   : > { %2294 = vmatpush.msra.mxu0 %v2248_v1  ;;  %s3732_s0 = sld [smem:[#allocation8]]  ;;  %3089 = vmatpush.msra.mxu3 %v2248_v1 }
  0x7f   : > { %s3737_s1 = sld [smem:[#allocation9]] }
  0x80   : > { %s3742_s16 = sld [smem:[#allocation3 + $0x3]] }
  0x81   : > { %v449_v5 = vstv %s3726_s27  ;;  %s3748_s12 = sld [smem:[#allocation3 + $0x4]] }
  0x82   : > { %v450_v6 = vmul.f32 %v449_v5, %v3735_v2  ;;  %v453_v7 = vstv %s3728_s17  ;;  %s3754_s18 = sld [smem:[#allocation3 + $0x5]] }
  0x83   : > { %v454_v8 = vmul.f32 %v453_v7, %v3740_v3  ;;  %v459_v9 = vstv %s3730_s23  ;;  %s3760_s24 = sld [smem:[#allocation8 + $0x1]] }
  0x84   : > { %v460_v10 = vmul.f32 %v459_v9, %v3745_v4  ;;  %s3765_s25 = sld [smem:[#allocation9 + $0x1]]  ;;  %v465_v18 = vstv %s3732_s0 }
  0x85   : > { %v456_v11 = vadd.f32 %v454_v8, %v450_v6  ;;  %s3767_s6 = sld [smem:[#allocation3 + $0x6]]  ;;  %v471_v39 = vstv %s3737_s1 }
  0x86   : > { %v477_v12 = vstv %s3742_s16  ;;  %s3770_s3 = sld [smem:[#allocation3 + $0x7]] }
  0x87   : > { %v478_v13 = vmul.f32 %v477_v12, %v3735_v2  ;;  %v481_v14 = vstv %s3748_s12  ;;  %s3776_s26 = sld [smem:[#allocation3 + $0x8]]  ;;  %v462_v15 = vadd.f32 %v460_v10, %v456_v11 }
  0x88   : > { %v482_v16 = vmul.f32 %v481_v14, %v3740_v3  ;;  %v487_v17 = vstv %s3754_s18  ;;  %s3782_s7 = sld [smem:[#allocation8 + $0x2]] }
  0x89   : > { %v488_v19 = vmul.f32 %v487_v17, %v3745_v4  ;;  %s3788_s14 = sld [smem:[#allocation9 + $0x2]]  ;;  %v493_v21 = vstv %s3760_s24  ;;  %v466_v23 = vadd.f32 %v465_v18, %v462_v15 }
  0x8a   : > { %v484_v20 = vadd.f32 %v482_v16, %v478_v13  ;;  %s3790_s15 = sld [smem:[#allocation3 + $0x9]]  ;;  %v499_v40 = vstv %s3765_s25 }
  0x8b   : > { %v505_v22 = vstv %s3767_s6  ;;  %s3794_s21 = sld [smem:[#allocation3 + $0xa]]  ;;  %v469_v32 = vmax.f32 %v466_v23, 0.0 }
  0x8c   : > { %v490_v24 = vadd.f32 %v488_v19, %v484_v20  ;;  %v506_v25 = vmul.f32 %v505_v22, %v3735_v2  ;;  %v509_v26 = vstv %s3770_s3  ;;  %s3802_s19 = sld [smem:[#allocation3 + $0xb]] }
  0x8d   : > { %v510_v27 = vmul.f32 %v509_v26, %v3740_v3  ;;  %v515_v28 = vstv %s3776_s26  ;;  %s3808_s5 = sld [smem:[#allocation8 + $0x3]]  ;;  %v472_v46 = vmul.f32 %v471_v39, %v469_v32 }
  0x8e   : > { %v494_v29 = vadd.f32 %v493_v21, %v490_v24  ;;  %v516_v30 = vmul.f32 %v515_v28, %v3745_v4  ;;  %s3815_s9 = sld [smem:[#allocation9 + $0x3]]  ;;  %v521_v33 = vstv %s3782_s7 }
  0x8f   : > { %7099 = sst [smem:[#allocation38_spill]] %s3788_s14  ;;  %v512_v31 = vadd.f32 %v510_v27, %v506_v25  ;;  %v527_v54 = vstv %s3788_s14 }
  0x90   : > { %s3817_s30 = sld [smem:[#allocation3 + $0xc]]  ;;  %v533_v34 = vstv %s3790_s15  ;;  %v497_v35 = vmax.f32 %v494_v29, 0.0 }
  0x91   : > { %s3821_s22 = sld [smem:[#allocation3 + $0xd]]  ;;  %v518_v36 = vadd.f32 %v516_v30, %v512_v31  ;;  %v534_v37 = vmul.f32 %v533_v34, %v3735_v2  ;;  %v537_v38 = vstv %s3794_s21 }
  0x92   : > { %s3827_s10 = sld [smem:[#allocation3 + $0xe]]  ;;  %v538_v41 = vmul.f32 %v537_v38, %v3740_v3  ;;  %v543_v42 = vstv %s3802_s19  ;;  %v500_v47 = vmul.f32 %v499_v40, %v497_v35 }
  0x93   : > { %7100 = sst [smem:[#allocation39_spill]] %s3808_s5  ;;  %v522_v43 = vadd.f32 %v521_v33, %v518_v36  ;;  %v544_v44 = vmul.f32 %v543_v42, %v3745_v4  ;;  %v549_v48 = vstv %s3808_s5 }
  0x94   : > { %7101 = sst [smem:[#allocation40_spill]] %s3815_s9  ;;  %v540_v45 = vadd.f32 %v538_v41, %v534_v37  ;;  %v502_v60 = vadd.f32 %v500_v47, %v472_v46  ;;  %v555_v10 = vstv %s3815_s9 }
  0x95   : > { %s3835_s11 = sld [smem:[#allocation8 + $0x4]]  ;;  %v525_v50 = vmax.f32 %v522_v43, 0.0 }
  0x96   : > { %7102 = sst [smem:[#allocation41_spill]] %s3817_s30  ;;  %v561_v49 = vstv %s3817_s30  ;;  %v546_v51 = vadd.f32 %v544_v44, %v540_v45 }
  0x97   : > { %7103 = sst [smem:[#allocation42_spill]] %s3821_s22  ;;  %v562_v52 = vmul.f32 %v561_v49, %v3735_v2  ;;  %v565_v53 = vstv %s3821_s22  ;;  %v528_v61 = vmul.f32 %v527_v54, %v525_v50 }
  0x98   : > { %7104 = sst [smem:[#allocation43_spill]] %s3827_s10  ;;  %v566_v55 = vmul.f32 %v565_v53, %v3740_v3  ;;  %v571_v56 = vstv %s3827_s10  ;;  %v550_v57 = vadd.f32 %v549_v48, %v546_v51 }
  0x99   : > { %s3842_s29 = sld [smem:[#allocation9 + $0x4]]  ;;  %v572_v58 = vmul.f32 %v571_v56, %v3745_v4  ;;  %v530_v20 = vadd.f32 %v528_v61, %v502_v60 }
  0x9a   : > { %s3844_s28 = sld [smem:[#allocation3 + $0xf]]  ;;  %v568_v59 = vadd.f32 %v566_v55, %v562_v52  ;;  %v553_v0 = vmax.f32 %v550_v57, 0.0 }
  0x9b   : > { %7105 = sst [smem:[#allocation44_spill]] %s3835_s11  ;;  %v577_v62 = vstv %s3835_s11 }
  0x9c   : > { %s3852_s8 = sld [smem:[#allocation3 + $0x10]]  ;;  %v574_v1 = vadd.f32 %v572_v58, %v568_v59  ;;  %v556_v23 = vmul.f32 %v555_v10, %v553_v0 }
  0x9d   : > { %s3858_s4 = sld [smem:[#allocation3 + $0x11]] }
  0x9e   : > { %s3865_s13 = sld [smem:[#allocation8 + $0x5]]  ;;  %v578_v15 = vadd.f32 %v577_v62, %v574_v1  ;;  %v558_v44 = vadd.f32 %v556_v23, %v530_v20 }
  0x9f   : > { %7106 = sst [smem:[#allocation45_spill]] %s3842_s29  ;;  %v583_v32 = vstv %s3842_s29 }
  0xa0   : > { %7107 = sst [smem:[#allocation46_spill]] %s3844_s28  ;;  %v589_v63 = vstv %s3844_s28  ;;  %v581_v27 = vmax.f32 %v578_v15, 0.0 }
  0xa1   : > { %s3872_s2 = sld [smem:[#allocation9 + $0x5]]  ;;  %v590_v6 = vmul.f32 %v589_v63, %v3735_v2 }
  0xa2   : > { %7108 = sst [smem:[#allocation47_spill]] %s3852_s8  ;;  %v593_v8 = vstv %s3852_s8  ;;  %v584_v45 = vmul.f32 %v583_v32, %v581_v27 }
  0xa3   : > { %7109 = sst [smem:[#allocation48_spill]] %s3858_s4  ;;  %v594_v11 = vmul.f32 %v593_v8, %v3740_v3  ;;  %v599_v13 = vstv %s3858_s4 }
  0xa4   : > { %7110 = sst [smem:[#allocation49_spill]] %s3865_s13  ;;  %v600_v16 = vmul.f32 %v599_v13, %v3745_v4  ;;  %v605_v24 = vstv %s3865_s13  ;;  %v586_v1 = vadd.f32 %v584_v45, %v558_v44 }
  0xa5   : > { %s3874_s30 = sld [smem:[#allocation3 + $0x12]]  ;;  %v596_v19 = vadd.f32 %v594_v11, %v590_v6 }
  0xa6   : > { %s3880_s22 = sld [smem:[#allocation3 + $0x13]] }
  0xa7   : > { %7111 = sst [smem:[#allocation50_spill]] %s3872_s2  ;;  %v602_v29 = vadd.f32 %v600_v16, %v596_v19  ;;  %v611_v57 = vstv %s3872_s2 }
  0xa8   : > { %s3886_s10 = sld [smem:[#allocation3 + $0x14]] }
  0xa9   : > { %s3893_s5 = sld [smem:[#allocation8 + $0x6]]  ;;  %v606_v37 = vadd.f32 %v605_v24, %v602_v29 }
  0xaa   : > { %s3900_s28 = sld [smem:[#allocation9 + $0x6]] }
  0xab   : > { %7112 = sst [smem:[#allocation51_spill]] %s3874_s30  ;;  %v617_v25 = vstv %s3874_s30  ;;  %v609_v50 = vmax.f32 %v606_v37, 0.0 }
  0xac   : > { %7113 = sst [smem:[#allocation52_spill]] %s3880_s22  ;;  %v618_v30 = vmul.f32 %v617_v25, %v3735_v2  ;;  %v621_v31 = vstv %s3880_s22 }
  0xad   : > { %s3902_s14 = sld [smem:[#allocation3 + $0x15]]  ;;  %v622_v35 = vmul.f32 %v621_v31, %v3740_v3  ;;  %v612_v6 = vmul.f32 %v611_v57, %v609_v50 }
  0xae   : > { %7114 = sst [smem:[#allocation53_spill]] %s3886_s10  ;;  %v627_v36 = vstv %s3886_s10 }
  0xaf   : > { %7115 = sst [smem:[#allocation54_spill]] %s3893_s5  ;;  %v628_v41 = vmul.f32 %v627_v36, %v3745_v4  ;;  %v624_v43 = vadd.f32 %v622_v35, %v618_v30  ;;  %v633_v46 = vstv %s3893_s5 }
  0xb0   : > { %7116 = sst [smem:[#allocation55_spill]] %s3900_s28  ;;  %v639_v27 = vstv %s3900_s28 }
  0xb1   : > { %s3908_s11 = sld [smem:[#allocation3 + $0x16]]  ;;  %v630_v51 = vadd.f32 %v628_v41, %v624_v43  ;;  %v614_v43 = vadd.f32 %v612_v6, %v586_v1 }
  0xb2   : > { %s3914_s4 = sld [smem:[#allocation3 + $0x17]] }
  0xb3   : > { %7117 = sst [smem:[#allocation56_spill]] %s3902_s14  ;;  %v645_v47 = vstv %s3902_s14  ;;  %v634_v60 = vadd.f32 %v633_v46, %v630_v51 }
  0xb4   : > { %s3921_s8 = sld [smem:[#allocation8 + $0x7]]  ;;  %v646_v52 = vmul.f32 %v645_v47, %v3735_v2 }
  0xb5   : > { %s3928_s30 = sld [smem:[#allocation9 + $0x7]]  ;;  %v637_v16 = vmax.f32 %v634_v60, 0.0 }
  0xb6   : > { %s3930_s9 = sld [smem:[#allocation3 + $0x18]] }
  0xb7   : > { %7118 = sst [smem:[#allocation57_spill]] %s3908_s11  ;;  %v649_v55 = vstv %s3908_s11  ;;  %v640_v44 = vmul.f32 %v639_v27, %v637_v16 }
  0xb8   : > { %7119 = sst [smem:[#allocation58_spill]] %s3914_s4  ;;  %v650_v58 = vmul.f32 %v649_v55, %v3740_v3  ;;  %v655_v59 = vstv %s3914_s4 }
  0xb9   : > { %s3936_s22 = sld [smem:[#allocation3 + $0x19]]  ;;  %v656_v61 = vmul.f32 %v655_v59, %v3745_v4 }
  0xba   : > { %7120 = sst [smem:[#allocation59_spill]] %s3921_s8  ;;  %v652_v0 = vadd.f32 %v650_v58, %v646_v52  ;;  %v661_v11 = vstv %s3921_s8 }
  0xbb   : > { %7121 = sst [smem:[#allocation60_spill]] %s3928_s30 }
  0xbc   : > { %7122 = sst [smem:[#allocation61_spill]] %s3930_s9  ;;  %v673_v15 = vstv %s3930_s9  ;;  %v658_v19 = vadd.f32 %v656_v61, %v652_v0  ;;  %v667_v61 = vstv %s3928_s30 }
  0xbd   : > { %s3942_s10 = sld [smem:[#allocation3 + $0x1a]]  ;;  %v674_v20 = vmul.f32 %v673_v15, %v3735_v2 }
  0xbe   : > { %s3949_s13 = sld [smem:[#allocation8 + $0x8]]  ;;  %v662_v35 = vadd.f32 %v661_v11, %v658_v19 }
  0xbf   : > { %7123 = sst [smem:[#allocation62_spill]] %s3936_s22  ;;  %v677_v23 = vstv %s3936_s22 }
  0xc0   : > { %s3956_s14 = sld [smem:[#allocation9 + $0x8]]  ;;  %v678_v29 = vmul.f32 %v677_v23, %v3740_v3  ;;  %v665_v51 = vmax.f32 %v662_v35, 0.0 }
  0xc1   : > { %s3958_s29 = sld [smem:[#allocation3 + $0x1b]] }
  0xc2   : > { %s3964_s5 = sld [smem:[#allocation3 + $0x1c]]  ;;  %v680_v41 = vadd.f32 %v678_v29, %v674_v20  ;;  %v642_v20 = vadd.f32 %v640_v44, %v614_v43  ;;  %v668_v29 = vmul.f32 %v667_v61, %v665_v51 }
  0xc3   : > { %7124 = sst [smem:[#allocation63_spill]] %s3942_s10  ;;  %v683_v30 = vstv %s3942_s10 }
  0xc4   : > { %7125 = sst [smem:[#allocation64_spill]] %s3949_s13  ;;  %v684_v37 = vmul.f32 %v683_v30, %v3745_v4  ;;  %v6566_v45 = vstv %s3949_s13 }
  0xc5   : > { %s3970_s4 = sld [smem:[#allocation3 + $0x1d]] }
  0xc6   : > { %7126 = sst [smem:[#allocation65_spill]] %s3956_s14  ;;  %v686_v52 = vadd.f32 %v684_v37, %v680_v41 }
  0xc7   : > { %7127 = sst [smem:[#allocation66_spill]] %s3958_s29  ;;  %v6802_v50 = vstv %s3958_s29 }
  0xc8   : > { %7128 = sst [smem:[#allocation67_spill]] %s3964_s5  ;;  %v702_v58 = vmul.f32 %v6802_v50, %v3735_v2  ;;  %v6747_v60 = vstv %s3964_s5  ;;  %v690_v6 = vadd.f32 %v6566_v45, %v686_v52 }
  0xc9   : > { %s3977_s11 = sld [smem:[#allocation8 + $0x9]]  ;;  %v706_v0 = vmul.f32 %v6747_v60, %v3740_v3 }
  0xca   : > { %s3984_s9 = sld [smem:[#allocation9 + $0x9]]  ;;  %v693_v41 = vmax.f32 %v690_v6, 0.0 }
  0xcb   : > { %7129 = sst [smem:[#allocation68_spill]] %s3970_s4  ;;  %v6559_v1 = vstv %s3970_s4  ;;  %v708_v19 = vadd.f32 %v706_v0, %v702_v58  ;;  %v6576_v0 = vstv %s3956_s14 }
  0xcc   : > { %s3986_s2 = sld [smem:[#allocation3 + $0x1e]]  ;;  %v712_v16 = vmul.f32 %v6559_v1, %v3745_v4 }
  0xcd   : > { %s3992_s22 = sld [smem:[#allocation3 + $0x1f]] }
  0xce   : > { %s3998_s10 = sld [smem:[#allocation3 + $0x20]]  ;;  %v714_v52 = vadd.f32 %v712_v16, %v708_v19  ;;  %v670_v19 = vadd.f32 %v668_v29, %v642_v20 }
  0xcf   : > { %7130 = sst [smem:[#allocation69_spill]] %s3977_s11  ;;  %v6568_v35 = vstv %s3977_s11 }
  0xd0   : > { %7131 = sst [smem:[#allocation70_spill]] %s3984_s9  ;;  %v718_v51 = vadd.f32 %v6568_v35, %v714_v52 }
  0xd1   : > { %s4005_s8 = sld [smem:[#allocation8 + $0xa]] }
  0xd2   : > { %7132 = sst [smem:[#allocation71_spill]] %s3986_s2  ;;  %v6565_v37 = vstv %s3986_s2  ;;  %v721_v52 = vmax.f32 %v718_v51, 0.0 }
  0xd3   : > { %7133 = sst [smem:[#allocation72_spill]] %s3992_s22  ;;  %v730_v1 = vmul.f32 %v6565_v37, %v3735_v2  ;;  %v6564_v58 = vstv %s3992_s22 }
  0xd4   : > { %7134 = sst [smem:[#allocation73_spill]] %s3998_s10  ;;  %v734_v43 = vmul.f32 %v6564_v58, %v3740_v3  ;;  %v6569_v44 = vstv %s3998_s10  ;;  %v696_v58 = vmul.f32 %v6576_v0, %v693_v41 }
  0xd5   : > { %s4012_s29 = sld [smem:[#allocation9 + $0xa]]  ;;  %v740_v6 = vmul.f32 %v6569_v44, %v3745_v4 }
  0xd6   : > { %s4014_s28 = sld [smem:[#allocation3 + $0x21]]  ;;  %v736_v16 = vadd.f32 %v734_v43, %v730_v1  ;;  %v6586_v43 = vstv %s3984_s9 }
  0xd7   : > { %7135 = sst [smem:[#allocation74_spill]] %s4005_s8  ;;  %v6578_v37 = vstv %s4005_s8 }
  0xd8   : > { %s4020_s13 = sld [smem:[#allocation3 + $0x22]]  ;;  %v742_v35 = vadd.f32 %v740_v6, %v736_v16  ;;  %v698_v16 = vadd.f32 %v696_v58, %v670_v19 }
  0xd9   : > { %s4026_s4 = sld [smem:[#allocation3 + $0x23]] }
  0xda   : > { %s4033_s5 = sld [smem:[#allocation8 + $0xb]]  ;;  %v746_v41 = vadd.f32 %v6578_v37, %v742_v35 }
  0xdb   : > { %7136 = sst [smem:[#allocation75_spill]] %s4012_s29 }
  0xdc   : > { %7137 = sst [smem:[#allocation76_spill]] %s4014_s28  ;;  %v6575_v45 = vstv %s4014_s28  ;;  %v749_v35 = vmax.f32 %v746_v41, 0.0 }
  0xdd   : > { %s4040_s2 = sld [smem:[#allocation9 + $0xb]]  ;;  %v758_v44 = vmul.f32 %v6575_v45, %v3735_v2 }
  0xde   : > { %7138 = sst [smem:[#allocation77_spill]] %s4020_s13  ;;  %v6574_v1 = vstv %s4020_s13 }
  0xdf   : > { %7139 = sst [smem:[#allocation78_spill]] %s4026_s4  ;;  %v762_v20 = vmul.f32 %v6574_v1, %v3740_v3  ;;  %v6579_v29 = vstv %s4026_s4  ;;  %v724_v1 = vmul.f32 %v6586_v43, %v721_v52 }
  0xe0   : > { %7140 = sst [smem:[#allocation79_spill]] %s4033_s5  ;;  %v768_v51 = vmul.f32 %v6579_v29, %v3745_v4  ;;  %v6588_v45 = vstv %s4033_s5 }
  0xe1   : > { %s4042_s30 = sld [smem:[#allocation3 + $0x24]]  ;;  %v764_v6 = vadd.f32 %v762_v20, %v758_v44  ;;  %v6596_v20 = vstv %s4012_s29 }
  0xe2   : > { %s4048_s22 = sld [smem:[#allocation3 + $0x25]] }
  0xe3   : > { %7141 = sst [smem:[#allocation80_spill]] %s4040_s2  ;;  %v770_v37 = vadd.f32 %v768_v51, %v764_v6  ;;  %v726_v6 = vadd.f32 %v724_v1, %v698_v16 }
  0xe4   : > { %s4054_s10 = sld [smem:[#allocation3 + $0x26]] }
  0xe5   : > { %s4061_s11 = sld [smem:[#allocation8 + $0xc]]  ;;  %v774_v52 = vadd.f32 %v6588_v45, %v770_v37 }
  0xe6   : > { %s4068_s28 = sld [smem:[#allocation9 + $0xc]] }
  0xe7   : > { %7142 = sst [smem:[#allocation81_spill]] %s4042_s30  ;;  %v6585_v0 = vstv %s4042_s30  ;;  %v777_v37 = vmax.f32 %v774_v52, 0.0 }
  0xe8   : > { %7143 = sst [smem:[#allocation82_spill]] %s4048_s22  ;;  %v786_v29 = vmul.f32 %v6585_v0, %v3735_v2  ;;  %v6584_v44 = vstv %s4048_s22 }
  0xe9   : > { %s4070_s14 = sld [smem:[#allocation3 + $0x27]]  ;;  %v790_v58 = vmul.f32 %v6584_v44, %v3740_v3  ;;  %v752_v44 = vmul.f32 %v6596_v20, %v749_v35 }
  0xea   : > { %7144 = sst [smem:[#allocation83_spill]] %s4054_s10  ;;  %v6589_v19 = vstv %s4054_s10 }
  0xeb   : > { %7145 = sst [smem:[#allocation84_spill]] %s4061_s11  ;;  %v796_v41 = vmul.f32 %v6589_v19, %v3745_v4  ;;  %v792_v51 = vadd.f32 %v790_v58, %v786_v29  ;;  %v6598_v0 = vstv %s4061_s11  ;;  %v6606_v58 = vstv %s4040_s2 }
  0xec   : > { %7146 = sst [smem:[#allocation85_spill]] %s4068_s28 }
  0xed   : > { %s4076_s8 = sld [smem:[#allocation3 + $0x28]]  ;;  %v798_v45 = vadd.f32 %v796_v41, %v792_v51  ;;  %v754_v51 = vadd.f32 %v752_v44, %v726_v6 }
  0xee   : > { %s4082_s4 = sld [smem:[#allocation3 + $0x29]] }
  0xef   : > { %7147 = sst [smem:[#allocation86_spill]] %s4070_s14  ;;  %v6595_v43 = vstv %s4070_s14  ;;  %v802_v35 = vadd.f32 %v6598_v0, %v798_v45 }
  0xf0   : > { %s4089_s13 = sld [smem:[#allocation8 + $0xd]]  ;;  %v814_v19 = vmul.f32 %v6595_v43, %v3735_v2 }
  0xf1   : > { %s4096_s30 = sld [smem:[#allocation9 + $0xd]]  ;;  %v805_v45 = vmax.f32 %v802_v35, 0.0 }
  0xf2   : > { %s4098_s9 = sld [smem:[#allocation3 + $0x2a]] }
  0xf3   : > { %7148 = sst [smem:[#allocation87_spill]] %s4076_s8  ;;  %v6594_v29 = vstv %s4076_s8 }
  0xf4   : > { %7149 = sst [smem:[#allocation88_spill]] %s4082_s4  ;;  %v818_v1 = vmul.f32 %v6594_v29, %v3740_v3  ;;  %v6599_v16 = vstv %s4082_s4  ;;  %v780_v29 = vmul.f32 %v6606_v58, %v777_v37 }
  0xf5   : > { %s4104_s22 = sld [smem:[#allocation3 + $0x2b]]  ;;  %v824_v52 = vmul.f32 %v6599_v16, %v3745_v4 }
  0xf6   : > { %7150 = sst [smem:[#allocation89_spill]] %s4089_s13  ;;  %v820_v41 = vadd.f32 %v818_v1, %v814_v19  ;;  %v6608_v43 = vstv %s4089_s13  ;;  %v6616_v1 = vstv %s4068_s28 }
  0xf7   : > { %7151 = sst [smem:[#allocation90_spill]] %s4096_s30 }
  0xf8   : > { %7152 = sst [smem:[#allocation91_spill]] %s4098_s9  ;;  %v6605_v20 = vstv %s4098_s9  ;;  %v826_v0 = vadd.f32 %v824_v52, %v820_v41  ;;  %v782_v41 = vadd.f32 %v780_v29, %v754_v51 }
  0xf9   : > { %s4110_s10 = sld [smem:[#allocation3 + $0x2c]]  ;;  %v842_v16 = vmul.f32 %v6605_v20, %v3735_v2 }
  0xfa   : > { %s4117_s5 = sld [smem:[#allocation8 + $0xe]]  ;;  %v830_v37 = vadd.f32 %v6608_v43, %v826_v0 }
  0xfb   : > { %7153 = sst [smem:[#allocation92_spill]] %s4104_s22  ;;  %v6604_v19 = vstv %s4104_s22 }
  0xfc   : > { %s4124_s14 = sld [smem:[#allocation9 + $0xe]]  ;;  %v846_v44 = vmul.f32 %v6604_v19, %v3740_v3  ;;  %v808_v19 = vmul.f32 %v6616_v1, %v805_v45  ;;  %v833_v0 = vmax.f32 %v830_v37, 0.0 }
  0xfd   : > { %s4126_s29 = sld [smem:[#allocation3 + $0x2d]] }
  0xfe   : > { %s4132_s11 = sld [smem:[#allocation3 + $0x2e]]  ;;  %v848_v52 = vadd.f32 %v846_v44, %v842_v16  ;;  %v6626_v44 = vstv %s4096_s30 }
  0xff   : > { %7154 = sst [smem:[#allocation93_spill]] %s4110_s10  ;;  %v6609_v6 = vstv %s4110_s10 }
 0x100   : > { %7155 = sst [smem:[#allocation94_spill]] %s4117_s5  ;;  %v852_v35 = vmul.f32 %v6609_v6, %v3745_v4  ;;  %v6618_v20 = vstv %s4117_s5 }
 0x101   : > { %s4138_s4 = sld [smem:[#allocation3 + $0x2f]] }
 0x102   : > { %7156 = sst [smem:[#allocation95_spill]] %s4124_s14  ;;  %v854_v43 = vadd.f32 %v852_v35, %v848_v52  ;;  %v810_v52 = vadd.f32 %v808_v19, %v782_v41 }
 0x103   : > { %7157 = sst [smem:[#allocation96_spill]] %s4126_s29  ;;  %v6615_v58 = vstv %s4126_s29 }
 0x104   : > { %7158 = sst [smem:[#allocation97_spill]] %s4132_s11  ;;  %v870_v6 = vmul.f32 %v6615_v58, %v3735_v2  ;;  %v6614_v16 = vstv %s4132_s11  ;;  %v858_v45 = vadd.f32 %v6618_v20, %v854_v43 }
 0x105   : > { %s4145_s8 = sld [smem:[#allocation8 + $0xf]]  ;;  %v874_v29 = vmul.f32 %v6614_v16, %v3740_v3  ;;  %v836_v16 = vmul.f32 %v6626_v44, %v833_v0 }
 0x106   : > { %s4152_s9 = sld [smem:[#allocation9 + $0xf]]  ;;  %v861_v43 = vmax.f32 %v858_v45, 0.0 }
 0x107   : > { %7159 = sst [smem:[#allocation98_spill]] %s4138_s4  ;;  %v6619_v51 = vstv %s4138_s4  ;;  %v876_v35 = vadd.f32 %v874_v29, %v870_v6  ;;  %v6636_v29 = vstv %s4124_s14 }
 0x108   : > { %s4154_s2 = sld [smem:[#allocation3 + $0x30]]  ;;  %v880_v37 = vmul.f32 %v6619_v51, %v3745_v4 }
 0x109   : > { %s4160_s22 = sld [smem:[#allocation3 + $0x31]] }
 0x10a   : > { %s4166_s10 = sld [smem:[#allocation3 + $0x32]]  ;;  %v882_v20 = vadd.f32 %v880_v37, %v876_v35  ;;  %v838_v35 = vadd.f32 %v836_v16, %v810_v52 }
 0x10b   : > { %7160 = sst [smem:[#allocation99_spill]] %s4145_s8  ;;  %v6628_v58 = vstv %s4145_s8 }
 0x10c   : > { %7161 = sst [smem:[#allocation100_spill]] %s4152_s9  ;;  %v886_v0 = vadd.f32 %v6628_v58, %v882_v20 }
 0x10d   : > { %s4173_s13 = sld [smem:[#allocation8 + $0x10]] }
 0x10e   : > { %7162 = sst [smem:[#allocation101_spill]] %s4154_s2  ;;  %v6625_v1 = vstv %s4154_s2  ;;  %v889_v20 = vmax.f32 %v886_v0, 0.0 }
 0x10f   : > { %7163 = sst [smem:[#allocation102_spill]] %s4160_s22  ;;  %v898_v51 = vmul.f32 %v6625_v1, %v3735_v2  ;;  %v6624_v6 = vstv %s4160_s22 }
 0x110   : > { %7164 = sst [smem:[#allocation103_spill]] %s4166_s10  ;;  %v902_v19 = vmul.f32 %v6624_v6, %v3740_v3  ;;  %v6629_v41 = vstv %s4166_s10  ;;  %v864_v6 = vmul.f32 %v6636_v29, %v861_v43 }
 0x111   : > { %s4180_s29 = sld [smem:[#allocation9 + $0x10]]  ;;  %v908_v45 = vmul.f32 %v6629_v41, %v3745_v4 }
 0x112   : > { %s4182_s28 = sld [smem:[#allocation3 + $0x33]]  ;;  %v904_v37 = vadd.f32 %v902_v19, %v898_v51  ;;  %v6646_v19 = vstv %s4152_s9 }
 0x113   : > { %7165 = sst [smem:[#allocation104_spill]] %s4173_s13  ;;  %v6638_v1 = vstv %s4173_s13 }
 0x114   : > { %s4188_s5 = sld [smem:[#allocation3 + $0x34]]  ;;  %v910_v58 = vadd.f32 %v908_v45, %v904_v37  ;;  %v866_v37 = vadd.f32 %v864_v6, %v838_v35 }
 0x115   : > { %s4194_s4 = sld [smem:[#allocation3 + $0x35]] }
 0x116   : > { %s4201_s11 = sld [smem:[#allocation8 + $0x11]]  ;;  %v914_v43 = vadd.f32 %v6638_v1, %v910_v58 }
 0x117   : > { %7166 = sst [smem:[#allocation105_spill]] %s4180_s29 }
 0x118   : > { %7167 = sst [smem:[#allocation106_spill]] %s4182_s28  ;;  %v6635_v44 = vstv %s4182_s28  ;;  %v917_v58 = vmax.f32 %v914_v43, 0.0 }
 0x119   : > { %s4208_s2 = sld [smem:[#allocation9 + $0x11]]  ;;  %v926_v41 = vmul.f32 %v6635_v44, %v3735_v2 }
 0x11a   : > { %7168 = sst [smem:[#allocation107_spill]] %s4188_s5  ;;  %v6634_v51 = vstv %s4188_s5 }
 0x11b   : > { %7169 = sst [smem:[#allocation108_spill]] %s4194_s4  ;;  %v930_v16 = vmul.f32 %v6634_v51, %v3740_v3  ;;  %v6639_v52 = vstv %s4194_s4  ;;  %v892_v51 = vmul.f32 %v6646_v19, %v889_v20 }
 0x11c   : > { %7170 = sst [smem:[#allocation109_spill]] %s4201_s11  ;;  %v936_v0 = vmul.f32 %v6639_v52, %v3745_v4  ;;  %v6648_v44 = vstv %s4201_s11 }
 0x11d   : > { %s4210_s30 = sld [smem:[#allocation3 + $0x36]]  ;;  %v932_v45 = vadd.f32 %v930_v16, %v926_v41  ;;  %v6656_v16 = vstv %s4180_s29 }
 0x11e   : > { %s4216_s22 = sld [smem:[#allocation3 + $0x37]] }
 0x11f   : > { %7171 = sst [smem:[#allocation110_spill]] %s4208_s2  ;;  %v938_v1 = vadd.f32 %v936_v0, %v932_v45  ;;  %v894_v45 = vadd.f32 %v892_v51, %v866_v37 }
 0x120   : > { %s4222_s10 = sld [smem:[#allocation3 + $0x38]] }
 0x121   : > { %s4229_s8 = sld [smem:[#allocation8 + $0x12]]  ;;  %v942_v20 = vadd.f32 %v6648_v44, %v938_v1 }
 0x122   : > { %s4236_s28 = sld [smem:[#allocation9 + $0x12]] }
 0x123   : > { %7172 = sst [smem:[#allocation111_spill]] %s4210_s30  ;;  %v6645_v29 = vstv %s4210_s30  ;;  %v945_v1 = vmax.f32 %v942_v20, 0.0 }
 0x124   : > { %7173 = sst [smem:[#allocation112_spill]] %s4216_s22  ;;  %v954_v52 = vmul.f32 %v6645_v29, %v3735_v2  ;;  %v6644_v41 = vstv %s4216_s22 }
 0x125   : > { %s4238_s14 = sld [smem:[#allocation3 + $0x39]]  ;;  %v958_v6 = vmul.f32 %v6644_v41, %v3740_v3  ;;  %v920_v41 = vmul.f32 %v6656_v16, %v917_v58 }
 0x126   : > { %7174 = sst [smem:[#allocation113_spill]] %s4222_s10  ;;  %v6649_v35 = vstv %s4222_s10 }
 0x127   : > { %7175 = sst [smem:[#allocation114_spill]] %s4229_s8  ;;  %v964_v43 = vmul.f32 %v6649_v35, %v3745_v4  ;;  %v960_v0 = vadd.f32 %v958_v6, %v954_v52  ;;  %v6658_v29 = vstv %s4229_s8  ;;  %v6666_v6 = vstv %s4208_s2 }
 0x128   : > { %7176 = sst [smem:[#allocation115_spill]] %s4236_s28 }
 0x129   : > { %s4244_s13 = sld [smem:[#allocation3 + $0x3a]]  ;;  %v966_v44 = vadd.f32 %v964_v43, %v960_v0  ;;  %v922_v0 = vadd.f32 %v920_v41, %v894_v45 }
 0x12a   : > { %s4250_s4 = sld [smem:[#allocation3 + $0x3b]] }
 0x12b   : > { %7177 = sst [smem:[#allocation116_spill]] %s4238_s14  ;;  %v6655_v19 = vstv %s4238_s14  ;;  %v970_v58 = vadd.f32 %v6658_v29, %v966_v44 }
 0x12c   : > { %s4257_s5 = sld [smem:[#allocation8 + $0x13]]  ;;  %v982_v35 = vmul.f32 %v6655_v19, %v3735_v2 }
 0x12d   : > { %s4264_s30 = sld [smem:[#allocation9 + $0x13]]  ;;  %v973_v44 = vmax.f32 %v970_v58, 0.0 }
 0x12e   : > { %s4266_s9 = sld [smem:[#allocation3 + $0x3c]] }
 0x12f   : > { %7178 = sst [smem:[#allocation117_spill]] %s4244_s13  ;;  %v6654_v52 = vstv %s4244_s13 }
 0x130   : > { %7179 = sst [smem:[#allocation118_spill]] %s4250_s4  ;;  %v986_v51 = vmul.f32 %v6654_v52, %v3740_v3  ;;  %v6659_v37 = vstv %s4250_s4  ;;  %v948_v52 = vmul.f32 %v6666_v6, %v945_v1 }
 0x131   : > { %s4272_s22 = sld [smem:[#allocation3 + $0x3d]]  ;;  %v992_v20 = vmul.f32 %v6659_v37, %v3745_v4 }
 0x132   : > { %7180 = sst [smem:[#allocation119_spill]] %s4257_s5  ;;  %v988_v43 = vadd.f32 %v986_v51, %v982_v35  ;;  %v6668_v19 = vstv %s4257_s5  ;;  %v6676_v51 = vstv %s4236_s28 }
 0x133   : > { %7181 = sst [smem:[#allocation120_spill]] %s4264_s30 }
 0x134   : > { %7182 = sst [smem:[#allocation121_spill]] %s4266_s9  ;;  %v6665_v16 = vstv %s4266_s9  ;;  %v994_v29 = vadd.f32 %v992_v20, %v988_v43  ;;  %v950_v43 = vadd.f32 %v948_v52, %v922_v0 }
 0x135   : > { %s4278_s10 = sld [smem:[#allocation3 + $0x3e]]  ;;  %v1010_v37 = vmul.f32 %v6665_v16, %v3735_v2 }
 0x136   : > { %s4285_s11 = sld [smem:[#allocation8 + $0x14]]  ;;  %v998_v1 = vadd.f32 %v6668_v19, %v994_v29 }
 0x137   : > { %7183 = sst [smem:[#allocation122_spill]] %s4272_s22  ;;  %v6664_v35 = vstv %s4272_s22 }
 0x138   : > { %s4292_s14 = sld [smem:[#allocation9 + $0x14]]  ;;  %v1014_v41 = vmul.f32 %v6664_v35, %v3740_v3  ;;  %v976_v35 = vmul.f32 %v6676_v51, %v973_v44  ;;  %v1001_v29 = vmax.f32 %v998_v1, 0.0 }
 0x139   : > { %s4294_s29 = sld [smem:[#allocation3 + $0x3f]] }
 0x13a   : > { %s4300_s13 = sld [smem:[#allocation3 + $0x40]]  ;;  %v1016_v20 = vadd.f32 %v1014_v41, %v1010_v37  ;;  %v6686_v41 = vstv %s4264_s30 }
 0x13b   : > { %7184 = sst [smem:[#allocation123_spill]] %s4278_s10  ;;  %v6669_v45 = vstv %s4278_s10 }
 0x13c   : > { %7185 = sst [smem:[#allocation124_spill]] %s4285_s11  ;;  %v1020_v58 = vmul.f32 %v6669_v45, %v3745_v4  ;;  %v6678_v16 = vstv %s4285_s11 }
 0x13d   : > { %s4306_s4 = sld [smem:[#allocation3 + $0x41]] }
 0x13e   : > { %7186 = sst [smem:[#allocation125_spill]] %s4292_s14  ;;  %v1022_v19 = vadd.f32 %v1020_v58, %v1016_v20  ;;  %v978_v20 = vadd.f32 %v976_v35, %v950_v43 }
 0x13f   : > { %7187 = sst [smem:[#allocation126_spill]] %s4294_s29  ;;  %v6675_v6 = vstv %s4294_s29 }
 0x140   : > { %7188 = sst [smem:[#allocation127_spill]] %s4300_s13  ;;  %v1038_v45 = vmul.f32 %v6675_v6, %v3735_v2  ;;  %v6674_v37 = vstv %s4300_s13  ;;  %v1026_v44 = vadd.f32 %v6678_v16, %v1022_v19 }
 0x141   : > { %s4313_s8 = sld [smem:[#allocation8 + $0x15]]  ;;  %v1042_v52 = vmul.f32 %v6674_v37, %v3740_v3  ;;  %v1004_v37 = vmul.f32 %v6686_v41, %v1001_v29 }
 0x142   : > { %s4320_s9 = sld [smem:[#allocation9 + $0x15]]  ;;  %v1029_v19 = vmax.f32 %v1026_v44, 0.0 }
 0x143   : > { %7189 = sst [smem:[#allocation128_spill]] %s4306_s4  ;;  %v6679_v0 = vstv %s4306_s4  ;;  %v1044_v58 = vadd.f32 %v1042_v52, %v1038_v45  ;;  %v6694_v52 = vstv %s4292_s14 }
 0x144   : > { %s4322_s2 = sld [smem:[#allocation3 + $0x42]]  ;;  %v1048_v1 = vmul.f32 %v6679_v0, %v3745_v4 }
 0x145   : > { %s4328_s22 = sld [smem:[#allocation3 + $0x43]] }
 0x146   : > { %s4334_s10 = sld [smem:[#allocation3 + $0x44]]  ;;  %v1050_v16 = vadd.f32 %v1048_v1, %v1044_v58  ;;  %v1006_v58 = vadd.f32 %v1004_v37, %v978_v20 }
 0x147   : > { %7190 = sst [smem:[#allocation129_spill]] %s4313_s8  ;;  %v6688_v6 = vstv %s4313_s8 }
 0x148   : > { %7191 = sst [smem:[#allocation130_spill]] %s4320_s9  ;;  %v1054_v29 = vadd.f32 %v6688_v6, %v1050_v16 }
 0x149   : > { %s4341_s5 = sld [smem:[#allocation8 + $0x16]] }
 0x14a   : > { %7192 = sst [smem:[#allocation131_spill]] %s4322_s2  ;;  %v6685_v51 = vstv %s4322_s2  ;;  %v1057_v16 = vmax.f32 %v1054_v29, 0.0 }
 0x14b   : > { %7193 = sst [smem:[#allocation132_spill]] %s4328_s22  ;;  %v1066_v0 = vmul.f32 %v6685_v51, %v3735_v2  ;;  %v6684_v45 = vstv %s4328_s22 }
 0x14c   : > { %7194 = sst [smem:[#allocation133_spill]] %s4334_s10  ;;  %v1070_v35 = vmul.f32 %v6684_v45, %v3740_v3  ;;  %v6689_v43 = vstv %s4334_s10  ;;  %v1032_v45 = vmul.f32 %v6694_v52, %v1029_v19 }
 0x14d   : > { %s4348_s29 = sld [smem:[#allocation9 + $0x16]]  ;;  %v1076_v44 = vmul.f32 %v6689_v43, %v3745_v4 }
 0x14e   : > { %s4350_s28 = sld [smem:[#allocation3 + $0x45]]  ;;  %v1072_v1 = vadd.f32 %v1070_v35, %v1066_v0  ;;  %v6704_v35 = vstv %s4320_s9 }
 0x14f   : > { %7195 = sst [smem:[#allocation134_spill]] %s4341_s5  ;;  %v6698_v51 = vstv %s4341_s5  ;;  %v1060_v52 = vmul.f32 %v6704_v35, %v1057_v16 }
 0x150   : > { %s4356_s11 = sld [smem:[#allocation3 + $0x46]]  ;;  %v1078_v6 = vadd.f32 %v1076_v44, %v1072_v1  ;;  %v1034_v1 = vadd.f32 %v1032_v45, %v1006_v58 }
 0x151   : > { %s4362_s4 = sld [smem:[#allocation3 + $0x47]] }
 0x152   : > { %s4369_s13 = sld [smem:[#allocation8 + $0x17]]  ;;  %v1082_v19 = vadd.f32 %v6698_v51, %v1078_v6 }
 0x153   : > { %7196 = sst [smem:[#allocation135_spill]] %s4348_s29 }
 0x154   : > { %7197 = sst [smem:[#allocation136_spill]] %s4350_s28  ;;  %v6696_v41 = vstv %s4350_s28  ;;  %v1085_v6 = vmax.f32 %v1082_v19, 0.0 }
 0x155   : > { %s4376_s2 = sld [smem:[#allocation9 + $0x17]]  ;;  %v1094_v43 = vmul.f32 %v6696_v41, %v3735_v2 }
 0x156   : > { %7198 = sst [smem:[#allocation137_spill]] %s4356_s11  ;;  %v6695_v0 = vstv %s4356_s11 }
 0x157   : > { %7199 = sst [smem:[#allocation138_spill]] %s4362_s4  ;;  %v1098_v37 = vmul.f32 %v6695_v0, %v3740_v3  ;;  %v6699_v20 = vstv %s4362_s4 }
 0x158   : > { %7200 = sst [smem:[#allocation139_spill]] %s4369_s13  ;;  %v1104_v29 = vmul.f32 %v6699_v20, %v3745_v4  ;;  %v6708_v0 = vstv %s4369_s13 }
 0x159   : > { %s4378_s30 = sld [smem:[#allocation3 + $0x48]]  ;;  %v1100_v44 = vadd.f32 %v1098_v37, %v1094_v43  ;;  %v6714_v37 = vstv %s4348_s29 }
 0x15a   : > { %s4384_s8 = sld [smem:[#allocation3 + $0x49]]  ;;  %v1088_v35 = vmul.f32 %v6714_v37, %v1085_v6 }
 0x15b   : > { %7201 = sst [smem:[#allocation140_spill]] %s4376_s2  ;;  %v1106_v51 = vadd.f32 %v1104_v29, %v1100_v44  ;;  %v1062_v44 = vadd.f32 %v1060_v52, %v1034_v1 }
 0x15c   : > { %s4390_s10 = sld [smem:[#allocation3 + $0x4a]] }
 0x15d   : > { %s4397_s14 = sld [smem:[#allocation8 + $0x18]]  ;;  %v1110_v16 = vadd.f32 %v6708_v0, %v1106_v51 }
 0x15e   : > { %s4404_s28 = sld [smem:[#allocation9 + $0x18]] }
 0x15f   : > { %7202 = sst [smem:[#allocation141_spill]] %s4378_s30  ;;  %v6706_v41 = vstv %s4378_s30  ;;  %v1113_v51 = vmax.f32 %v1110_v16, 0.0 }
 0x160   : > { %7203 = sst [smem:[#allocation142_spill]] %s4384_s8  ;;  %v1122_v20 = vmul.f32 %v6706_v41, %v3735_v2  ;;  %v6705_v43 = vstv %s4384_s8 }
 0x161   : > { %s4406_s22 = sld [smem:[#allocation3 + $0x4b]]  ;;  %v1126_v45 = vmul.f32 %v6705_v43, %v3740_v3 }
 0x162   : > { %7204 = sst [smem:[#allocation143_spill]] %s4390_s10  ;;  %v6709_v58 = vstv %s4390_s10 }
 0x163   : > { %7205 = sst [smem:[#allocation144_spill]] %s4397_s14  ;;  %v1132_v19 = vmul.f32 %v6709_v58, %v3745_v4  ;;  %v1128_v29 = vadd.f32 %v1126_v45, %v1122_v20  ;;  %v6718_v43 = vstv %s4397_s14  ;;  %v6724_v45 = vstv %s4376_s2 }
 0x164   : > { %7206 = sst [smem:[#allocation145_spill]] %s4404_s28  ;;  %v1116_v37 = vmul.f32 %v6724_v45, %v1113_v51 }
 0x165   : > { %s4412_s5 = sld [smem:[#allocation3 + $0x4c]]  ;;  %v1134_v0 = vadd.f32 %v1132_v19, %v1128_v29  ;;  %v1090_v29 = vadd.f32 %v1088_v35, %v1062_v44 }
 0x166   : > { %s4418_s4 = sld [smem:[#allocation3 + $0x4d]] }
 0x167   : > { %7207 = sst [smem:[#allocation146_spill]] %s4406_s22  ;;  %v6716_v41 = vstv %s4406_s22  ;;  %v1138_v6 = vadd.f32 %v6718_v43, %v1134_v0 }
 0x168   : > { %s4425_s9 = sld [smem:[#allocation8 + $0x19]]  ;;  %v1150_v58 = vmul.f32 %v6716_v41, %v3735_v2 }
 0x169   : > { %s4432_s30 = sld [smem:[#allocation9 + $0x19]]  ;;  %v1141_v0 = vmax.f32 %v1138_v6, 0.0 }
 0x16a   : > { %s4434_s11 = sld [smem:[#allocation3 + $0x4e]] }
 0x16b   : > { %7208 = sst [smem:[#allocation147_spill]] %s4412_s5  ;;  %v6715_v20 = vstv %s4412_s5 }
 0x16c   : > { %7209 = sst [smem:[#allocation148_spill]] %s4418_s4  ;;  %v1154_v52 = vmul.f32 %v6715_v20, %v3740_v3  ;;  %v6719_v1 = vstv %s4418_s4 }
 0x16d   : > { %s4440_s13 = sld [smem:[#allocation3 + $0x4f]]  ;;  %v1160_v16 = vmul.f32 %v6719_v1, %v3745_v4 }
 0x16e   : > { %7210 = sst [smem:[#allocation149_spill]] %s4425_s9  ;;  %v1156_v19 = vadd.f32 %v1154_v52, %v1150_v58  ;;  %v6727_v20 = vstv %s4425_s9  ;;  %v6732_v52 = vstv %s4404_s28 }
 0x16f   : > { %7211 = sst [smem:[#allocation150_spill]] %s4432_s30 }
 0x170   : > { %7212 = sst [smem:[#allocation151_spill]] %s4434_s11  ;;  %v6746_v41 = vstv %s4434_s11  ;;  %v1162_v43 = vadd.f32 %v1160_v16, %v1156_v19  ;;  %v1144_v19 = vmul.f32 %v6732_v52, %v1141_v0 }
 0x171   : > { %s4446_s10 = sld [smem:[#allocation3 + $0x50]]  ;;  %v1178_v1 = vmul.f32 %v6746_v41, %v3735_v2 }
 0x172   : > { %s4453_s29 = sld [smem:[#allocation8 + $0x1a]]  ;;  %v1166_v51 = vadd.f32 %v6727_v20, %v1162_v43 }
 0x173   : > { %s4460_s22 = sld [smem:[#allocation9 + $0x1a]]  ;;  %v6725_v58 = vstv %s4440_s13 }
 0x174   : > { %s4462_s8 = sld [smem:[#allocation3 + $0x51]]  ;;  %v1182_v35 = vmul.f32 %v6725_v58, %v3740_v3  ;;  %v1118_v3 = vadd.f32 %v1116_v37, %v1090_v29  ;;  %v1169_v43 = vmax.f32 %v1166_v51, 0.0  ;;  %v6742_v37 = vstv %s4432_s30  ;;  %v4506_v29 = vld [vmem:[%s3702_s20 + $0x10] sm:$0xff] }
 0x175   : > { %s4468_s14 = sld [smem:[#allocation3 + $0x52]] }
 0x176   : > { %s4474_s4 = sld [smem:[#allocation3 + $0x53]]  ;;  %v1184_v16 = vadd.f32 %v1182_v35, %v1178_v1  ;;  %v1146_v52 = vadd.f32 %v1144_v19, %v1118_v3 }
 0x177   : > { %7213 = sst [smem:[#allocation152_spill]] %s4446_s10  ;;  %v6737_v44 = vstv %s4446_s10 }
 0x178   : > { %7214 = sst [smem:[#allocation153_spill]] %s4453_s29  ;;  %v1188_v6 = vmul.f32 %v6737_v44, %v3745_v4  ;;  %v6736_v45 = vstv %s4453_s29 }
 0x179   : > { %7215 = sst [smem:[#allocation154_spill]] %s4460_s22  ;;  %v6753_v3 = vstv %s4460_s22 }
 0x17a   : > { %7216 = sst [smem:[#allocation155_spill]] %s4462_s8  ;;  %v6734_v58 = vstv %s4462_s8  ;;  %v1190_v20 = vadd.f32 %v1188_v6, %v1184_v16 }
 0x17b   : > { %7217 = sst [smem:[#allocation156_spill]] %s4468_s14  ;;  %v1206_v4 = vmul.f32 %v6734_v58, %v3735_v2  ;;  %v6733_v1 = vstv %s4468_s14  ;;  %v4517_v2 = vld [vmem:[%s3702_s20 + $0x20] sm:$0xff] }
 0x17c   : > { %7218 = sst [smem:[#allocation157_spill]] %s4474_s4  ;;  %v1210_v0 = vmul.f32 %v4506_v29, %v6733_v1  ;;  %v6738_v35 = vstv %s4474_s4  ;;  %v1194_v51 = vadd.f32 %v6736_v45, %v1190_v20  ;;  %v1172_v1 = vmul.f32 %v6742_v37, %v1169_v43 }
 0x17d   : > { %s4481_s2 = sld [smem:[#allocation8 + $0x1b]]  ;;  %v1216_v6 = vmul.f32 %v4517_v2, %v6738_v35  ;;  %v4533_v35 = vld [vmem:[%s3702_s20] sm:$0xff] }
 0x17e   : > { %s4488_s11 = sld [smem:[#allocation9 + $0x1b]]  ;;  %v1212_v16 = vadd.f32 %v1210_v0, %v1206_v4  ;;  %v1197_v45 = vmax.f32 %v1194_v51, 0.0 }
 0x17f   : > { %s4490_s5 = sld [smem:[#allocation3 + $0x54]] }
 0x180   : > { %s4496_s9 = sld [smem:[#allocation3 + $0x55]]  ;;  %v1218_v44 = vadd.f32 %v1216_v6, %v1212_v16  ;;  %v1174_v16 = vadd.f32 %v1172_v1, %v1146_v52 }
 0x181   : > { %s4502_s10 = sld [smem:[#allocation3 + $0x56]] }
 0x182   : > { %s4512_s28 = sld [smem:[#allocation8 + $0x1c]] }
 0x183   : > { %7219 = sst [smem:[#allocation158_spill]] %s4481_s2  ;;  %v6749_v58 = vstv %s4481_s2 }
 0x184   : > { %7220 = sst [smem:[#allocation159_spill]] %s4488_s11  ;;  %v1222_v51 = vadd.f32 %v6749_v58, %v1218_v44  ;;  %v6763_v44 = vstv %s4488_s11 }
 0x185   : > { %7221 = sst [smem:[#allocation160_spill]] %s4490_s5  ;;  %v6745_v20 = vstv %s4490_s5 }
 0x186   : > { %7222 = sst [smem:[#allocation161_spill]] %s4496_s9  ;;  %v1234_v4 = vmul.f32 %v4533_v35, %v6745_v20  ;;  %v6744_v0 = vstv %s4496_s9  ;;  %v1225_v20 = vmax.f32 %v1222_v51, 0.0 }
 0x187   : > { %7223 = sst [smem:[#allocation162_spill]] %s4502_s10  ;;  %v1238_v19 = vmul.f32 %v4506_v29, %v6744_v0  ;;  %v6801_v43 = vstv %s4502_s10  ;;  %v1200_v0 = vmul.f32 %v6753_v3, %v1197_v45 }
 0x188   : > { %7224 = sst [smem:[#allocation163_spill]] %s4512_s28  ;;  %v1244_v6 = vmul.f32 %v4517_v2, %v6801_v43  ;;  %v6757_v41 = vstv %s4512_s28 }
 0x189   : > { %s4522_s8 = sld [smem:[#allocation9 + $0x1c]]  ;;  %v1240_v37 = vadd.f32 %v1238_v19, %v1234_v4  ;;  %v1202_v51 = vadd.f32 %v1200_v0, %v1174_v16 }
 0x18a   : > { %s4524_s14 = sld [smem:[#allocation3 + $0x57]] }
 0x18b   : > { %s4530_s29 = sld [smem:[#allocation3 + $0x58]]  ;;  %v1246_v58 = vadd.f32 %v1244_v6, %v1240_v37  ;;  %v1228_v6 = vmul.f32 %v6763_v44, %v1225_v20 }
 0x18c   : > { %s4539_s4 = sld [smem:[#allocation3 + $0x59]] }
 0x18d   : > { %s4546_s30 = sld [smem:[#allocation8 + $0x1d]]  ;;  %v1250_v19 = vadd.f32 %v6757_v41, %v1246_v58 }
 0x18e   : > { %s4553_s5 = sld [smem:[#allocation9 + $0x1d]] }
 0x18f   : > { %7225 = sst [smem:[#allocation164_spill]] %s4522_s8 }
 0x190   : > { %7226 = sst [smem:[#allocation165_spill]] %s4524_s14  ;;  %v6756_v60 = vstv %s4524_s14 }
 0x191   : > { %7227 = sst [smem:[#allocation166_spill]] %s4530_s29  ;;  %v1262_v52 = vmul.f32 %v4533_v35, %v6756_v60  ;;  %v6755_v1 = vstv %s4530_s29  ;;  %v6768_v60 = vstv %s4522_s8 }
 0x192   : > { %7228 = sst [smem:[#allocation167_spill]] %s4539_s4  ;;  %v1266_v45 = vmul.f32 %v4506_v29, %v6755_v1  ;;  %v6759_v4 = vstv %s4539_s4  ;;  %v1253_v1 = vmax.f32 %v1250_v19, 0.0 }
 0x193   : > { %7229 = sst [smem:[#allocation168_spill]] %s4546_s30  ;;  %v1272_v37 = vmul.f32 %v4517_v2, %v6759_v4  ;;  %v6770_v58 = vstv %s4546_s30 }
 0x194   : > { %7230 = sst [smem:[#allocation169_spill]] %s4553_s5  ;;  %v1268_v3 = vadd.f32 %v1266_v45, %v1262_v52  ;;  %v1230_v45 = vadd.f32 %v1228_v6, %v1202_v51  ;;  %v1256_v19 = vmul.f32 %v6768_v60, %v1253_v1  ;;  %v6774_v44 = vstv %s4553_s5 }
 0x195   : > { %s4555_s9 = sld [smem:[#allocation3 + $0x5a]] }
 0x196   : > { %s4561_s2 = sld [smem:[#allocation3 + $0x5b]]  ;;  %v1274_v4 = vadd.f32 %v1272_v37, %v1268_v3 }
 0x197   : > { %s4568_s10 = sld [smem:[#allocation3 + $0x5c]] }
 0x198   : > { %s4574_s22 = sld [smem:[#allocation8 + $0x1e]]  ;;  %v1278_v3 = vadd.f32 %v6770_v58, %v1274_v4  ;;  %v1258_v58 = vadd.f32 %v1256_v19, %v1230_v45 }
 0x199   : > { %s4581_s14 = sld [smem:[#allocation9 + $0x1e]] }
 0x19a   : > { %s4585_s29 = sld [smem:[#allocation3 + $0x5d]] }
 0x19b   : > { %7231 = sst [smem:[#allocation170_spill]] %s4555_s9  ;;  %v6766_v41 = vstv %s4555_s9 }
 0x19c   : > { %7232 = sst [smem:[#allocation171_spill]] %s4561_s2  ;;  %v1290_v0 = vmul.f32 %v4533_v35, %v6766_v41  ;;  %v6764_v20 = vstv %s4561_s2  ;;  %v1281_v41 = vmax.f32 %v1278_v3, 0.0 }
 0x19d   : > { %7233 = sst [smem:[#allocation172_spill]] %s4568_s10  ;;  %v1294_v16 = vmul.f32 %v4506_v29, %v6764_v20  ;;  %v6800_v52 = vstv %s4568_s10 }
 0x19e   : > { %7234 = sst [smem:[#allocation173_spill]] %s4574_s22  ;;  %v1300_v37 = vmul.f32 %v4517_v2, %v6800_v52  ;;  %v6777_v51 = vstv %s4574_s22  ;;  %v4714_v52 = vld [vmem:[%s3702_s20 + $0x28] sm:$0xff] }
 0x19f   : > { %7235 = sst [smem:[#allocation174_spill]] %s4581_s14  ;;  %v1296_v20 = vadd.f32 %v1294_v16, %v1290_v0  ;;  %v1284_v0 = vmul.f32 %v6774_v44, %v1281_v41  ;;  %v6784_v45 = vstv %s4581_s14 }
 0x1a0   : > { %7236 = sst [smem:[#allocation175_spill]] %s4585_s29  ;;  %v6779_v1 = vstv %s4585_s29 }
 0x1a1   : > { %s4590_s28 = sld [smem:[#allocation3 + $0x5e]]  ;;  %v1302_v4 = vadd.f32 %v1300_v37, %v1296_v20  ;;  %v1318_v6 = vmul.f32 %v4533_v35, %v6779_v1 }
 0x1a2   : > { %s4596_s11 = sld [smem:[#allocation3 + $0x5f]] }
 0x1a3   : > { %s4602_s4 = sld [smem:[#allocation8 + $0x1f]]  ;;  %v1306_v20 = vadd.f32 %v6777_v51, %v1302_v4  ;;  %v1286_v4 = vadd.f32 %v1284_v0, %v1258_v58 }
 0x1a4   : > { %s4611_s9 = sld [smem:[#allocation9 + $0x1f]] }
 0x1a5   : > { %s4614_s2 = sld [smem:[#allocation3 + $0x60]]  ;;  %v1309_v19 = vmax.f32 %v1306_v20, 0.0 }
 0x1a6   : > { %s4618_s8 = sld [smem:[#allocation3 + $0x61]] }
 0x1a7   : > { %7237 = sst [smem:[#allocation176_spill]] %s4590_s28  ;;  %v6775_v60 = vstv %s4590_s28 }
 0x1a8   : > { %7238 = sst [smem:[#allocation177_spill]] %s4596_s11  ;;  %v1322_v16 = vmul.f32 %v4506_v29, %v6775_v60  ;;  %v6778_v3 = vstv %s4596_s11 }
 0x1a9   : > { %7239 = sst [smem:[#allocation178_spill]] %s4602_s4  ;;  %v1328_v37 = vmul.f32 %v4517_v2, %v6778_v3  ;;  %v6787_v44 = vstv %s4602_s4 }
 0x1aa   : > { %7240 = sst [smem:[#allocation179_spill]] %s4611_s9  ;;  %v1324_v41 = vadd.f32 %v1322_v16, %v1318_v6  ;;  %v1312_v6 = vmul.f32 %v6784_v45, %v1309_v19 }
 0x1ab   : > { %7241 = sst [smem:[#allocation180_spill]] %s4614_s2  ;;  %v6789_v60 = vstv %s4614_s2 }
 0x1ac   : > { %7242 = sst [smem:[#allocation181_spill]] %s4618_s8  ;;  %v1330_v51 = vadd.f32 %v1328_v37, %v1324_v41  ;;  %v1346_v3 = vmul.f32 %v4533_v35, %v6789_v60  ;;  %v6785_v1 = vstv %s4618_s8  ;;  %v6793_v37 = vstv %s4611_s9 }
 0x1ad   : > { %s4624_s30 = sld [smem:[#allocation3 + $0x62]]  ;;  %v1350_v16 = vmul.f32 %v4506_v29, %v6785_v1  ;;  %v1314_v19 = vadd.f32 %v1312_v6, %v1286_v4 }
 0x1ae   : > { %s4632_s10 = sld [smem:[#allocation8 + $0x20]]  ;;  %v1334_v58 = vadd.f32 %v6787_v44, %v1330_v51 }
 0x1af   : > { %s4639_s29 = sld [smem:[#allocation9 + $0x20]]  ;;  %v1352_v41 = vadd.f32 %v1350_v16, %v1346_v3 }
 0x1b0   : > { %s4642_s5 = sld [smem:[#allocation3 + $0x63]]  ;;  %v1337_v45 = vmax.f32 %v1334_v58, 0.0 }
 0x1b1   : > { %s4646_s22 = sld [smem:[#allocation3 + $0x64]] }
 0x1b2   : > { %s4652_s11 = sld [smem:[#allocation3 + $0x65]]  ;;  %v1340_v3 = vmul.f32 %v6793_v37, %v1337_v45  ;;  %v4699_v45 = vld [vmem:[%s3702_s20 + $0x8] sm:$0xff] }
 0x1b3   : > { %7243 = sst [smem:[#allocation182_spill]] %s4624_s30  ;;  %v6788_v20 = vstv %s4624_s30 }
 0x1b4   : > { %7244 = sst [smem:[#allocation183_spill]] %s4632_s10  ;;  %v1356_v0 = vmul.f32 %v4517_v2, %v6788_v20  ;;  %v6797_v1 = vstv %s4632_s10  ;;  %v1342_v37 = vadd.f32 %v1340_v3, %v1314_v19  ;;  %v479_v19 = vmul.f32 %v477_v12, %v4699_v45 }
 0x1b5   : > { %7245 = sst [smem:[#allocation184_spill]] %s4639_s29  ;;  %v6804_v58 = vstv %s4639_s29 }
 0x1b6   : > { %7246 = sst [smem:[#allocation185_spill]] %s4642_s5  ;;  %v6795_v51 = vstv %s4642_s5  ;;  %v1358_v44 = vadd.f32 %v1356_v0, %v1352_v41  ;;  %v4702_v41 = vld [vmem:[%s3702_s20 + $0x18] sm:$0xff] }
 0x1b7   : > { %s4660_s28 = sld [smem:[#allocation8 + $0x21]]  ;;  %v1374_v20 = vmul.f32 %v4533_v35, %v6795_v51  ;;  %v6794_v60 = vstv %s4646_s22 }
 0x1b8   : > { %s4667_s2 = sld [smem:[#allocation9 + $0x21]]  ;;  %v1378_v4 = vmul.f32 %v4506_v29, %v6794_v60  ;;  %v6798_v6 = vstv %s4652_s11  ;;  %v1362_v16 = vadd.f32 %v6797_v1, %v1358_v44  ;;  %v451_v44 = vmul.f32 %v449_v5, %v4699_v45 }
 0x1b9   : > { %s4670_s14 = sld [smem:[#allocation3 + $0x66]]  ;;  %v1384_v0 = vmul.f32 %v4517_v2, %v6798_v6 }
 0x1ba   : > { %s4674_s4 = sld [smem:[#allocation3 + $0x67]]  ;;  %v1380_v60 = vadd.f32 %v1378_v4, %v1374_v20  ;;  %v1365_v1 = vmax.f32 %v1362_v16, 0.0  ;;  %v455_v20 = vmul.f32 %v453_v7, %v4702_v41  ;;  %v461_v16 = vmul.f32 %v459_v9, %v4714_v52 }
 0x1bb   : > { %s4680_s30 = sld [smem:[#allocation3 + $0x68]]  ;;  %v483_v9 = vmul.f32 %v481_v14, %v4702_v41  ;;  %v489_v14 = vmul.f32 %v487_v17, %v4714_v52 }
 0x1bc   : > { %s4688_s8 = sld [smem:[#allocation8 + $0x22]]  ;;  %v1386_v3 = vadd.f32 %v1384_v0, %v1380_v60  ;;  %v1368_v43 = vmul.f32 %v6804_v58, %v1365_v1  ;;  %v457_v12 = vadd.f32 %v455_v20, %v451_v44 }
 0x1bd   : > { %s4696_s5 = sld [smem:[#allocation9 + $0x22]]  ;;  %v6805_v51 = vstv %s4660_s28 }
 0x1be   : > { %7247 = sst [smem:[#allocation186_spill]] %s4667_s2  ;;  %v1390_v60 = vadd.f32 %v6805_v51, %v1386_v3  ;;  %v6809_v0 = vstv %s4667_s2  ;;  %v1370_v1 = vadd.f32 %v1368_v43, %v1342_v37  ;;  %v463_v20 = vadd.f32 %v461_v16, %v457_v12 }
 0x1bf   : > { %s4705_s9 = sld [smem:[#allocation3 + $0x69]]  ;;  %v6803_v6 = vstv %s4670_s14 }
 0x1c0   : > { %s4711_s10 = sld [smem:[#allocation3 + $0x6a]]  ;;  %v1402_v5 = vmul.f32 %v4533_v35, %v6803_v6  ;;  %v1405_v4 = vstv %s4674_s4  ;;  %v1393_v3 = vmax.f32 %v1390_v60, 0.0  ;;  %v467_v16 = vadd.f32 %v465_v18, %v463_v20 }
 0x1c1   : > { %s4726_s27 = sld [smem:[#allocation3 + $0x6b]]  ;;  %v1406_v7 = vmul.f32 %v4506_v29, %v1405_v4  ;;  %v6807_v50 = vstv %s4680_s30 }
 0x1c2   : > { %7248 = sst [smem:[#allocation187_spill]] %s4688_s8  ;;  %v1412_v6 = vmul.f32 %v4517_v2, %v6807_v50  ;;  %v6813_v44 = vstv %s4688_s8  ;;  %v485_v50 = vadd.f32 %v483_v9, %v479_v19 }
 0x1c3   : > { %7249 = sst [smem:[#allocation188_spill]] %s4696_s5  ;;  %v1408_v58 = vadd.f32 %v1406_v7, %v1402_v5  ;;  %v1396_v7 = vmul.f32 %v6809_v0, %v1393_v3  ;;  %v470_v3 = vmax.f32 %v467_v16, 0.0 }
 0x1c4   : > { %s4737_s17 = sld [smem:[#allocation8 + $0x23]]  ;;  %v491_v17 = vadd.f32 %v489_v14, %v485_v50 }
 0x1c5   : > { %s4745_s23 = sld [smem:[#allocation9 + $0x23]]  ;;  %v1429_v51 = vstv %s4705_s9  ;;  %v1414_v43 = vadd.f32 %v1412_v6, %v1408_v58  ;;  %v6812_v58 = vstv %s4696_s5  ;;  %v1398_v9 = vadd.f32 %v1396_v7, %v1370_v1 }
 0x1c6   : > { %s4751_s16 = sld [smem:[#allocation3 + $0x6c]]  ;;  %v1430_v37 = vmul.f32 %v4533_v35, %v1429_v51  ;;  %v1433_v5 = vstv %s4711_s10  ;;  %v495_v50 = vadd.f32 %v493_v21, %v491_v17  ;;  %v507_v1 = vmul.f32 %v505_v22, %v4699_v45 }
 0x1c7   : > { %s4754_s29 = sld [smem:[#allocation3 + $0x6d]]  ;;  %v1434_v12 = vmul.f32 %v4506_v29, %v1433_v5  ;;  %v1439_v19 = vstv %s4726_s27  ;;  %v1418_v6 = vadd.f32 %v6813_v44, %v1414_v43  ;;  %v511_v22 = vmul.f32 %v509_v26, %v4702_v41 }
 0x1c8   : > { %s4763_s12 = sld [smem:[#allocation3 + $0x6e]]  ;;  %v1440_v18 = vmul.f32 %v4517_v2, %v1439_v19  ;;  %v498_v21 = vmax.f32 %v495_v50, 0.0 }
 0x1c9   : > { %s4773_s18 = sld [smem:[#allocation8 + $0x24]]  ;;  %v1436_v20 = vadd.f32 %v1434_v12, %v1430_v37  ;;  %v1421_v14 = vmax.f32 %v1418_v6, 0.0 }
 0x1ca   : > { %7250 = sst [smem:[#allocation189_spill]] %s4737_s17  ;;  %v6814_v60 = vstv %s4737_s17  ;;  %v501_v26 = vmul.f32 %v499_v40, %v498_v21  ;;  %v535_v40 = vmul.f32 %v533_v34, %v4699_v45 }
 0x1cb   : > { %7251 = sst [smem:[#allocation190_spill]] %s4745_s23  ;;  %v1451_v43 = vstv %s4745_s23  ;;  %v1442_v37 = vadd.f32 %v1440_v18, %v1436_v20  ;;  %v1424_v12 = vmul.f32 %v6812_v58, %v1421_v14  ;;  %v473_v14 = vmul.f32 %v471_v39, %v470_v3 }
 0x1cc   : > { %s4782_s0 = sld [smem:[#allocation9 + $0x24]]  ;;  %v1457_v0 = vstv %s4751_s16  ;;  %v517_v39 = vmul.f32 %v515_v28, %v4714_v52 }
 0x1cd   : > { %s4784_s2 = sld [smem:[#allocation3 + $0x6f]]  ;;  %v1458_v7 = vmul.f32 %v4533_v35, %v1457_v0  ;;  %v6816_v16 = vstv %s4754_s29  ;;  %v1446_v18 = vadd.f32 %v6814_v60, %v1442_v37  ;;  %v1426_v58 = vadd.f32 %v1424_v12, %v1398_v9 }
 0x1ce   : > { %s4790_s8 = sld [smem:[#allocation3 + $0x70]]  ;;  %v1462_v17 = vmul.f32 %v4506_v29, %v6816_v16  ;;  %v6815_v6 = vstv %s4763_s12  ;;  %v513_v37 = vadd.f32 %v511_v22, %v507_v1  ;;  %v503_v34 = vadd.f32 %v501_v26, %v473_v14 }
 0x1cf   : > { %7252 = sst [smem:[#allocation191_spill]] %s4773_s18  ;;  %v1468_v20 = vmul.f32 %v4517_v2, %v6815_v6  ;;  %v1473_v50 = vstv %s4773_s18  ;;  %v1449_v60 = vmax.f32 %v1446_v18, 0.0 }
 0x1d0   : > { %s4799_s24 = sld [smem:[#allocation3 + $0x71]]  ;;  %v1464_v44 = vadd.f32 %v1462_v17, %v1458_v7  ;;  %v519_v28 = vadd.f32 %v517_v39, %v513_v37 }
 0x1d1   : > { %s4807_s6 = sld [smem:[#allocation8 + $0x25]]  ;;  %v1452_v1 = vmul.f32 %v1451_v43, %v1449_v60  ;;  %v539_v60 = vmul.f32 %v537_v38, %v4702_v41  ;;  %v545_v38 = vmul.f32 %v543_v42, %v4714_v52 }
 0x1d2   : > { %7253 = sst [smem:[#allocation192_spill]] %s4782_s0  ;;  %v6824_v6 = vstv %s4782_s0  ;;  %v1470_v9 = vadd.f32 %v1468_v20, %v1464_v44  ;;  %v523_v37 = vadd.f32 %v521_v33, %v519_v28 }
 0x1d3   : > { %s4818_s5 = sld [smem:[#allocation9 + $0x25]]  ;;  %v1485_v16 = vstv %s4784_s2  ;;  %v1454_v22 = vadd.f32 %v1452_v1, %v1426_v58  ;;  %v541_v14 = vadd.f32 %v539_v60, %v535_v40 }
 0x1d4   : > { %s4822_s3 = sld [smem:[#allocation3 + $0x72]]  ;;  %v1486_v3 = vmul.f32 %v4533_v35, %v1485_v16  ;;  %v1489_v7 = vstv %s4790_s8  ;;  %v1474_v44 = vadd.f32 %v1473_v50, %v1470_v9  ;;  %v526_v33 = vmax.f32 %v523_v37, 0.0 }
 0x1d5   : > { %s4828_s17 = sld [smem:[#allocation3 + $0x73]]  ;;  %v1490_v21 = vmul.f32 %v4506_v29, %v1489_v7  ;;  %v547_v42 = vadd.f32 %v545_v38, %v541_v14 }
 0x1d6   : > { %7254 = sst [smem:[#allocation193_spill]] %s4799_s24  ;;  %v1495_v12 = vstv %s4799_s24  ;;  %v1477_v39 = vmax.f32 %v1474_v44, 0.0 }
 0x1d7   : > { %7255 = sst [smem:[#allocation194_spill]] %s4807_s6  ;;  %v1496_v17 = vmul.f32 %v4517_v2, %v1495_v12  ;;  %v1492_v18 = vadd.f32 %v1490_v21, %v1486_v3  ;;  %v6831_v20 = vstv %s4807_s6  ;;  %v551_v14 = vadd.f32 %v549_v48, %v547_v42 }
 0x1d8   : > { %s4837_s1 = sld [smem:[#allocation3 + $0x74]]  ;;  %v1480_v1 = vmul.f32 %v6824_v6, %v1477_v39  ;;  %v529_v39 = vmul.f32 %v527_v54, %v526_v33 }
 0x1d9   : > { %7256 = sst [smem:[#allocation195_spill]] %s4818_s5  ;;  %v1498_v58 = vadd.f32 %v1496_v17, %v1492_v18  ;;  %v6829_v44 = vstv %s4818_s5  ;;  %v554_v48 = vmax.f32 %v551_v14, 0.0 }
 0x1da   : > { %7257 = sst [smem:[#allocation196_spill]] %s4822_s3  ;;  %v1513_v9 = vstv %s4822_s3  ;;  %v1482_v18 = vadd.f32 %v1480_v1, %v1454_v22  ;;  %v563_v22 = vmul.f32 %v561_v49, %v4699_v45  ;;  %v567_v49 = vmul.f32 %v565_v53, %v4702_v41 }
 0x1db   : > { %7258 = sst [smem:[#allocation197_spill]] %s4828_s17  ;;  %v1514_v26 = vmul.f32 %v4533_v35, %v1513_v9  ;;  %v1517_v3 = vstv %s4828_s17  ;;  %v1502_v28 = vadd.f32 %v6831_v20, %v1498_v58  ;;  %v531_v14 = vadd.f32 %v529_v39, %v503_v34 }
 0x1dc   : > { %s4848_s25 = sld [smem:[#allocation8 + $0x26]]  ;;  %v1518_v21 = vmul.f32 %v4506_v29, %v1517_v3  ;;  %v557_v53 = vmul.f32 %v555_v10, %v554_v48  ;;  %v573_v34 = vmul.f32 %v571_v56, %v4714_v52  ;;  %v591_v10 = vmul.f32 %v589_v63, %v4699_v45 }
 0x1dd   : > { %s4855_s26 = sld [smem:[#allocation9 + $0x26]]  ;;  %v1505_v38 = vmax.f32 %v1502_v28, 0.0 }
 0x1de   : > { %7259 = sst [smem:[#allocation198_spill]] %s4837_s1  ;;  %v1523_v40 = vstv %s4837_s1  ;;  %v1520_v37 = vadd.f32 %v1518_v21, %v1514_v26  ;;  %v559_v63 = vadd.f32 %v557_v53, %v531_v14 }
 0x1df   : > { %s4861_s15 = sld [smem:[#allocation3 + $0x75]]  ;;  %v1524_v17 = vmul.f32 %v4517_v2, %v1523_v40  ;;  %v1508_v54 = vmul.f32 %v6829_v44, %v1505_v38 }
 0x1e0   : > { %s4866_s23 = sld [smem:[#allocation3 + $0x76]] }
 0x1e1   : > { %s4875_s7 = sld [smem:[#allocation3 + $0x77]]  ;;  %v1526_v26 = vadd.f32 %v1524_v17, %v1520_v37  ;;  %v1510_v38 = vadd.f32 %v1508_v54, %v1482_v18 }
 0x1e2   : > { %7260 = sst [smem:[#allocation199_spill]] %s4848_s25  ;;  %v6830_v60 = vstv %s4848_s25 }
 0x1e3   : > { %7261 = sst [smem:[#allocation200_spill]] %s4855_s26  ;;  %v6852_v58 = vstv %s4855_s26  ;;  %v1530_v28 = vadd.f32 %v6830_v60, %v1526_v26  ;;  %v569_v26 = vadd.f32 %v567_v49, %v563_v22 }
 0x1e4   : > { %s4883_s19 = sld [smem:[#allocation8 + $0x27]] }
 0x1e5   : > { %7262 = sst [smem:[#allocation201_spill]] %s4861_s15  ;;  %v1541_v6 = vstv %s4861_s15  ;;  %v1533_v60 = vmax.f32 %v1530_v28, 0.0  ;;  %v575_v56 = vadd.f32 %v573_v34, %v569_v26 }
 0x1e6   : > { %7263 = sst [smem:[#allocation202_spill]] %s4866_s23  ;;  %v1542_v1 = vmul.f32 %v4533_v35, %v1541_v6  ;;  %v1545_v21 = vstv %s4866_s23 }
 0x1e7   : > { %7265 = sst [smem:[#allocation38_spill]] %s4875_s7  ;;  %v1546_v33 = vmul.f32 %v4506_v29, %v1545_v21  ;;  %v6832_v42 = vstv %s4875_s7  ;;  %v1536_v22 = vmul.f32 %v6852_v58, %v1533_v60  ;;  %v595_v60 = vmul.f32 %v593_v8, %v4702_v41 }
 0x1e8   : > { %s4892_s0 = sld [smem:[#allocation9 + $0x27]]  ;;  %v1552_v17 = vmul.f32 %v4517_v2, %v6832_v42  ;;  %v579_v26 = vadd.f32 %v577_v62, %v575_v56  ;;  %v601_v8 = vmul.f32 %v599_v13, %v4714_v52 }
 0x1e9   : > { %s4894_s17 = sld [smem:[#allocation3 + $0x78]]  ;;  %v1548_v44 = vadd.f32 %v1546_v33, %v1542_v1  ;;  %v1538_v49 = vadd.f32 %v1536_v22, %v1510_v38  ;;  %v597_v14 = vadd.f32 %v595_v60, %v591_v10 }
 0x1ea   : > { %7267 = sst [smem:[#allocation39_spill]] %s4883_s19  ;;  %v1557_v37 = vstv %s4883_s19  ;;  %v582_v62 = vmax.f32 %v579_v26, 0.0 }
 0x1eb   : > { %s4902_s1 = sld [smem:[#allocation3 + $0x79]]  ;;  %v1554_v18 = vadd.f32 %v1552_v17, %v1548_v44  ;;  %v603_v13 = vadd.f32 %v601_v8, %v597_v14 }
 0x1ec   : > { %s4911_s18 = sld [smem:[#allocation3 + $0x7a]] }
 0x1ed   : > { %s4919_s3 = sld [smem:[#allocation8 + $0x28]]  ;;  %v1558_v44 = vadd.f32 %v1557_v37, %v1554_v18  ;;  %v607_v14 = vadd.f32 %v605_v24, %v603_v13 }
 0x1ee   : > { %7269 = sst [smem:[#allocation41_spill]] %s4892_s0  ;;  %v6844_v20 = vstv %s4892_s0 }
 0x1ef   : > { %7270 = sst [smem:[#allocation203_spill]] %s4894_s17  ;;  %v1569_v42 = vstv %s4894_s17  ;;  %v1561_v34 = vmax.f32 %v1558_v44, 0.0  ;;  %v610_v24 = vmax.f32 %v607_v14, 0.0 }
 0x1f0   : > { %s4930_s5 = sld [smem:[#allocation9 + $0x28]]  ;;  %v1570_v39 = vmul.f32 %v4533_v35, %v1569_v42 }
 0x1f1   : > { %7272 = sst [smem:[#allocation42_spill]] %s4902_s1  ;;  %v1573_v1 = vstv %s4902_s1  ;;  %v1564_v22 = vmul.f32 %v6844_v20, %v1561_v34  ;;  %v585_v34 = vmul.f32 %v583_v32, %v582_v62 }
 0x1f2   : > { %7274 = sst [smem:[#allocation40_spill]] %s4911_s18  ;;  %v1574_v48 = vmul.f32 %v4506_v29, %v1573_v1  ;;  %v1579_v54 = vstv %s4911_s18 }
 0x1f3   : > { %7275 = sst [smem:[#allocation204_spill]] %s4919_s3  ;;  %v1580_v33 = vmul.f32 %v4517_v2, %v1579_v54  ;;  %v6851_v17 = vstv %s4919_s3  ;;  %v587_v14 = vadd.f32 %v585_v34, %v559_v63  ;;  %v629_v63 = vmul.f32 %v627_v36, %v4714_v52 }
 0x1f4   : > { %s4932_s6 = sld [smem:[#allocation3 + $0x7b]]  ;;  %v1576_v28 = vadd.f32 %v1574_v48, %v1570_v39 }
 0x1f5   : > { %s4938_s25 = sld [smem:[#allocation3 + $0x7c]] }
 0x1f6   : > { %7277 = sst [smem:[#allocation43_spill]] %s4930_s5  ;;  %v1582_v38 = vadd.f32 %v1580_v33, %v1576_v28  ;;  %v6849_v44 = vstv %s4930_s5  ;;  %v1566_v28 = vadd.f32 %v1564_v22, %v1538_v49  ;;  %v619_v49 = vmul.f32 %v617_v25, %v4699_v45 }
 0x1f7   : > { %s4947_s21 = sld [smem:[#allocation3 + $0x7d]]  ;;  %v623_v25 = vmul.f32 %v621_v31, %v4702_v41  ;;  %v613_v31 = vmul.f32 %v611_v57, %v610_v24  ;;  %v647_v57 = vmul.f32 %v645_v47, %v4699_v45 }
 0x1f8   : > { %s4958_s24 = sld [smem:[#allocation8 + $0x29]]  ;;  %v1586_v56 = vadd.f32 %v6851_v17, %v1582_v38 }
 0x1f9   : > { %s4965_s23 = sld [smem:[#allocation9 + $0x29]]  ;;  %v615_v47 = vadd.f32 %v613_v31, %v587_v14 }
 0x1fa   : > { %7279 = sst [smem:[#allocation46_spill]] %s4932_s6  ;;  %v1597_v18 = vstv %s4932_s6  ;;  %v1589_v8 = vmax.f32 %v1586_v56, 0.0 }
 0x1fb   : > { %7280 = sst [smem:[#allocation205_spill]] %s4938_s25  ;;  %v1598_v53 = vmul.f32 %v4533_v35, %v1597_v18  ;;  %v1601_v39 = vstv %s4938_s25 }
 0x1fc   : > { %s4971_s26 = sld [smem:[#allocation3 + $0x7e]]  ;;  %v1602_v48 = vmul.f32 %v4506_v29, %v1601_v39  ;;  %v1592_v32 = vmul.f32 %v6849_v44, %v1589_v8 }
 0x1fd   : > { %7282 = sst [smem:[#allocation47_spill]] %s4947_s21  ;;  %v1607_v10 = vstv %s4947_s21 }
 0x1fe   : > { %7284 = sst [smem:[#allocation44_spill]] %s4958_s24  ;;  %v1608_v33 = vmul.f32 %v4517_v2, %v1607_v10  ;;  %v6850_v60 = vstv %s4958_s24  ;;  %v1604_v26 = vadd.f32 %v1602_v48, %v1598_v53  ;;  %v1594_v8 = vadd.f32 %v1592_v32, %v1566_v28 }
 0x1ff   : > { %7286 = sst [smem:[#allocation48_spill]] %s4965_s23  ;;  %v6872_v38 = vstv %s4965_s23 }
 0x200   : > { %s4976_s19 = sld [smem:[#allocation3 + $0x7f]]  ;;  %v1610_v53 = vadd.f32 %v1608_v33, %v1604_v26 }
 0x201   : > { %s4985_s15 = sld [smem:[#allocation3 + $0x80]] }
 0x202   : > { %7287 = sst [smem:[#allocation206_spill]] %s4971_s26  ;;  %v1625_v20 = vstv %s4971_s26  ;;  %v1614_v56 = vadd.f32 %v6850_v60, %v1610_v53  ;;  %v625_v53 = vadd.f32 %v623_v25, %v619_v49 }
 0x203   : > { %s4993_s17 = sld [smem:[#allocation8 + $0x2a]]  ;;  %v1626_v22 = vmul.f32 %v4533_v35, %v1625_v20 }
 0x204   : > { %s5002_s0 = sld [smem:[#allocation9 + $0x2a]]  ;;  %v1617_v60 = vmax.f32 %v1614_v56, 0.0  ;;  %v631_v36 = vadd.f32 %v629_v63, %v625_v53 }
 0x205   : > { %s5004_s25 = sld [smem:[#allocation3 + $0x81]] }
 0x206   : > { %7288 = sst [smem:[#allocation207_spill]] %s4976_s19  ;;  %v1629_v48 = vstv %s4976_s19  ;;  %v1620_v49 = vmul.f32 %v6872_v38, %v1617_v60  ;;  %v651_v60 = vmul.f32 %v649_v55, %v4702_v41  ;;  %v635_v53 = vadd.f32 %v633_v46, %v631_v36 }
 0x207   : > { %7290 = sst [smem:[#allocation45_spill]] %s4985_s15  ;;  %v1630_v62 = vmul.f32 %v4506_v29, %v1629_v48  ;;  %v1635_v13 = vstv %s4985_s15  ;;  %v657_v55 = vmul.f32 %v655_v59, %v4714_v52 }
 0x208   : > { %s5012_s21 = sld [smem:[#allocation3 + $0x82]]  ;;  %v1636_v33 = vmul.f32 %v4517_v2, %v1635_v13  ;;  %v1622_v25 = vadd.f32 %v1620_v49, %v1594_v8  ;;  %v653_v14 = vadd.f32 %v651_v60, %v647_v57  ;;  %v638_v46 = vmax.f32 %v635_v53, 0.0 }
 0x209   : > { %7292 = sst [smem:[#allocation49_spill]] %s4993_s17  ;;  %v1641_v26 = vstv %s4993_s17  ;;  %v1632_v44 = vadd.f32 %v1630_v62, %v1626_v22 }
 0x20a   : > { %7294 = sst [smem:[#allocation51_spill]] %s5002_s0  ;;  %v6864_v17 = vstv %s5002_s0  ;;  %v659_v59 = vadd.f32 %v657_v55, %v653_v14 }
 0x20b   : > { %7295 = sst [smem:[#allocation208_spill]] %s5004_s25  ;;  %v1653_v58 = vstv %s5004_s25  ;;  %v1638_v28 = vadd.f32 %v1636_v33, %v1632_v44 }
 0x20c   : > { %s5021_s18 = sld [smem:[#allocation3 + $0x83]]  ;;  %v1654_v34 = vmul.f32 %v4533_v35, %v1653_v58  ;;  %v663_v14 = vadd.f32 %v661_v11, %v659_v59 }
 0x20d   : > { %s5029_s6 = sld [smem:[#allocation8 + $0x2b]]  ;;  %v1642_v44 = vadd.f32 %v1641_v26, %v1638_v28 }
 0x20e   : > { %7297 = sst [smem:[#allocation52_spill]] %s5012_s21  ;;  %v1657_v22 = vstv %s5012_s21  ;;  %v666_v11 = vmax.f32 %v663_v14, 0.0 }
 0x20f   : > { %s5040_s5 = sld [smem:[#allocation9 + $0x2b]]  ;;  %v1658_v24 = vmul.f32 %v4506_v29, %v1657_v22  ;;  %v1645_v63 = vmax.f32 %v1642_v44, 0.0 }
 0x210   : > { %s5042_s3 = sld [smem:[#allocation3 + $0x84]] }
 0x211   : > { %s5048_s24 = sld [smem:[#allocation3 + $0x85]]  ;;  %v1660_v56 = vadd.f32 %v1658_v24, %v1654_v34  ;;  %v1648_v49 = vmul.f32 %v6864_v17, %v1645_v63  ;;  %v641_v63 = vmul.f32 %v639_v27, %v638_v46 }
 0x212   : > { %7299 = sst [smem:[#allocation50_spill]] %s5021_s18  ;;  %v1663_v32 = vstv %s5021_s18 }
 0x213   : > { %7300 = sst [smem:[#allocation209_spill]] %s5029_s6  ;;  %v1664_v62 = vmul.f32 %v4517_v2, %v1663_v32  ;;  %v6871_v33 = vstv %s5029_s6  ;;  %v643_v14 = vadd.f32 %v641_v63, %v615_v47  ;;  %v685_v47 = vmul.f32 %v683_v30, %v4714_v52 }
 0x214   : > { %s5057_s7 = sld [smem:[#allocation3 + $0x86]] }
 0x215   : > { %7302 = sst [smem:[#allocation53_spill]] %s5040_s5  ;;  %v1666_v8 = vadd.f32 %v1664_v62, %v1660_v56  ;;  %v6869_v44 = vstv %s5040_s5  ;;  %v1650_v56 = vadd.f32 %v1648_v49, %v1622_v25  ;;  %v675_v25 = vmul.f32 %v673_v15, %v4699_v45 }
 0x216   : > { %7304 = sst [smem:[#allocation56_spill]] %s5042_s3  ;;  %v1681_v28 = vstv %s5042_s3  ;;  %v679_v15 = vmul.f32 %v677_v23, %v4702_v41  ;;  %v669_v23 = vmul.f32 %v667_v61, %v666_v11 }
 0x217   : > { %7305 = sst [smem:[#allocation210_spill]] %s5048_s24  ;;  %v1682_v31 = vmul.f32 %v4533_v35, %v1681_v28  ;;  %v1685_v34 = vstv %s5048_s24  ;;  %v1670_v36 = vadd.f32 %v6871_v33, %v1666_v8 }
 0x218   : > { %s5068_s1 = sld [smem:[#allocation8 + $0x2c]]  ;;  %v1686_v24 = vmul.f32 %v4506_v29, %v1685_v34 }
 0x219   : > { %s5075_s19 = sld [smem:[#allocation9 + $0x2c]]  ;;  %v1673_v55 = vmax.f32 %v1670_v36, 0.0 }
 0x21a   : > { %7307 = sst [smem:[#allocation57_spill]] %s5057_s7  ;;  %v1691_v57 = vstv %s5057_s7  ;;  %v1688_v53 = vadd.f32 %v1686_v24, %v1682_v31 }
 0x21b   : > { %s5081_s23 = sld [smem:[#allocation3 + $0x87]]  ;;  %v1692_v62 = vmul.f32 %v4517_v2, %v1691_v57  ;;  %v1676_v27 = vmul.f32 %v6869_v44, %v1673_v55 }
 0x21c   : > { %s5086_s17 = sld [smem:[#allocation3 + $0x88]] }
 0x21d   : > { %s5095_s26 = sld [smem:[#allocation3 + $0x89]]  ;;  %v1694_v31 = vadd.f32 %v1692_v62, %v1688_v53  ;;  %v1678_v55 = vadd.f32 %v1676_v27, %v1650_v56 }
 0x21e   : > { %7309 = sst [smem:[#allocation54_spill]] %s5068_s1  ;;  %v6870_v60 = vstv %s5068_s1 }
 0x21f   : > { %7311 = sst [smem:[#allocation58_spill]] %s5075_s19  ;;  %v6877_v8 = vstv %s5075_s19  ;;  %v1698_v36 = vadd.f32 %v6870_v60, %v1694_v31  ;;  %v681_v31 = vadd.f32 %v679_v15, %v675_v25 }
 0x220   : > { %s5103_s25 = sld [smem:[#allocation8 + $0x2d]] }
 0x221   : > { %7312 = sst [smem:[#allocation211_spill]] %s5081_s23  ;;  %v1709_v17 = vstv %s5081_s23  ;;  %v1701_v60 = vmax.f32 %v1698_v36, 0.0  ;;  %v687_v30 = vadd.f32 %v685_v47, %v681_v31  ;;  %v671_v36 = vadd.f32 %v669_v23, %v643_v14 }
 0x222   : > { %7313 = sst [smem:[#allocation212_spill]] %s5086_s17  ;;  %v1710_v49 = vmul.f32 %v4533_v35, %v1709_v17  ;;  %v1713_v24 = vstv %s5086_s17 }
 0x223   : > { %7315 = sst [smem:[#allocation55_spill]] %s5095_s26  ;;  %v1714_v46 = vmul.f32 %v4506_v29, %v1713_v24  ;;  %v7045_v59 = vstv %s5095_s26  ;;  %v1704_v11 = vmul.f32 %v6877_v8, %v1701_v60 }
 0x224   : > { %s5112_s0 = sld [smem:[#allocation9 + $0x2d]]  ;;  %v1720_v62 = vmul.f32 %v4517_v2, %v7045_v59 }
 0x225   : > { %s5114_s24 = sld [smem:[#allocation3 + $0x8a]]  ;;  %v1716_v44 = vadd.f32 %v1714_v46, %v1710_v49 }
 0x226   : > { %7317 = sst [smem:[#allocation59_spill]] %s5103_s25  ;;  %v6880_v53 = vstv %s5103_s25 }
 0x227   : > { %s5122_s7 = sld [smem:[#allocation3 + $0x8b]]  ;;  %v1722_v56 = vadd.f32 %v1720_v62, %v1716_v44 }
 0x228   : > { %s5131_s18 = sld [smem:[#allocation3 + $0x8c]] }
 0x229   : > { %s5139_s3 = sld [smem:[#allocation8 + $0x2e]]  ;;  %v1726_v44 = vadd.f32 %v6880_v53, %v1722_v56 }
 0x22a   : > { %7319 = sst [smem:[#allocation61_spill]] %s5112_s0  ;;  %v6886_v33 = vstv %s5112_s0 }
 0x22b   : > { %7320 = sst [smem:[#allocation213_spill]] %s5114_s24  ;;  %v6933_v38 = vstv %s5114_s24  ;;  %v1729_v56 = vmax.f32 %v1726_v44, 0.0 }
 0x22c   : > { %s5150_s5 = sld [smem:[#allocation9 + $0x2e]]  ;;  %v1738_v63 = vmul.f32 %v4533_v35, %v6933_v38 }
 0x22d   : > { %7322 = sst [smem:[#allocation62_spill]] %s5122_s7  ;;  %v6878_v49 = vstv %s5122_s7  ;;  %v1732_v44 = vmul.f32 %v6886_v33, %v1729_v56 }
 0x22e   : > { %7324 = sst [smem:[#allocation60_spill]] %s5131_s18  ;;  %v1742_v27 = vmul.f32 %v4506_v29, %v6878_v49  ;;  %v6931_v46 = vstv %s5131_s18 }
 0x22f   : > { %7325 = sst [smem:[#allocation214_spill]] %s5139_s3  ;;  %v1748_v15 = vmul.f32 %v4517_v2, %v6931_v46  ;;  %v6888_v49 = vstv %s5139_s3 }
 0x230   : > { %s7328_s17 = sld [smem:[#allocation66_spill]]  ;;  %v1744_v8 = vadd.f32 %v1742_v27, %v1738_v63 }
 0x231   : > { %s5152_s6 = sld [smem:[#allocation3 + $0x8d]] }
 0x232   : > { %7327 = sst [smem:[#allocation63_spill]] %s5150_s5 }
 0x233   : > { %s5158_s1 = sld [smem:[#allocation3 + $0x8e]] }
 0x234   : > { %s7331_s26 = sld [smem:[#allocation67_spill]] }
 0x235   : > { %s5167_s15 = sld [smem:[#allocation3 + $0x8f]] }
 0x236   : > { %v7333_v61 = vstv %s7328_s17  ;;  %s7334_s23 = sld [smem:[#allocation64_spill]] }
 0x237   : > { %7329 = sst [smem:[#allocation66_spill]] %s5152_s6  ;;  %v703_v25 = vmul.f32 %v7333_v61, %v4699_v45  ;;  %v1706_v61 = vadd.f32 %v1704_v11, %v1678_v55  ;;  %v6892_v53 = vstv %s5152_s6  ;;  %v1750_v11 = vadd.f32 %v1748_v15, %v1744_v8 }
 0x238   : > { %s5178_s21 = sld [smem:[#allocation8 + $0x2f]]  ;;  %v1766_v63 = vmul.f32 %v4533_v35, %v6892_v53 }
 0x239   : > { %7330 = sst [smem:[#allocation215_spill]] %s5158_s1  ;;  %v6889_v27 = vstv %s5158_s1  ;;  %v1754_v15 = vadd.f32 %v6888_v49, %v1750_v11  ;;  %v1734_v56 = vadd.f32 %v1732_v44, %v1706_v61 }
 0x23a   : > { %s7336_s24 = sld [smem:[#allocation68_spill]]  ;;  %v7338_v60 = vstv %s7331_s26 }
 0x23b   : > { %7332 = sst [smem:[#allocation67_spill]] %s5167_s15  ;;  %v707_v62 = vmul.f32 %v7338_v60, %v4702_v41  ;;  %v1770_v60 = vmul.f32 %v4506_v29, %v6889_v27  ;;  %v1757_v49 = vmax.f32 %v1754_v15, 0.0 }
 0x23c   : > { %s5185_s17 = sld [smem:[#allocation9 + $0x2f]]  ;;  %v7340_v31 = vstv %s7334_s23 }
 0x23d   : > { %s5191_s19 = sld [smem:[#allocation3 + $0x90]]  ;;  %v691_v47 = vadd.f32 %v7340_v31, %v687_v30  ;;  %v709_v14 = vadd.f32 %v707_v62, %v703_v25  ;;  %v6890_v25 = vstv %s5167_s15  ;;  %v6896_v62 = vstv %s5150_s5 }
 0x23e   : > { %7335 = sst [smem:[#allocation64_spill]] %s5178_s21  ;;  %v1776_v31 = vmul.f32 %v4517_v2, %v6890_v25 }
 0x23f   : > { %s5196_s25 = sld [smem:[#allocation3 + $0x91]]  ;;  %v694_v30 = vmax.f32 %v691_v47, 0.0  ;;  %v6897_v47 = vstv %s5178_s21 }
 0x240   : > { %v7342_v23 = vstv %s7336_s24  ;;  %s7343_s26 = sld [smem:[#allocation65_spill]] }
 0x241   : > { %v713_v55 = vmul.f32 %v7342_v23, %v4714_v52  ;;  %s5205_s23 = sld [smem:[#allocation3 + $0x92]]  ;;  %v1772_v23 = vadd.f32 %v1770_v60, %v1766_v63 }
 0x242   : > { %7337 = sst [smem:[#allocation68_spill]] %s5185_s17  ;;  %v6904_v27 = vstv %s5185_s17 }
 0x243   : > { %7339 = sst [smem:[#allocation216_spill]] %s5191_s19  ;;  %v715_v8 = vadd.f32 %v713_v55, %v709_v14  ;;  %v6922_v25 = vstv %s5191_s19  ;;  %v1778_v63 = vadd.f32 %v1776_v31, %v1772_v23 }
 0x244   : > { %s7345_s18 = sld [smem:[#allocation69_spill]]  ;;  %v1794_v60 = vmul.f32 %v4533_v35, %v6922_v25 }
 0x245   : > { %7341 = sst [smem:[#allocation217_spill]] %s5196_s25  ;;  %v6898_v53 = vstv %s5196_s25 }
 0x246   : > { %s5213_s24 = sld [smem:[#allocation8 + $0x30]]  ;;  %v7350_v33 = vstv %s7343_s26 }
 0x247   : > { %7344 = sst [smem:[#allocation65_spill]] %s5205_s23  ;;  %v697_v14 = vmul.f32 %v7350_v33, %v694_v30  ;;  %v1760_v30 = vmul.f32 %v6896_v62, %v1757_v49  ;;  %v6899_v15 = vstv %s5205_s23 }
 0x248   : > { %s7347_s7 = sld [smem:[#allocation71_spill]] }
 0x249   : > { %s5222_s0 = sld [smem:[#allocation9 + $0x30]] }
 0x24a   : > { %s5224_s1 = sld [smem:[#allocation3 + $0x93]]  ;;  %v7351_v55 = vstv %s7345_s18 }
 0x24b   : > { %s7352_s3 = sld [smem:[#allocation72_spill]]  ;;  %v719_v11 = vadd.f32 %v7351_v55, %v715_v8  ;;  %v1798_v8 = vmul.f32 %v4506_v29, %v6898_v53  ;;  %v1782_v55 = vadd.f32 %v6897_v47, %v1778_v63  ;;  %v699_v29 = vadd.f32 %v697_v14, %v671_v36 }
 0x24c   : > { %7346 = sst [smem:[#allocation69_spill]] %s5213_s24  ;;  %v6907_v49 = vstv %s5213_s24 }
 0x24d   : > { %s5232_s15 = sld [smem:[#allocation3 + $0x94]]  ;;  %v722_v33 = vmax.f32 %v719_v11, 0.0  ;;  %v1804_v11 = vmul.f32 %v4517_v2, %v6899_v15  ;;  %v1800_v62 = vadd.f32 %v1798_v8, %v1794_v60  ;;  %v1785_v53 = vmax.f32 %v1782_v55, 0.0 }
 0x24e   : > { %v7354_v61 = vstv %s7347_s7  ;;  %s7355_s26 = sld [smem:[#allocation70_spill]] }
 0x24f   : > { %7348 = sst [smem:[#allocation71_spill]] %s5222_s0  ;;  %v731_v44 = vmul.f32 %v7354_v61, %v4699_v45  ;;  %v1762_v61 = vadd.f32 %v1760_v30, %v1734_v56  ;;  %v6914_v2 = vstv %s5222_s0  ;;  %v1806_v14 = vadd.f32 %v1804_v11, %v1800_v62 }
 0x250   : > { %7349 = sst [smem:[#allocation218_spill]] %s5224_s1  ;;  %v6908_v15 = vstv %s5224_s1  ;;  %v1788_v8 = vmul.f32 %v6904_v27, %v1785_v53 }
 0x251   : > { %s5241_s18 = sld [smem:[#allocation3 + $0x95]]  ;;  %v7358_v31 = vstv %s7352_s3  ;;  %v1822_v60 = vmul.f32 %v4533_v35, %v6908_v15  ;;  %v1810_v11 = vadd.f32 %v6907_v49, %v1806_v14 }
 0x252   : > { %s5249_s6 = sld [smem:[#allocation8 + $0x31]]  ;;  %v735_v23 = vmul.f32 %v7358_v31, %v4702_v41 }
 0x253   : > { %7353 = sst [smem:[#allocation72_spill]] %s5232_s15  ;;  %v6905_v30 = vstv %s5232_s15  ;;  %v1813_v15 = vmax.f32 %v1810_v11, 0.0 }
 0x254   : > { %s7359_s7 = sld [smem:[#allocation73_spill]]  ;;  %v7363_v31 = vstv %s7355_s26  ;;  %v737_v47 = vadd.f32 %v735_v23, %v731_v44  ;;  %v5285_v23 = vld [vmem:[%s3702_s20 + $0x10] sm:$0xff] }
 0x255   : > { %s5260_s5 = sld [smem:[#allocation9 + $0x31]]  ;;  %v725_v63 = vmul.f32 %v7363_v31, %v722_v33  ;;  %v1826_v55 = vmul.f32 %v5285_v23, %v6905_v30  ;;  %v5296_v31 = vld [vmem:[%s3702_s20 + $0x20] sm:$0xff]  ;;  %v1790_v30 = vadd.f32 %v1788_v8, %v1762_v61  ;;  %v1816_v11 = vmul.f32 %v6914_v2, %v1813_v15 }
 0x256   : > { %s7361_s25 = sld [smem:[#allocation76_spill]]  ;;  %v5318_v8 = vld [vmem:[%s3702_s20] sm:$0xff] }
 0x257   : > { %7356 = sst [smem:[#allocation70_spill]] %s5241_s18  ;;  %v6909_v62 = vstv %s5241_s18  ;;  %v1818_v15 = vadd.f32 %v1816_v11, %v1790_v30 }
 0x258   : > { %7357 = sst [smem:[#allocation219_spill]] %s5249_s6  ;;  %v1832_v53 = vmul.f32 %v5296_v31, %v6909_v62 }
 0x259   : > { %s5262_s3 = sld [smem:[#allocation3 + $0x96]] }
 0x25a   : > { %s5268_s21 = sld [smem:[#allocation3 + $0x97]]  ;;  %v7365_v36 = vstv %s7359_s7 }
 0x25b   : > { %7360 = sst [smem:[#allocation73_spill]] %s5260_s5  ;;  %v741_v56 = vmul.f32 %v7365_v36, %v4714_v52  ;;  %v727_v36 = vadd.f32 %v725_v63, %v699_v29 }
 0x25c   : > { %s7366_s23 = sld [smem:[#allocation77_spill]]  ;;  %v7368_v44 = vstv %s7361_s25 }
 0x25d   : > { %s5277_s26 = sld [smem:[#allocation3 + $0x98]]  ;;  %v759_v33 = vmul.f32 %v7368_v44, %v4699_v45  ;;  %v743_v35 = vadd.f32 %v741_v56, %v737_v47  ;;  %v1828_v47 = vadd.f32 %v1826_v55, %v1822_v60  ;;  %v6918_v56 = vstv %s5249_s6 }
 0x25e   : > { %s7369_s19 = sld [smem:[#allocation74_spill]] }
 0x25f   : > { %7362 = sst [smem:[#allocation76_spill]] %s5262_s3  ;;  %v6919_v62 = vstv %s5262_s3  ;;  %v1834_v60 = vadd.f32 %v1832_v53, %v1828_v47 }
 0x260   : > { %7364 = sst [smem:[#allocation220_spill]] %s5268_s21  ;;  %v1850_v55 = vmul.f32 %v5318_v8, %v6919_v62 }
 0x261   : > { %s5291_s7 = sld [smem:[#allocation8 + $0x32]]  ;;  %v1838_v47 = vadd.f32 %v6918_v56, %v1834_v60 }
 0x262   : > { %s7371_s1 = sld [smem:[#allocation78_spill]]  ;;  %v7373_v44 = vstv %s7366_s23 }
 0x263   : > { %7367 = sst [smem:[#allocation77_spill]] %s5277_s26  ;;  %v763_v27 = vmul.f32 %v7373_v44, %v4702_v41  ;;  %v6916_v44 = vstv %s5268_s21  ;;  %v1841_v56 = vmax.f32 %v1838_v47, 0.0 }
 0x264   : > { %s5301_s25 = sld [smem:[#allocation9 + $0x32]]  ;;  %v7375_v14 = vstv %s7369_s19 }
 0x265   : > { %s5307_s17 = sld [smem:[#allocation3 + $0x99]]  ;;  %v747_v49 = vadd.f32 %v7375_v14, %v743_v35  ;;  %v765_v29 = vadd.f32 %v763_v27, %v759_v33  ;;  %v1854_v27 = vmul.f32 %v5285_v23, %v6916_v44  ;;  %v6920_v33 = vstv %s5277_s26 }
 0x266   : > { %s5312_s24 = sld [smem:[#allocation3 + $0x9a]]  ;;  %v6926_v14 = vstv %s5260_s5 }
 0x267   : > { %7370 = sst [smem:[#allocation74_spill]] %s5291_s7  ;;  %v750_v35 = vmax.f32 %v747_v49, 0.0  ;;  %v1860_v49 = vmul.f32 %v5296_v31, %v6920_v33  ;;  %v1856_v2 = vadd.f32 %v1854_v27, %v1850_v55 }
 0x268   : > { %v7377_v63 = vstv %s7371_s1  ;;  %s7378_s19 = sld [smem:[#allocation75_spill]] }
 0x269   : > { %v769_v61 = vmul.f32 %v7377_v63, %v4714_v52  ;;  %s5324_s23 = sld [smem:[#allocation3 + $0x9b]]  ;;  %v6929_v63 = vstv %s5291_s7  ;;  %v1862_v55 = vadd.f32 %v1860_v49, %v1856_v2 }
 0x26a   : > { %7372 = sst [smem:[#allocation78_spill]] %s5301_s25  ;;  %v6937_v62 = vstv %s5301_s25 }
 0x26b   : > { %7374 = sst [smem:[#allocation221_spill]] %s5307_s17  ;;  %v771_v53 = vadd.f32 %v769_v61, %v765_v29  ;;  %v6928_v33 = vstv %s5307_s17 }
 0x26c   : > { %7376 = sst [smem:[#allocation222_spill]] %s5312_s24  ;;  %v1878_v27 = vmul.f32 %v5318_v8, %v6928_v33  ;;  %v6927_v25 = vstv %s5312_s24 }
 0x26d   : > { %s7380_s18 = sld [smem:[#allocation79_spill]] }
 0x26e   : > { %s5332_s1 = sld [smem:[#allocation8 + $0x33]]  ;;  %v7385_v44 = vstv %s7378_s19 }
 0x26f   : > { %7379 = sst [smem:[#allocation75_spill]] %s5324_s23  ;;  %v753_v29 = vmul.f32 %v7385_v44, %v750_v35  ;;  %v1844_v35 = vmul.f32 %v6926_v14, %v1841_v56  ;;  %v6930_v47 = vstv %s5324_s23 }
 0x270   : > { %s7382_s15 = sld [smem:[#allocation81_spill]] }
 0x271   : > { %s5341_s0 = sld [smem:[#allocation9 + $0x33]]  ;;  %v1846_v14 = vadd.f32 %v1844_v35, %v1818_v15 }
 0x272   : > { %s5343_s21 = sld [smem:[#allocation3 + $0x9c]] }
 0x273   : > { %v7386_v61 = vstv %s7380_s18  ;;  %s7387_s6 = sld [smem:[#allocation82_spill]] }
 0x274   : > { %7381 = sst [smem:[#allocation79_spill]] %s5332_s1  ;;  %v775_v60 = vadd.f32 %v7386_v61, %v771_v53  ;;  %v1882_v53 = vmul.f32 %v5285_v23, %v6927_v25  ;;  %v1866_v61 = vadd.f32 %v6929_v63, %v1862_v55  ;;  %v6939_v56 = vstv %s5332_s1 }
 0x275   : > { %s5351_s26 = sld [smem:[#allocation3 + $0x9d]] }
 0x276   : > { %v7389_v30 = vstv %s7382_s15  ;;  %s7390_s19 = sld [smem:[#allocation80_spill]]  ;;  %v778_v44 = vmax.f32 %v775_v60, 0.0  ;;  %v1888_v60 = vmul.f32 %v5296_v31, %v6930_v47  ;;  %v1884_v25 = vadd.f32 %v1882_v53, %v1878_v27 }
 0x277   : > { %7383 = sst [smem:[#allocation81_spill]] %s5341_s0  ;;  %v787_v11 = vmul.f32 %v7389_v30, %v4699_v45  ;;  %v755_v30 = vadd.f32 %v753_v29, %v727_v36  ;;  %v1869_v63 = vmax.f32 %v1866_v61, 0.0  ;;  %v6946_v47 = vstv %s5341_s0 }
 0x278   : > { %7384 = sst [smem:[#allocation223_spill]] %s5343_s21  ;;  %v6993_v46 = vstv %s5343_s21  ;;  %v1890_v15 = vadd.f32 %v1888_v60, %v1884_v25 }
 0x279   : > { %s5360_s18 = sld [smem:[#allocation3 + $0x9e]]  ;;  %v7393_v2 = vstv %s7387_s6  ;;  %v1906_v29 = vmul.f32 %v5318_v8, %v6993_v46  ;;  %v1872_v35 = vmul.f32 %v6937_v62, %v1869_v63 }
 0x27a   : > { %s5368_s3 = sld [smem:[#allocation8 + $0x34]]  ;;  %v791_v49 = vmul.f32 %v7393_v2, %v4702_v41  ;;  %v1894_v25 = vadd.f32 %v6939_v56, %v1890_v15 }
 0x27b   : > { %7388 = sst [smem:[#allocation82_spill]] %s5351_s26  ;;  %v6962_v27 = vstv %s5351_s26 }
 0x27c   : > { %s7394_s15 = sld [smem:[#allocation83_spill]]  ;;  %v7398_v2 = vstv %s7390_s19  ;;  %v793_v55 = vadd.f32 %v791_v49, %v787_v11  ;;  %v1910_v53 = vmul.f32 %v5285_v23, %v6962_v27  ;;  %v1897_v15 = vmax.f32 %v1894_v25, 0.0  ;;  %v5506_v27 = vld [vmem:[%s3702_s20 + $0x28] sm:$0xff] }
 0x27d   : > { %s5379_s5 = sld [smem:[#allocation9 + $0x34]]  ;;  %v781_v33 = vmul.f32 %v7398_v2, %v778_v44  ;;  %v1874_v2 = vadd.f32 %v1872_v35, %v1846_v14 }
 0x27e   : > { %s7396_s24 = sld [smem:[#allocation86_spill]] }
 0x27f   : > { %7391 = sst [smem:[#allocation80_spill]] %s5360_s18  ;;  %v6960_v49 = vstv %s5360_s18 }
 0x280   : > { %7392 = sst [smem:[#allocation224_spill]] %s5368_s3  ;;  %v1916_v61 = vmul.f32 %v5296_v31, %v6960_v49  ;;  %v6947_v62 = vstv %s5368_s3 }
 0x281   : > { %s5381_s6 = sld [smem:[#allocation3 + $0x9f]] }
 0x282   : > { %s5387_s7 = sld [smem:[#allocation3 + $0xa0]]  ;;  %v7400_v38 = vstv %s7394_s15 }
 0x283   : > { %7395 = sst [smem:[#allocation83_spill]] %s5379_s5  ;;  %v797_v36 = vmul.f32 %v7400_v38, %v4714_v52 }
 0x284   : > { %s7401_s23 = sld [smem:[#allocation87_spill]]  ;;  %v7403_v11 = vstv %s7396_s24 }
 0x285   : > { %s5396_s19 = sld [smem:[#allocation3 + $0xa1]]  ;;  %v815_v44 = vmul.f32 %v7403_v11, %v4699_v45  ;;  %v799_v38 = vadd.f32 %v797_v36, %v793_v55  ;;  %v783_v45 = vadd.f32 %v781_v33, %v755_v30  ;;  %v1912_v11 = vadd.f32 %v1910_v53, %v1906_v29 }
 0x286   : > { %s7404_s17 = sld [smem:[#allocation84_spill]] }
 0x287   : > { %7397 = sst [smem:[#allocation86_spill]] %s5381_s6  ;;  %v6957_v56 = vstv %s5381_s6  ;;  %v1918_v30 = vadd.f32 %v1916_v61, %v1912_v11 }
 0x288   : > { %7399 = sst [smem:[#allocation225_spill]] %s5387_s7  ;;  %v1934_v29 = vmul.f32 %v5318_v8, %v6957_v56  ;;  %v6956_v35 = vstv %s5387_s7 }
 0x289   : > { %s5407_s15 = sld [smem:[#allocation8 + $0x35]]  ;;  %v1938_v25 = vmul.f32 %v5285_v23, %v6956_v35  ;;  %v1922_v61 = vadd.f32 %v6947_v62, %v1918_v30 }
 0x28a   : > { %s7406_s21 = sld [smem:[#allocation88_spill]]  ;;  %v7408_v63 = vstv %s7401_s23 }
 0x28b   : > { %7402 = sst [smem:[#allocation87_spill]] %s5396_s19  ;;  %v819_v60 = vmul.f32 %v7408_v63, %v4702_v41  ;;  %v6953_v63 = vstv %s5379_s5  ;;  %v1925_v30 = vmax.f32 %v1922_v61, 0.0 }
 0x28c   : > { %s5414_s24 = sld [smem:[#allocation9 + $0x35]]  ;;  %v7410_v55 = vstv %s7404_s17 }
 0x28d   : > { %s5420_s25 = sld [smem:[#allocation3 + $0xa2]]  ;;  %v803_v36 = vadd.f32 %v7410_v55, %v799_v38  ;;  %v821_v33 = vadd.f32 %v819_v60, %v815_v44  ;;  %v1900_v38 = vmul.f32 %v6946_v47, %v1897_v15  ;;  %v6949_v44 = vstv %s5396_s19 }
 0x28e   : > { %s5425_s1 = sld [smem:[#allocation3 + $0xa3]]  ;;  %v1944_v60 = vmul.f32 %v5296_v31, %v6949_v44 }
 0x28f   : > { %7405 = sst [smem:[#allocation84_spill]] %s5407_s15  ;;  %v806_v53 = vmax.f32 %v803_v36, 0.0  ;;  %v6958_v11 = vstv %s5407_s15  ;;  %v1902_v55 = vadd.f32 %v1900_v38, %v1874_v2  ;;  %v1940_v36 = vadd.f32 %v1938_v25, %v1934_v29  ;;  %v5464_v2 = vld [vmem:[%s3702_s20 + $0x8] sm:$0xff] }
 0x290   : > { %v7412_v41 = vstv %s7406_s21  ;;  %s7413_s23 = sld [smem:[#allocation85_spill]] }
 0x291   : > { %v825_v14 = vmul.f32 %v7412_v41, %v4714_v52  ;;  %s5434_s17 = sld [smem:[#allocation3 + $0xa4]]  ;;  %v1946_v25 = vadd.f32 %v1944_v60, %v1940_v36 }
 0x292   : > { %7407 = sst [smem:[#allocation88_spill]] %s5414_s24  ;;  %v6966_v47 = vstv %s5414_s24 }
 0x293   : > { %7409 = sst [smem:[#allocation226_spill]] %s5420_s25  ;;  %v827_v52 = vadd.f32 %v825_v14, %v821_v33  ;;  %v6951_v62 = vstv %s5420_s25 }
 0x294   : > { %7411 = sst [smem:[#allocation227_spill]] %s5425_s1 }
 0x295   : > { %s7415_s18 = sld [smem:[#allocation89_spill]] }
 0x296   : > { %s5442_s21 = sld [smem:[#allocation8 + $0x36]]  ;;  %v7420_v15 = vstv %s7413_s23 }
 0x297   : > { %7414 = sst [smem:[#allocation85_spill]] %s5434_s17  ;;  %v809_v33 = vmul.f32 %v7420_v15, %v806_v53  ;;  %v1962_v53 = vmul.f32 %v5318_v8, %v6951_v62  ;;  %v1928_v15 = vmul.f32 %v6953_v63, %v1925_v30  ;;  %v6959_v44 = vstv %s5434_s17 }
 0x298   : > { %s7417_s6 = sld [smem:[#allocation91_spill]]  ;;  %v1950_v62 = vadd.f32 %v6958_v11, %v1946_v25 }
 0x299   : > { %s5451_s0 = sld [smem:[#allocation9 + $0x36]]  ;;  %v811_v63 = vadd.f32 %v809_v33, %v783_v45 }
 0x29a   : > { %s5453_s7 = sld [smem:[#allocation3 + $0xa5]]  ;;  %v1953_v11 = vmax.f32 %v1950_v62, 0.0 }
 0x29b   : > { %v7421_v41 = vstv %s7415_s18  ;;  %s7422_s3 = sld [smem:[#allocation92_spill]] }
 0x29c   : > { %7416 = sst [smem:[#allocation89_spill]] %s5442_s21  ;;  %v831_v14 = vadd.f32 %v7421_v41, %v827_v52  ;;  %v6955_v52 = vstv %s5425_s1  ;;  %v6970_v30 = vstv %s5442_s21 }
 0x29d   : > { %s5461_s19 = sld [smem:[#allocation3 + $0xa6]]  ;;  %v1966_v41 = vmul.f32 %v5285_v23, %v6955_v52  ;;  %v1930_v52 = vadd.f32 %v1928_v15, %v1902_v55  ;;  %v1956_v15 = vmul.f32 %v6966_v47, %v1953_v11 }
 0x29e   : > { %v7424_v29 = vstv %s7417_s6  ;;  %s5473_s18 = sld [smem:[#allocation3 + $0xa7]]  ;;  %v834_v61 = vmax.f32 %v831_v14, 0.0  ;;  %v1972_v14 = vmul.f32 %v5296_v31, %v6959_v44 }
 0x29f   : > { %7418 = sst [smem:[#allocation91_spill]] %s5451_s0  ;;  %v843_v38 = vmul.f32 %v5464_v2, %v7424_v29  ;;  %v5484_v29 = vld [vmem:[%s3702_s20 + $0x18] sm:$0xff]  ;;  %v1968_v35 = vadd.f32 %v1966_v41, %v1962_v53  ;;  %v6976_v44 = vstv %s5451_s0  ;;  %v1958_v47 = vadd.f32 %v1956_v15, %v1930_v52 }
 0x2a0   : > { %7419 = sst [smem:[#allocation228_spill]] %s5453_s7  ;;  %v6968_v49 = vstv %s5453_s7 }
 0x2a1   : > { %s7426_s23 = sld [smem:[#allocation90_spill]]  ;;  %v7428_v60 = vstv %s7422_s3  ;;  %v1974_v33 = vadd.f32 %v1972_v14, %v1968_v35  ;;  %v1990_v53 = vmul.f32 %v5318_v8, %v6968_v49 }
 0x2a2   : > { %s5481_s6 = sld [smem:[#allocation8 + $0x37]]  ;;  %v847_v36 = vmul.f32 %v5484_v29, %v7428_v60 }
 0x2a3   : > { %7423 = sst [smem:[#allocation92_spill]] %s5461_s19  ;;  %v1978_v14 = vadd.f32 %v6970_v30, %v1974_v33 }
 0x2a4   : > { %7425 = sst [smem:[#allocation229_spill]] %s5473_s18  ;;  %v849_v25 = vadd.f32 %v847_v36, %v843_v38  ;;  %v6991_v36 = vstv %s5473_s18 }
 0x2a5   : > { %s7429_s25 = sld [smem:[#allocation93_spill]]  ;;  %v1981_v33 = vmax.f32 %v1978_v14, 0.0 }
 0x2a6   : > { %s5495_s5 = sld [smem:[#allocation9 + $0x37]] }
 0x2a7   : > { %s7431_s1 = sld [smem:[#allocation96_spill]]  ;;  %v7433_v60 = vstv %s7426_s23  ;;  %v1984_v14 = vmul.f32 %v6976_v44, %v1981_v33 }
 0x2a8   : > { %7427 = sst [smem:[#allocation90_spill]] %s5481_s6  ;;  %v837_v56 = vmul.f32 %v7433_v60, %v834_v61  ;;  %v6967_v61 = vstv %s5461_s19  ;;  %v2000_v60 = vmul.f32 %v5296_v31, %v6991_v36  ;;  %v6978_v49 = vstv %s5481_s6 }
 0x2a9   : > { %s5497_s3 = sld [smem:[#allocation3 + $0xa8]]  ;;  %v1994_v41 = vmul.f32 %v5285_v23, %v6967_v61  ;;  %v1986_v33 = vadd.f32 %v1984_v14, %v1958_v47 }
 0x2aa   : > { %s5503_s15 = sld [smem:[#allocation3 + $0xa9]] }
 0x2ab   : > { %v7435_v45 = vstv %s7429_s25  ;;  %s7436_s17 = sld [smem:[#allocation97_spill]]  ;;  %v1996_v61 = vadd.f32 %v1994_v41, %v1990_v53 }
 0x2ac   : > { %7430 = sst [smem:[#allocation93_spill]] %s5495_s5  ;;  %v853_v55 = vmul.f32 %v5506_v27, %v7435_v45  ;;  %v839_v45 = vadd.f32 %v837_v56, %v811_v63 }
 0x2ad   : > { %s5515_s23 = sld [smem:[#allocation3 + $0xaa]]  ;;  %v7438_v62 = vstv %s7431_s1  ;;  %v2002_v15 = vadd.f32 %v2000_v60, %v1996_v61 }
 0x2ae   : > { %s7439_s26 = sld [smem:[#allocation94_spill]]  ;;  %v871_v38 = vmul.f32 %v5464_v2, %v7438_v62  ;;  %v855_v35 = vadd.f32 %v853_v55, %v849_v25 }
 0x2af   : > { %7432 = sst [smem:[#allocation96_spill]] %s5497_s3  ;;  %v6982_v30 = vstv %s5497_s3  ;;  %v2006_v60 = vadd.f32 %v6978_v49, %v2002_v15 }
 0x2b0   : > { %7434 = sst [smem:[#allocation230_spill]] %s5503_s15  ;;  %v2018_v53 = vmul.f32 %v5318_v8, %v6982_v30  ;;  %v6979_v41 = vstv %s5503_s15 }
 0x2b1   : > { %s5526_s25 = sld [smem:[#allocation8 + $0x38]]  ;;  %v7443_v11 = vstv %s7436_s17  ;;  %v2009_v49 = vmax.f32 %v2006_v60, 0.0 }
 0x2b2   : > { %s7441_s7 = sld [smem:[#allocation98_spill]]  ;;  %v875_v62 = vmul.f32 %v5484_v29, %v7443_v11  ;;  %v2022_v11 = vmul.f32 %v5285_v23, %v6979_v41 }
 0x2b3   : > { %7437 = sst [smem:[#allocation97_spill]] %s5515_s23 }
 0x2b4   : > { %s5533_s1 = sld [smem:[#allocation9 + $0x38]]  ;;  %v7445_v25 = vstv %s7439_s26  ;;  %v877_v56 = vadd.f32 %v875_v62, %v871_v38  ;;  %v6980_v38 = vstv %s5515_s23  ;;  %v6986_v62 = vstv %s5495_s5 }
 0x2b5   : > { %s5539_s24 = sld [smem:[#allocation3 + $0xab]]  ;;  %v859_v55 = vadd.f32 %v7445_v25, %v855_v35  ;;  %v2028_v25 = vmul.f32 %v5296_v31, %v6980_v38 }
 0x2b6   : > { %s5544_s21 = sld [smem:[#allocation3 + $0xac]] }
 0x2b7   : > { %7440 = sst [smem:[#allocation94_spill]] %s5526_s25  ;;  %v862_v35 = vmax.f32 %v859_v55, 0.0  ;;  %v6989_v55 = vstv %s5526_s25 }
 0x2b8   : > { %v7447_v63 = vstv %s7441_s7  ;;  %s7448_s17 = sld [smem:[#allocation95_spill]] }
 0x2b9   : > { %v881_v52 = vmul.f32 %v5506_v27, %v7447_v63  ;;  %s5553_s26 = sld [smem:[#allocation3 + $0xad]]  ;;  %v2024_v63 = vadd.f32 %v2022_v11, %v2018_v53 }
 0x2ba   : > { %7442 = sst [smem:[#allocation98_spill]] %s5533_s1  ;;  %v6997_v41 = vstv %s5533_s1 }
 0x2bb   : > { %7444 = sst [smem:[#allocation231_spill]] %s5539_s24  ;;  %v883_v61 = vadd.f32 %v881_v52, %v877_v56  ;;  %v6988_v38 = vstv %s5539_s24  ;;  %v2030_v53 = vadd.f32 %v2028_v25, %v2024_v63 }
 0x2bc   : > { %7446 = sst [smem:[#allocation232_spill]] %s5544_s21  ;;  %v2046_v14 = vmul.f32 %v5318_v8, %v6988_v38  ;;  %v6987_v11 = vstv %s5544_s21 }
 0x2bd   : > { %s7450_s18 = sld [smem:[#allocation99_spill]]  ;;  %v2034_v63 = vadd.f32 %v6989_v55, %v2030_v53 }
 0x2be   : > { %s5561_s7 = sld [smem:[#allocation8 + $0x39]]  ;;  %v7455_v44 = vstv %s7448_s17 }
 0x2bf   : > { %7449 = sst [smem:[#allocation95_spill]] %s5553_s26  ;;  %v865_v56 = vmul.f32 %v7455_v44, %v862_v35  ;;  %v2012_v35 = vmul.f32 %v6986_v62, %v2009_v49  ;;  %v6990_v60 = vstv %s5553_s26  ;;  %v2037_v55 = vmax.f32 %v2034_v63, 0.0 }
 0x2c0   : > { %s7452_s19 = sld [smem:[#allocation101_spill]] }
 0x2c1   : > { %s5570_s0 = sld [smem:[#allocation9 + $0x39]]  ;;  %v2014_v62 = vadd.f32 %v2012_v35, %v1986_v33  ;;  %v2040_v35 = vmul.f32 %v6997_v41, %v2037_v55 }
 0x2c2   : > { %s5572_s15 = sld [smem:[#allocation3 + $0xae]] }
 0x2c3   : > { %v7456_v52 = vstv %s7450_s18  ;;  %s7457_s6 = sld [smem:[#allocation102_spill]] }
 0x2c4   : > { %7451 = sst [smem:[#allocation99_spill]] %s5561_s7  ;;  %v887_v15 = vadd.f32 %v7456_v52, %v883_v61  ;;  %v2050_v61 = vmul.f32 %v5285_v23, %v6987_v11  ;;  %v2056_v52 = vmul.f32 %v5296_v31, %v6990_v60  ;;  %v7000_v49 = vstv %s5561_s7 }
 0x2c5   : > { %s5580_s23 = sld [smem:[#allocation3 + $0xaf]] }
 0x2c6   : > { %v7459_v30 = vstv %s7452_s19  ;;  %s7460_s17 = sld [smem:[#allocation100_spill]]  ;;  %v890_v44 = vmax.f32 %v887_v15, 0.0  ;;  %v867_v15 = vadd.f32 %v865_v56, %v839_v45  ;;  %v2052_v11 = vadd.f32 %v2050_v61, %v2046_v14 }
 0x2c7   : > { %7453 = sst [smem:[#allocation101_spill]] %s5570_s0  ;;  %v899_v47 = vmul.f32 %v5464_v2, %v7459_v30  ;;  %v7005_v60 = vstv %s5570_s0 }
 0x2c8   : > { %7454 = sst [smem:[#allocation233_spill]] %s5572_s15  ;;  %v7044_v36 = vstv %s5572_s15  ;;  %v2058_v33 = vadd.f32 %v2056_v52, %v2052_v11 }
 0x2c9   : > { %s5589_s18 = sld [smem:[#allocation3 + $0xb0]]  ;;  %v7463_v30 = vstv %s7457_s6  ;;  %v2074_v56 = vmul.f32 %v5318_v8, %v7044_v36 }
 0x2ca   : > { %s5597_s19 = sld [smem:[#allocation8 + $0x3a]]  ;;  %v903_v25 = vmul.f32 %v5484_v29, %v7463_v30  ;;  %v2062_v11 = vadd.f32 %v7000_v49, %v2058_v33 }
 0x2cb   : > { %7458 = sst [smem:[#allocation102_spill]] %s5580_s23  ;;  %v6998_v14 = vstv %s5580_s23 }
 0x2cc   : > { %s7464_s24 = sld [smem:[#allocation103_spill]]  ;;  %v7468_v30 = vstv %s7460_s17  ;;  %v905_v53 = vadd.f32 %v903_v25, %v899_v47  ;;  %v2078_v61 = vmul.f32 %v5285_v23, %v6998_v14  ;;  %v2065_v33 = vmax.f32 %v2062_v11, 0.0 }
 0x2cd   : > { %s5608_s5 = sld [smem:[#allocation9 + $0x3a]]  ;;  %v893_v38 = vmul.f32 %v7468_v30, %v890_v44 }
 0x2ce   : > { %s7466_s21 = sld [smem:[#allocation106_spill]]  ;;  %v2080_v41 = vadd.f32 %v2078_v61, %v2074_v56  ;;  %v2068_v11 = vmul.f32 %v7005_v60, %v2065_v33 }
 0x2cf   : > { %7461 = sst [smem:[#allocation100_spill]] %s5589_s18  ;;  %v7022_v25 = vstv %s5589_s18  ;;  %v895_v52 = vadd.f32 %v893_v38, %v867_v15 }
 0x2d0   : > { %7462 = sst [smem:[#allocation234_spill]] %s5597_s19  ;;  %v2084_v63 = vmul.f32 %v5296_v31, %v7022_v25  ;;  %v7009_v14 = vstv %s5597_s19 }
 0x2d1   : > { %s5610_s6 = sld [smem:[#allocation3 + $0xb1]] }
 0x2d2   : > { %s5616_s25 = sld [smem:[#allocation3 + $0xb2]]  ;;  %v7470_v46 = vstv %s7464_s24 }
 0x2d3   : > { %7465 = sst [smem:[#allocation103_spill]] %s5608_s5  ;;  %v909_v45 = vmul.f32 %v5506_v27, %v7470_v46 }
 0x2d4   : > { %s7471_s26 = sld [smem:[#allocation107_spill]]  ;;  %v7473_v47 = vstv %s7466_s21 }
 0x2d5   : > { %s5625_s17 = sld [smem:[#allocation3 + $0xb3]]  ;;  %v927_v44 = vmul.f32 %v5464_v2, %v7473_v47  ;;  %v911_v46 = vadd.f32 %v909_v45, %v905_v53  ;;  %v2042_v47 = vadd.f32 %v2040_v35, %v2014_v62  ;;  %v2086_v35 = vadd.f32 %v2084_v63, %v2080_v41 }
 0x2d6   : > { %s7474_s3 = sld [smem:[#allocation104_spill]] }
 0x2d7   : > { %7467 = sst [smem:[#allocation106_spill]] %s5610_s6  ;;  %v7021_v49 = vstv %s5610_s6  ;;  %v2090_v63 = vadd.f32 %v7009_v14, %v2086_v35 }
 0x2d8   : > { %7469 = sst [smem:[#allocation235_spill]] %s5616_s25  ;;  %v2102_v56 = vmul.f32 %v5318_v8, %v7021_v49  ;;  %v7006_v61 = vstv %s5616_s25 }
 0x2d9   : > { %s5636_s24 = sld [smem:[#allocation8 + $0x3b]] }
 0x2da   : > { %s7476_s15 = sld [smem:[#allocation108_spill]]  ;;  %v7478_v55 = vstv %s7471_s26 }
 0x2db   : > { %7472 = sst [smem:[#allocation107_spill]] %s5625_s17  ;;  %v931_v30 = vmul.f32 %v5484_v29, %v7478_v55  ;;  %v7010_v55 = vstv %s5625_s17 }
 0x2dc   : > { %s5643_s21 = sld [smem:[#allocation9 + $0x3b]]  ;;  %v7480_v53 = vstv %s7474_s3 }
 0x2dd   : > { %s5649_s1 = sld [smem:[#allocation3 + $0xb4]]  ;;  %v915_v45 = vadd.f32 %v7480_v53, %v911_v46  ;;  %v933_v38 = vadd.f32 %v931_v30, %v927_v44  ;;  %v2106_v44 = vmul.f32 %v5285_v23, %v7006_v61  ;;  %v7014_v30 = vstv %s5608_s5 }
 0x2de   : > { %s5654_s7 = sld [smem:[#allocation3 + $0xb5]]  ;;  %v2112_v53 = vmul.f32 %v5296_v31, %v7010_v55 }
 0x2df   : > { %7475 = sst [smem:[#allocation104_spill]] %s5636_s24  ;;  %v918_v46 = vmax.f32 %v915_v45, 0.0  ;;  %v2108_v60 = vadd.f32 %v2106_v44, %v2102_v56  ;;  %v7018_v61 = vstv %s5636_s24 }
 0x2e0   : > { %v7482_v15 = vstv %s7476_s15  ;;  %s7483_s26 = sld [smem:[#allocation105_spill]] }
 0x2e1   : > { %v937_v62 = vmul.f32 %v5506_v27, %v7482_v15  ;;  %s5663_s3 = sld [smem:[#allocation3 + $0xb6]]  ;;  %v2070_v15 = vadd.f32 %v2068_v11, %v2042_v47 }
 0x2e2   : > { %7477 = sst [smem:[#allocation108_spill]] %s5643_s21 }
 0x2e3   : > { %7479 = sst [smem:[#allocation236_spill]] %s5649_s1  ;;  %v939_v41 = vadd.f32 %v937_v62, %v933_v38  ;;  %v7028_v38 = vstv %s5643_s21  ;;  %v2093_v62 = vmax.f32 %v2090_v63, 0.0  ;;  %v7016_v35 = vstv %s5649_s1 }
 0x2e4   : > { %7481 = sst [smem:[#allocation237_spill]] %s5654_s7  ;;  %v2130_v47 = vmul.f32 %v5318_v8, %v7016_v35  ;;  %v7015_v56 = vstv %s5654_s7 }
 0x2e5   : > { %s5671_s15 = sld [smem:[#allocation8 + $0x3c]]  ;;  %v2096_v63 = vmul.f32 %v7014_v30, %v2093_v62 }
 0x2e6   : > { %s7486_s18 = sld [smem:[#allocation109_spill]]  ;;  %v7488_v45 = vstv %s7483_s26 }
 0x2e7   : > { %7484 = sst [smem:[#allocation105_spill]] %s5663_s3  ;;  %v921_v33 = vmul.f32 %v7488_v45, %v918_v46  ;;  %v2114_v45 = vadd.f32 %v2112_v53, %v2108_v60  ;;  %v2098_v30 = vadd.f32 %v2096_v63, %v2070_v15 }
 0x2e8   : > { %s5679_s6 = sld [smem:[#allocation9 + $0x3c]] }
 0x2e9   : > { %s7489_s0 = sld [smem:[#allocation111_spill]]  ;;  %v923_v14 = vadd.f32 %v921_v33, %v895_v52  ;;  %v2134_v52 = vmul.f32 %v5285_v23, %v7015_v56  ;;  %v7019_v33 = vstv %s5663_s3 }
 0x2ea   : > { %s5685_s19 = sld [smem:[#allocation3 + $0xb7]] }
 0x2eb   : > { %7485 = sst [smem:[#allocation238_spill]] %s5671_s15  ;;  %v7030_v53 = vstv %s5671_s15  ;;  %v2136_v56 = vadd.f32 %v2134_v52, %v2130_v47 }
 0x2ec   : > { %s5688_s17 = sld [smem:[#allocation3 + $0xb8]]  ;;  %v7491_v55 = vstv %s7486_s18 }
 0x2ed   : > { %s7492_s26 = sld [smem:[#allocation112_spill]]  ;;  %v943_v46 = vadd.f32 %v7491_v55, %v939_v41  ;;  %v2118_v55 = vadd.f32 %v7018_v61, %v2114_v45  ;;  %v2140_v41 = vmul.f32 %v5296_v31, %v7019_v33 }
 0x2ee   : > { %7487 = sst [smem:[#allocation109_spill]] %s5679_s6  ;;  %v7036_v35 = vstv %s5679_s6 }
 0x2ef   : > { %s5696_s25 = sld [smem:[#allocation3 + $0xb9]]  ;;  %v7494_v11 = vstv %s7489_s0  ;;  %v946_v60 = vmax.f32 %v943_v46, 0.0  ;;  %v2121_v61 = vmax.f32 %v2118_v55, 0.0  ;;  %v2142_v63 = vadd.f32 %v2140_v41, %v2136_v56 }
 0x2f0   : > { %s7495_s23 = sld [smem:[#allocation110_spill]]  ;;  %v955_v44 = vmul.f32 %v5464_v2, %v7494_v11  ;;  %v7043_v33 = vstv %s5685_s19 }
 0x2f1   : > { %s5707_s18 = sld [smem:[#allocation8 + $0x3d]]  ;;  %v2158_v47 = vmul.f32 %v5318_v8, %v7043_v33  ;;  %v2124_v55 = vmul.f32 %v7028_v38, %v2121_v61  ;;  %v2146_v56 = vadd.f32 %v7030_v53, %v2142_v63 }
 0x2f2   : > { %7490 = sst [smem:[#allocation111_spill]] %s5688_s17  ;;  %v7033_v52 = vstv %s5688_s17 }
 0x2f3   : > { %s7497_s1 = sld [smem:[#allocation113_spill]]  ;;  %v7499_v62 = vstv %s7492_s26  ;;  %v2149_v63 = vmax.f32 %v2146_v56, 0.0 }
 0x2f4   : > { %s5715_s0 = sld [smem:[#allocation9 + $0x3d]]  ;;  %v959_v11 = vmul.f32 %v5484_v29, %v7499_v62 }
 0x2f5   : > { %7493 = sst [smem:[#allocation112_spill]] %s5696_s25  ;;  %v7032_v62 = vstv %s5696_s25  ;;  %v2152_v56 = vmul.f32 %v7036_v35, %v2149_v63 }
 0x2f6   : > { %s5721_s5 = sld [smem:[#allocation3 + $0xba]]  ;;  %v7501_v46 = vstv %s7495_s23  ;;  %v961_v49 = vadd.f32 %v959_v11, %v955_v44  ;;  %v2162_v44 = vmul.f32 %v5285_v23, %v7033_v52  ;;  %v2168_v41 = vmul.f32 %v5296_v31, %v7032_v62 }
 0x2f7   : > { %7496 = sst [smem:[#allocation110_spill]] %s5707_s18  ;;  %v949_v45 = vmul.f32 %v7501_v46, %v946_v60  ;;  %v2126_v46 = vadd.f32 %v2124_v55, %v2098_v30 }
 0x2f8   : > { %s5726_s24 = sld [smem:[#allocation3 + $0xbb]] }
 0x2f9   : > { %v7503_v25 = vstv %s7497_s1  ;;  %s7504_s26 = sld [smem:[#allocation116_spill]]  ;;  %v951_v60 = vadd.f32 %v949_v45, %v923_v14  ;;  %v7041_v14 = vstv %s5707_s18  ;;  %v2164_v45 = vadd.f32 %v2162_v44, %v2158_v47 }
 0x2fa   : > { %7498 = sst [smem:[#allocation113_spill]] %s5715_s0  ;;  %v965_v15 = vmul.f32 %v5506_v27, %v7503_v25  ;;  %v7050_v38 = vstv %s5715_s0 }
 0x2fb   : > { %s5735_s23 = sld [smem:[#allocation3 + $0xbc]]  ;;  %v2170_v47 = vadd.f32 %v2168_v41, %v2164_v45 }
 0x2fc   : > { %7500 = sst [smem:[#allocation239_spill]] %s5721_s5  ;;  %v967_v25 = vadd.f32 %v965_v15, %v961_v49  ;;  %v7039_v53 = vstv %s5721_s5 }
 0x2fd   : > { %s7506_s3 = sld [smem:[#allocation114_spill]]  ;;  %v2186_v55 = vmul.f32 %v5318_v8, %v7039_v53  ;;  %v2174_v41 = vadd.f32 %v7041_v14, %v2170_v47 }
 0x2fe   : > { %7502 = sst [smem:[#allocation240_spill]] %s5726_s24  ;;  %v7037_v44 = vstv %s5726_s24 }
 0x2ff   : > { %s7507_s1 = sld [smem:[#allocation117_spill]]  ;;  %v7511_v61 = vstv %s7504_s26  ;;  %v2177_v47 = vmax.f32 %v2174_v41, 0.0 }
 0x300   : > { %s5743_s7 = sld [smem:[#allocation8 + $0x3e]]  ;;  %v983_v11 = vmul.f32 %v5464_v2, %v7511_v61 }
 0x301   : > { %7505 = sst [smem:[#allocation116_spill]] %s5735_s23 }
 0x302   : > { %s7509_s20 = sld [smem:[#allocation118_spill]] }
 0x303   : > { %s5751_s21 = sld [smem:[#allocation9 + $0x3e]]  ;;  %v7513_v49 = vstv %s7506_s3 }
 0x304   : > { %s5757_s17 = sld [smem:[#allocation3 + $0xbd]]  ;;  %v971_v15 = vadd.f32 %v7513_v49, %v967_v25  ;;  %v2190_v49 = vmul.f32 %v5285_v23, %v7037_v44  ;;  %v2154_v44 = vadd.f32 %v2152_v56, %v2126_v46 }
 0x305   : > { %s5762_s15 = sld [smem:[#allocation3 + $0xbe]]  ;;  %v7515_v62 = vstv %s7507_s1 }
 0x306   : > { %7508 = sst [smem:[#allocation114_spill]] %s5743_s7  ;;  %v987_v61 = vmul.f32 %v5484_v29, %v7515_v62  ;;  %v974_v25 = vmax.f32 %v971_v15, 0.0  ;;  %v7042_v62 = vstv %s5735_s23  ;;  %v7054_v15 = vstv %s5743_s7 }
 0x307   : > { %s7517_s26 = sld [smem:[#allocation115_spill]]  ;;  %v2196_v45 = vmul.f32 %v5296_v31, %v7042_v62  ;;  %v2192_v53 = vadd.f32 %v2190_v49, %v2186_v55  ;;  %v2180_v49 = vmul.f32 %v7050_v38, %v2177_v47 }
 0x308   : > { %v7516_v52 = vstv %s7509_s20  ;;  %s5774_s3 = sld [smem:[#allocation3 + $0xbf]] }
 0x309   : > { %7510 = sst [smem:[#allocation117_spill]] %s5751_s21  ;;  %v993_v30 = vmul.f32 %v5506_v27, %v7516_v52  ;;  %v989_v52 = vadd.f32 %v987_v61, %v983_v11  ;;  %v7057_v11 = vstv %s5751_s21  ;;  %v2198_v59 = vadd.f32 %v2196_v45, %v2192_v53 }
 0x30a   : > { %7512 = sst [smem:[#allocation118_spill]] %s5757_s17  ;;  %v7061_v14 = vstv %s5757_s17  ;;  %v2182_v45 = vadd.f32 %v2180_v49, %v2154_v44 }
 0x30b   : > { %7514 = sst [smem:[#allocation241_spill]] %s5762_s15  ;;  %v995_v61 = vadd.f32 %v993_v30, %v989_v52  ;;  %v2214_v46 = vmul.f32 %v5318_v8, %v7061_v14  ;;  %v7051_v55 = vstv %s5762_s15  ;;  %v2202_v8 = vadd.f32 %v7054_v15, %v2198_v59 }
 0x30c   : > { %s7519_s20 = sld [smem:[#allocation121_spill]]  ;;  %v2218_v30 = vmul.f32 %v5285_v23, %v7051_v55 }
 0x30d   : > { %s5782_s1 = sld [smem:[#allocation8 + $0x3f]]  ;;  %v7521_v63 = vstv %s7517_s26  ;;  %v2205_v47 = vmax.f32 %v2202_v8, 0.0 }
 0x30e   : > { %7518 = sst [smem:[#allocation115_spill]] %s5774_s3  ;;  %v977_v35 = vmul.f32 %v7521_v63, %v974_v25  ;;  %v2220_v63 = vadd.f32 %v2218_v30, %v2214_v46 }
 0x30f   : > { %s7520_s5 = sld [smem:[#allocation119_spill]]  ;;  %v2208_v30 = vmul.f32 %v7057_v11, %v2205_v47 }
 0x310   : > { %s5790_s6 = sld [smem:[#allocation9 + $0x3f]]  ;;  %v979_v62 = vadd.f32 %v977_v35, %v951_v60  ;;  %v7059_v35 = vstv %s5774_s3 }
 0x311   : > { %s7522_s24 = sld [smem:[#allocation122_spill]]  ;;  %v2224_v53 = vmul.f32 %v5296_v31, %v7059_v35 }
 0x312   : > { %s5795_s18 = sld [smem:[#allocation2]]  ;;  %v7524_v33 = vstv %s7519_s20 }
 0x313   : > { %v1011_v36 = vmul.f32 %v5464_v2, %v7524_v33  ;;  %s7526_s26 = sld [smem:[#allocation120_spill]]  ;;  %v7058_v52 = vstv %s5782_s1  ;;  %v2226_v31 = vadd.f32 %v2224_v53, %v2220_v63 }
 0x314   : > { %s7527_s23 = sld [smem:[#allocation123_spill]] }
 0x315   : > { %v7525_v25 = vstv %s7520_s5  ;;  %s7528_s25 = sld [smem:[#allocation126_spill]]  ;;  %v2230_v53 = vadd.f32 %v7058_v52, %v2226_v31 }
 0x316   : > { %v999_v56 = vadd.f32 %v7525_v25, %v995_v61  ;;  %s7530_s20 = sld [smem:[#allocation127_spill]]  ;;  %v7060_v23 = vstv %s5790_s6 }
 0x317   : > { %v7529_v60 = vstv %s7522_s24  ;;  %s7531_s17 = sld [smem:[#allocation128_spill]] }
 0x318   : > { %7523 = sst [smem:[#allocation121_spill]] %s5795_s18  ;;  %v1015_v33 = vmul.f32 %v5484_v29, %v7529_v60  ;;  %v1002_v41 = vmax.f32 %v999_v56, 0.0  ;;  %v2241_v25 = vstv %s5795_s18 }
 0x319   : > { %s7532_s5 = sld [smem:[#allocation131_spill]]  ;;  %v7535_v60 = vstv %s7526_s26 }
 0x31a   : > { %v1017_v61 = vadd.f32 %v1015_v33, %v1011_v36  ;;  %s7533_s0 = sld [smem:[#allocation132_spill]]  ;;  %v1005_v38 = vmul.f32 %v7535_v60, %v1002_v41  ;;  %v7536_v55 = vstv %s7527_s23 }
 0x31b   : > { %s7534_s24 = sld [smem:[#allocation133_spill]]  ;;  %v1021_v59 = vmul.f32 %v5506_v27, %v7536_v55  ;;  %v7539_v15 = vstv %s7528_s25 }
 0x31c   : > { %s7537_s7 = sld [smem:[#allocation124_spill]]  ;;  %v1039_v44 = vmul.f32 %v5464_v2, %v7539_v15  ;;  %v7541_v46 = vstv %s7530_s20  ;;  %v1007_v33 = vadd.f32 %v1005_v38, %v979_v62 }
 0x31d   : > { %s7538_s3 = sld [smem:[#allocation136_spill]]  ;;  %v1043_v56 = vmul.f32 %v5484_v29, %v7541_v46  ;;  %v7542_v36 = vstv %s7531_s17  ;;  %v1023_v8 = vadd.f32 %v1021_v59, %v1017_v61 }
 0x31e   : > { %s7540_s15 = sld [smem:[#allocation137_spill]]  ;;  %v1049_v49 = vmul.f32 %v5506_v27, %v7542_v36  ;;  %v2210_v36 = vadd.f32 %v2208_v30, %v2182_v45 }
 0x31f   : > { %s7543_s26 = sld [smem:[#allocation138_spill]]  ;;  %v7544_v41 = vstv %s7532_s5  ;;  %v1045_v15 = vadd.f32 %v1043_v56, %v1039_v44  ;;  %v2233_v44 = vmax.f32 %v2230_v53, 0.0 }
 0x320   : > { %s7545_s23 = sld [smem:[#allocation141_spill]]  ;;  %v1067_v55 = vmul.f32 %v5464_v2, %v7544_v41  ;;  %v7547_v63 = vstv %s7533_s0 }
 0x321   : > { %s7546_s25 = sld [smem:[#allocation142_spill]]  ;;  %v1071_v60 = vmul.f32 %v5484_v29, %v7547_v63  ;;  %v7549_v46 = vstv %s7534_s24  ;;  %v1051_v56 = vadd.f32 %v1049_v49, %v1045_v15 }
 0x322   : > { %s7548_s17 = sld [smem:[#allocation129_spill]]  ;;  %v1077_v47 = vmul.f32 %v5506_v27, %v7549_v46  ;;  %v7551_v38 = vstv %s7537_s7 }
 0x323   : > { %s7550_s20 = sld [smem:[#allocation143_spill]]  ;;  %v1027_v62 = vadd.f32 %v7551_v38, %v1023_v8  ;;  %v7553_v61 = vstv %s7538_s3  ;;  %v1073_v11 = vadd.f32 %v1071_v60, %v1067_v55 }
 0x324   : > { %s7552_s21 = sld [smem:[#allocation125_spill]]  ;;  %v1095_v59 = vmul.f32 %v5464_v2, %v7553_v61  ;;  %v7554_v41 = vstv %s7540_s15 }
 0x325   : > { %v1099_v31 = vmul.f32 %v5484_v29, %v7554_v41  ;;  %s7555_s5 = sld [smem:[#allocation146_spill]]  ;;  %v7556_v52 = vstv %s7543_s26  ;;  %v1030_v46 = vmax.f32 %v1027_v62, 0.0  ;;  %v2236_v41 = vmul.f32 %v7060_v23, %v2233_v44 }
 0x326   : > { %s7557_s0 = sld [smem:[#allocation134_spill]]  ;;  %v1105_v63 = vmul.f32 %v5506_v27, %v7556_v52  ;;  %v7559_v30 = vstv %s7545_s23  ;;  %v1079_v55 = vadd.f32 %v1077_v47, %v1073_v11 }
 0x327   : > { %s7558_s24 = sld [smem:[#allocation147_spill]]  ;;  %v1101_v45 = vadd.f32 %v1099_v31, %v1095_v59  ;;  %v1123_v8 = vmul.f32 %v5464_v2, %v7559_v30  ;;  %v7561_v38 = vstv %s7546_s25  ;;  %v2238_v35 = vadd.f32 %v2236_v41, %v2210_v36 }
 0x328   : > { %s7560_s7 = sld [smem:[#allocation139_spill]]  ;;  %v1127_v61 = vmul.f32 %v5484_v29, %v7561_v38  ;;  %v7563_v53 = vstv %s7548_s17 }
 0x329   : > { %s7562_s15 = sld [smem:[#allocation148_spill]]  ;;  %v1055_v49 = vadd.f32 %v7563_v53, %v1051_v56  ;;  %v7565_v15 = vstv %s7550_s20  ;;  %v1107_v59 = vadd.f32 %v1105_v63, %v1101_v45 }
 0x32a   : > { %s7564_s3 = sld [smem:[#allocation130_spill]]  ;;  %v1133_v52 = vmul.f32 %v5506_v27, %v7565_v15  ;;  %v7566_v60 = vstv %s7552_s21  ;;  %v1129_v31 = vadd.f32 %v1127_v61, %v1123_v8  ;;  %v5892_v8 = vadd.f32 %v2241_v25, %v2238_v35 }
 0x32b   : > { %v1033_v62 = vmul.f32 %v7566_v60, %v1030_v46  ;;  %s7567_s26 = sld [smem:[#allocation144_spill]]  ;;  %v7568_v30 = vstv %s7555_s5  ;;  %v1058_v44 = vmax.f32 %v1055_v49, 0.0 }
 0x32c   : > { %s7569_s23 = sld [smem:[#allocation151_spill]]  ;;  %v1151_v38 = vmul.f32 %v5464_v2, %v7568_v30  ;;  %v7570_v23 = vstv %s7557_s0  ;;  %v1135_v63 = vadd.f32 %v1133_v52, %v1129_v31  ;;  %3057 = vmatmul.msk.f32.vlgmr.msra.gmra.mxu0 %vm2254_vm0, %v5892_v8 }
 0x32d   : > { %v1083_v14 = vadd.f32 %v7570_v23, %v1079_v55  ;;  %v7571_v56 = vstv %s7558_s24  ;;  %s7572_s25 = sld [smem:[#allocation135_spill]]  ;;  %v1035_v47 = vadd.f32 %v1033_v62, %v1007_v33  ;;  %v7583_v62 = vstv %s4440_s13 }
 0x32e   : > { %v1155_v11 = vmul.f32 %v5484_v29, %v7571_v56  ;;  %v7573_v53 = vstv %s7560_s7  ;;  %s7574_s21 = sld [smem:[#allocation140_spill]] }
 0x32f   : > { %v1111_v15 = vadd.f32 %v7573_v53, %v1107_v59  ;;  %v7575_v46 = vstv %s7562_s15  ;;  %s7577_s17 = sld [smem:[#allocation152_spill]]  ;;  %v1086_v41 = vmax.f32 %v1083_v14, 0.0  ;;  %v1183_v59 = vmul.f32 %v5484_v29, %v7583_v62 }
 0x330   : > { %v1161_v45 = vmul.f32 %v5506_v27, %v7575_v46  ;;  %v7576_v61 = vstv %s7564_s3  ;;  %v1157_v23 = vadd.f32 %v1155_v11, %v1151_v38  ;;  %s7578_s20 = sld [smem:[#allocation149_spill]]  ;;  %v2252_v14 = vmul.f32 %v5892_v8, %v5892_v8 }
 0x331   : > { %v1061_v36 = vmul.f32 %v7576_v61, %v1058_v44  ;;  %v1114_v49 = vmax.f32 %v1111_v15, 0.0  ;;  %v7579_v55 = vstv %s7567_s26  ;;  %s7580_s5 = sld [smem:[#allocation155_spill]] }
 0x332   : > { %v1139_v33 = vadd.f32 %v7579_v55, %v1135_v63  ;;  %v7581_v60 = vstv %s7569_s23  ;;  %s7582_s0 = sld [smem:[#allocation156_spill]]  ;;  %v1163_v38 = vadd.f32 %v1161_v45, %v1157_v23  ;;  %3063 = vmatmul.msk.f32.vlgmr.msra.gmra.mxu3 %vm2254_vm0, %v2252_v14 }
 0x333   : > { %v1179_v52 = vmul.f32 %v5464_v2, %v7581_v60  ;;  %s7584_s24 = sld [smem:[#allocation145_spill]]  ;;  %v1063_v35 = vadd.f32 %v1061_v36, %v1035_v47  ;;  %v7587_v31 = vstv %s7572_s25 }
 0x334   : > { %s7585_s7 = sld [smem:[#allocation157_spill]]  ;;  %v1089_v30 = vmul.f32 %v7587_v31, %v1086_v41  ;;  %v7588_v44 = vstv %s7574_s21  ;;  %v1142_v11 = vmax.f32 %v1139_v33, 0.0 }
 0x335   : > { %s7586_s15 = sld [smem:[#allocation160_spill]]  ;;  %v1117_v56 = vmul.f32 %v7588_v44, %v1114_v49  ;;  %v1185_v53 = vadd.f32 %v1183_v59, %v1179_v52  ;;  %v7591_v15 = vstv %s7577_s17 }
 0x336   : > { %s7589_s3 = sld [smem:[#allocation161_spill]]  ;;  %v1189_v63 = vmul.f32 %v5506_v27, %v7591_v15  ;;  %v1091_v46 = vadd.f32 %v1089_v30, %v1063_v35  ;;  %v7595_v61 = vstv %s7578_s20 }
 0x337   : > { %s7590_s13 = sld [smem:[#allocation153_spill]]  ;;  %v1167_v47 = vadd.f32 %v7595_v61, %v1163_v38  ;;  %v7596_v36 = vstv %s7580_s5 }
 0x338   : > { %s7592_s26 = sld [smem:[#allocation162_spill]]  ;;  %v1207_v45 = vmul.f32 %v5464_v2, %v7596_v36  ;;  %v7598_v41 = vstv %s7582_s0  ;;  %v1191_v33 = vadd.f32 %v1189_v63, %v1185_v53  ;;  %v1119_v14 = vadd.f32 %v1117_v56, %v1091_v46 }
 0x339   : > { %s7593_s23 = sld [smem:[#allocation165_spill]]  ;;  %v1211_v23 = vmul.f32 %v5484_v29, %v7598_v41  ;;  %v7599_v49 = vstv %s7584_s24  ;;  %v1170_v35 = vmax.f32 %v1167_v47, 0.0 }
 0x33a   : > { %s7594_s18 = sld [smem:[#allocation166_spill]]  ;;  %v1145_v55 = vmul.f32 %v7599_v49, %v1142_v11  ;;  %v7600_v60 = vstv %s7585_s7 }
 0x33b   : > { %s7597_s25 = sld [smem:[#allocation150_spill]]  ;;  %v1217_v52 = vmul.f32 %v5506_v27, %v7600_v60  ;;  %v7601_v62 = vstv %s7586_s15  ;;  %v1213_v31 = vadd.f32 %v1211_v23, %v1207_v45 }
 0x33c   : > { %s7602_s21 = sld [smem:[#allocation167_spill]]  ;;  %v1235_v59 = vmul.f32 %v5464_v2, %v7601_v62  ;;  %v7605_v30 = vstv %s7589_s3  ;;  %v1147_v46 = vadd.f32 %v1145_v55, %v1119_v14 }
 0x33d   : > { %s7603_s17 = sld [smem:[#allocation170_spill]]  ;;  %v1239_v38 = vmul.f32 %v5484_v29, %v7605_v30  ;;  %v7606_v44 = vstv %s7590_s13  ;;  %v1219_v41 = vadd.f32 %v1217_v52, %v1213_v31 }
 0x33e   : > { %s7604_s20 = sld [smem:[#allocation158_spill]]  ;;  %v1195_v15 = vadd.f32 %v7606_v44, %v1191_v33  ;;  %v7608_v11 = vstv %s7592_s26 }
 0x33f   : > { %s7607_s5 = sld [smem:[#allocation171_spill]]  ;;  %v1245_v53 = vmul.f32 %v5506_v27, %v7608_v11  ;;  %v7610_v63 = vstv %s7593_s23  ;;  %v1241_v23 = vadd.f32 %v1239_v38, %v1235_v59 }
 0x340   : > { %s7609_s0 = sld [smem:[#allocation154_spill]]  ;;  %v1263_v61 = vmul.f32 %v5464_v2, %v7610_v63  ;;  %v7611_v36 = vstv %s7594_s18  ;;  %v1198_v49 = vmax.f32 %v1195_v15, 0.0 }
 0x341   : > { %s7612_s24 = sld [smem:[#allocation172_spill]]  ;;  %v1267_v56 = vmul.f32 %v5484_v29, %v7611_v36  ;;  %v7614_v47 = vstv %s7597_s25  ;;  %v1247_v14 = vadd.f32 %v1245_v53, %v1241_v23 }
 0x342   : > { %s7613_s7 = sld [smem:[#allocation175_spill]]  ;;  %v1173_v45 = vmul.f32 %v7614_v47, %v1170_v35  ;;  %v7617_v60 = vstv %s7602_s21 }
 0x343   : > { %s7615_s15 = sld [smem:[#allocation163_spill]]  ;;  %v1269_v33 = vadd.f32 %v1267_v56, %v1263_v61  ;;  %v1273_v62 = vmul.f32 %v5506_v27, %v7617_v60  ;;  %v7619_v30 = vstv %s7603_s17 }
 0x344   : > { %s7616_s3 = sld [smem:[#allocation176_spill]]  ;;  %v1291_v44 = vmul.f32 %v5464_v2, %v7619_v30  ;;  %v1175_v11 = vadd.f32 %v1173_v45, %v1147_v46  ;;  %v7622_v63 = vstv %s7604_s20 }
 0x345   : > { %s7618_s13 = sld [smem:[#allocation168_spill]]  ;;  %v1223_v55 = vadd.f32 %v7622_v63, %v1219_v41  ;;  %v7624_v35 = vstv %s7607_s5  ;;  %v1275_v38 = vadd.f32 %v1273_v62, %v1269_v33 }
 0x346   : > { %s7620_s18 = sld [smem:[#allocation177_spill]]  ;;  %v1295_v52 = vmul.f32 %v5484_v29, %v7624_v35  ;;  %v7625_v59 = vstv %s7609_s0 }
 0x347   : > { %s7621_s26 = sld [smem:[#allocation180_spill]]  ;;  %v1201_v31 = vmul.f32 %v7625_v59, %v1198_v49  ;;  %v7626_v15 = vstv %s7612_s24  ;;  %v1226_v46 = vmax.f32 %v1223_v55, 0.0 }
 0x348   : > { %s7623_s23 = sld [smem:[#allocation159_spill]]  ;;  %v1301_v61 = vmul.f32 %v5506_v27, %v7626_v15  ;;  %v7628_v36 = vstv %s7613_s7  ;;  %v1297_v53 = vadd.f32 %v1295_v52, %v1291_v44 }
 0x349   : > { %s7627_s25 = sld [smem:[#allocation181_spill]]  ;;  %v1319_v56 = vmul.f32 %v5464_v2, %v7628_v36  ;;  %v7631_v47 = vstv %s7615_s15  ;;  %v1203_v49 = vadd.f32 %v1201_v31, %v1175_v11 }
 0x34a   : > { %s7629_s21 = sld [smem:[#allocation182_spill]]  ;;  %v1251_v45 = vadd.f32 %v7631_v47, %v1247_v14  ;;  %v7633_v41 = vstv %s7616_s3  ;;  %v1303_v44 = vadd.f32 %v1301_v61, %v1297_v53 }
 0x34b   : > { %s7630_s17 = sld [smem:[#allocation185_spill]]  ;;  %v1323_v23 = vmul.f32 %v5484_v29, %v7633_v41  ;;  %v7635_v33 = vstv %s7618_s13 }
 0x34c   : > { %s7632_s20 = sld [smem:[#allocation164_spill]]  ;;  %v1279_v60 = vadd.f32 %v7635_v33, %v1275_v38  ;;  %v7637_v62 = vstv %s7620_s18  ;;  %v1254_v59 = vmax.f32 %v1251_v45, 0.0 }
 0x34d   : > { %s7634_s5 = sld [smem:[#allocation173_spill]]  ;;  %v1329_v30 = vmul.f32 %v5506_v27, %v7637_v62  ;;  %v7638_v63 = vstv %s7621_s26  ;;  %v1325_v52 = vadd.f32 %v1323_v23, %v1319_v56 }
 0x34e   : > { %s7636_s0 = sld [smem:[#allocation169_spill]]  ;;  %v1347_v35 = vmul.f32 %v5464_v2, %v7638_v63  ;;  %v7639_v55 = vstv %s7623_s23  ;;  %v1282_v15 = vmax.f32 %v1279_v60, 0.0  ;;  %v7649_v63 = vstv %s4646_s22 }
 0x34f   : > { %v1229_v14 = vmul.f32 %v7639_v55, %v1226_v46  ;;  %s7640_s24 = sld [smem:[#allocation178_spill]]  ;;  %v7641_v11 = vstv %s7627_s25  ;;  %v1331_v56 = vadd.f32 %v1329_v30, %v1325_v52  ;;  %v1379_v55 = vmul.f32 %v5484_v29, %v7649_v63 }
 0x350   : > { %v1351_v31 = vmul.f32 %v5484_v29, %v7641_v11  ;;  %v7642_v38 = vstv %s7629_s21  ;;  %s7646_s7 = sld [smem:[#allocation174_spill]]  ;;  %v7650_v11 = vstv %s4652_s11 }
 0x351   : > { %v1357_v36 = vmul.f32 %v5506_v27, %v7642_v38  ;;  %v7643_v47 = vstv %s7630_s17  ;;  %v1231_v33 = vadd.f32 %v1229_v14, %v1203_v49  ;;  %s7648_s15 = sld [smem:[#allocation183_spill]]  ;;  %v1385_v38 = vmul.f32 %v5506_v27, %v7650_v11 }
 0x352   : > { %v1375_v41 = vmul.f32 %v5464_v2, %v7643_v47  ;;  %v7644_v62 = vstv %s7632_s20  ;;  %v1353_v60 = vadd.f32 %v1351_v31, %v1347_v35  ;;  %s7652_s3 = sld [smem:[#allocation179_spill]]  ;;  %v1407_v35 = vmul.f32 %v5484_v29, %v1405_v4 }
 0x353   : > { %v1257_v46 = vmul.f32 %v7644_v62, %v1254_v59  ;;  %v7645_v45 = vstv %s7634_s5  ;;  %v7653_v62 = vstv %s4670_s14  ;;  %s7657_s22 = sld [smem:[#allocation184_spill]]  ;;  %v1435_v4 = vmul.f32 %v5484_v29, %v1433_v5 }
 0x354   : > { %v1307_v61 = vadd.f32 %v7645_v45, %v1303_v44  ;;  %v7647_v53 = vstv %s7636_s0  ;;  %v1403_v30 = vmul.f32 %v5464_v2, %v7653_v62  ;;  %v1359_v44 = vadd.f32 %v1357_v36, %v1353_v60  ;;  %s7663_s4 = sld [smem:[#allocation186_spill]] }
 0x355   : > { %v1285_v23 = vmul.f32 %v7647_v53, %v1282_v15  ;;  %v1259_v47 = vadd.f32 %v1257_v46, %v1231_v33  ;;  %v7651_v14 = vstv %s7640_s24  ;;  %v1381_v52 = vadd.f32 %v1379_v55, %v1375_v41  ;;  %s7664_s10 = sld [smem:[#allocation189_spill]] }
 0x356   : > { %v1310_v49 = vmax.f32 %v1307_v61, 0.0  ;;  %v1335_v59 = vadd.f32 %v7651_v14, %v1331_v56  ;;  %v7654_v15 = vstv %s4680_s30  ;;  %v7655_v33 = vstv %s7646_s7  ;;  %s7658_s30 = sld [smem:[#allocation187_spill]] }
 0x357   : > { %v1413_v31 = vmul.f32 %v5506_v27, %v7654_v15  ;;  %v1287_v45 = vadd.f32 %v1285_v23, %v1259_v47  ;;  %v1431_v56 = vmul.f32 %v5464_v2, %v1429_v51  ;;  %v7656_v53 = vstv %s7648_s15  ;;  %s7678_s13 = sld [smem:[#allocation38_spill]] }
 0x358   : > { %v1313_v46 = vmul.f32 %v7655_v33, %v1310_v49  ;;  %v1338_v61 = vmax.f32 %v1335_v59, 0.0  ;;  %v1363_v36 = vadd.f32 %v7656_v53, %v1359_v44  ;;  %v1387_v41 = vadd.f32 %v1385_v38, %v1381_v52  ;;  %s7680_s8 = sld [smem:[#allocation194_spill]] }
 0x359   : > { %v1409_v60 = vadd.f32 %v1407_v35, %v1403_v30  ;;  %v7659_v23 = vstv %s7652_s3  ;;  %v1441_v11 = vmul.f32 %v5506_v27, %v1439_v19  ;;  %v1459_v51 = vmul.f32 %v5464_v2, %v1457_v0  ;;  %s7685_s21 = sld [smem:[#allocation192_spill]] }
 0x35a   : > { %v1315_v63 = vadd.f32 %v1313_v46, %v1287_v45  ;;  %v1341_v55 = vmul.f32 %v7659_v23, %v1338_v61  ;;  %v1366_v47 = vmax.f32 %v1363_v36, 0.0  ;;  %v7662_v49 = vstv %s4660_s28  ;;  %s7671_s28 = sld [smem:[#allocation188_spill]] }
 0x35b   : > { %v1391_v38 = vadd.f32 %v7662_v49, %v1387_v41  ;;  %v1415_v14 = vadd.f32 %v1413_v31, %v1409_v60  ;;  %v1437_v59 = vadd.f32 %v1435_v4, %v1431_v56  ;;  %v7665_v62 = vstv %s4754_s29  ;;  %s7686_s17 = sld [smem:[#allocation199_spill]] }
 0x35c   : > { %v1343_v5 = vadd.f32 %v1341_v55, %v1315_v63  ;;  %v1463_v30 = vmul.f32 %v5484_v29, %v7665_v62  ;;  %v7666_v44 = vstv %s4763_s12  ;;  %v1487_v19 = vmul.f32 %v5464_v2, %v1485_v16  ;;  %s7692_s24 = sld [smem:[#allocation195_spill]] }
 0x35d   : > { %v1469_v52 = vmul.f32 %v5506_v27, %v7666_v44  ;;  %v7668_v0 = vstv %s7657_s22  ;;  %v1394_v15 = vmax.f32 %v1391_v38, 0.0  ;;  %v7670_v45 = vstv %s7658_s30  ;;  %s7698_s22 = sld [smem:[#allocation200_spill]] }
 0x35e   : > { %v1369_v35 = vmul.f32 %v7668_v0, %v1366_v47  ;;  %v1419_v31 = vadd.f32 %v7670_v45, %v1415_v14  ;;  %v1443_v33 = vadd.f32 %v1441_v11, %v1437_v59  ;;  %v1465_v46 = vadd.f32 %v1463_v30, %v1459_v51  ;;  %s7700_s9 = sld [smem:[#allocation204_spill]] }
 0x35f   : > { %v1491_v61 = vmul.f32 %v5484_v29, %v1489_v7  ;;  %v1497_v56 = vmul.f32 %v5506_v27, %v1495_v12  ;;  %v1515_v16 = vmul.f32 %v5464_v2, %v1513_v9  ;;  %v7675_v36 = vstv %s7663_s4  ;;  %s7703_s4 = sld [smem:[#allocation41_spill]] }
 0x360   : > { %v1371_v53 = vadd.f32 %v1369_v35, %v1343_v5  ;;  %v1397_v41 = vmul.f32 %v7675_v36, %v1394_v15  ;;  %v1422_v60 = vmax.f32 %v1419_v31, 0.0  ;;  %v7677_v4 = vstv %s7664_s10  ;;  %s7706_s27 = sld [smem:[#allocation44_spill]] }
 0x361   : > { %v1447_v63 = vadd.f32 %v7677_v4, %v1443_v33  ;;  %v1471_v23 = vadd.f32 %v1469_v52, %v1465_v46  ;;  %v1493_v55 = vadd.f32 %v1491_v61, %v1487_v19  ;;  %v1519_v7 = vmul.f32 %v5484_v29, %v1517_v3  ;;  %s7712_s2 = sld [smem:[#allocation43_spill]] }
 0x362   : > { %v1525_v12 = vmul.f32 %v5506_v27, %v1523_v40  ;;  %v1399_v9 = vadd.f32 %v1397_v41, %v1371_v53  ;;  %v7681_v11 = vstv %s7671_s28  ;;  %v1543_v49 = vmul.f32 %v5464_v2, %v1541_v6  ;;  %s7716_s18 = sld [smem:[#allocation55_spill]] }
 0x363   : > { %v1425_v51 = vmul.f32 %v7681_v11, %v1422_v60  ;;  %v1450_v47 = vmax.f32 %v1447_v63, 0.0  ;;  %v1475_v38 = vadd.f32 %v1473_v50, %v1471_v23  ;;  %v1499_v14 = vadd.f32 %v1497_v56, %v1493_v55  ;;  %s7719_s26 = sld [smem:[#allocation48_spill]] }
 0x364   : > { %v1521_v59 = vadd.f32 %v1519_v7, %v1515_v16  ;;  %v1547_v3 = vmul.f32 %v5484_v29, %v1545_v21  ;;  %v7687_v62 = vstv %s7678_s13  ;;  %v1571_v6 = vmul.f32 %v5464_v2, %v1569_v42  ;;  %s7720_s23 = sld [smem:[#allocation209_spill]] }
 0x365   : > { %v1427_v40 = vadd.f32 %v1425_v51, %v1399_v9  ;;  %v1453_v5 = vmul.f32 %v1451_v43, %v1450_v47  ;;  %v1553_v30 = vmul.f32 %v5506_v27, %v7687_v62  ;;  %v1478_v50 = vmax.f32 %v1475_v38, 0.0  ;;  %s7721_s25 = sld [smem:[#allocation62_spill]] }
 0x366   : > { %v7691_v44 = vstv %s7680_s8  ;;  %v1527_v19 = vadd.f32 %v1525_v12, %v1521_v59  ;;  %v1549_v0 = vadd.f32 %v1547_v3, %v1543_v49  ;;  %v1575_v43 = vmul.f32 %v5484_v29, %v1573_v1  ;;  %s7717_s8 = sld [smem:[#allocation213_spill]] }
 0x367   : > { %v1503_v52 = vadd.f32 %v7691_v44, %v1499_v14  ;;  %v1455_v21 = vadd.f32 %v1453_v5, %v1427_v40  ;;  %v1581_v35 = vmul.f32 %v5506_v27, %v1579_v54  ;;  %v1599_v15 = vmul.f32 %v5464_v2, %v1597_v18  ;;  %s7725_s20 = sld [smem:[#allocation66_spill]] }
 0x368   : > { %v7695_v42 = vstv %s7685_s21  ;;  %v7697_v33 = vstv %s7686_s17  ;;  %v1555_v61 = vadd.f32 %v1553_v30, %v1549_v0  ;;  %v1577_v56 = vadd.f32 %v1575_v43, %v1571_v6  ;;  %s7723_s21 = sld [smem:[#allocation60_spill]] }
 0x369   : > { %v1481_v45 = vmul.f32 %v7695_v42, %v1478_v50  ;;  %v1506_v31 = vmax.f32 %v1503_v52, 0.0  ;;  %v1531_v46 = vadd.f32 %v7697_v33, %v1527_v19  ;;  %v1603_v1 = vmul.f32 %v5484_v29, %v1601_v39  ;;  %s7724_s17 = sld [smem:[#allocation51_spill]] }
 0x36a   : > { %v1609_v54 = vmul.f32 %v5506_v27, %v1607_v10  ;;  %v1627_v18 = vmul.f32 %v5464_v2, %v1625_v20  ;;  %v7702_v53 = vstv %s7692_s24  ;;  %v1559_v60 = vadd.f32 %v1557_v37, %v1555_v61  ;;  %s7726_s5 = sld [smem:[#allocation54_spill]] }
 0x36b   : > { %v1483_v16 = vadd.f32 %v1481_v45, %v1455_v21  ;;  %v1509_v36 = vmul.f32 %v7702_v53, %v1506_v31  ;;  %v1534_v41 = vmax.f32 %v1531_v46, 0.0  ;;  %v1583_v4 = vadd.f32 %v1581_v35, %v1577_v56  ;;  %s7729_s0 = sld [smem:[#allocation215_spill]] }
 0x36c   : > { %v1605_v63 = vadd.f32 %v1603_v1, %v1599_v15  ;;  %v1631_v39 = vmul.f32 %v5484_v29, %v1629_v48  ;;  %v1637_v10 = vmul.f32 %v5506_v27, %v1635_v13  ;;  %v7707_v23 = vstv %s7698_s22  ;;  %s7731_s24 = sld [smem:[#allocation53_spill]] }
 0x36d   : > { %v1511_v20 = vadd.f32 %v1509_v36, %v1483_v16  ;;  %v1537_v55 = vmul.f32 %v7707_v23, %v1534_v41  ;;  %v1562_v7 = vmax.f32 %v1559_v60, 0.0  ;;  %v1655_v12 = vmul.f32 %v5464_v2, %v1653_v58  ;;  %s7733_s7 = sld [smem:[#allocation67_spill]] }
 0x36e   : > { %v7710_v37 = vstv %s7700_s9  ;;  %v1611_v11 = vadd.f32 %v1609_v54, %v1605_v63  ;;  %v1633_v51 = vadd.f32 %v1631_v39, %v1627_v18  ;;  %v1659_v48 = vmul.f32 %v5484_v29, %v1657_v22  ;;  %s7734_s15 = sld [smem:[#allocation216_spill]] }
 0x36f   : > { %v1587_v9 = vadd.f32 %v7710_v37, %v1583_v4  ;;  %v1539_v13 = vadd.f32 %v1537_v55, %v1511_v20  ;;  %v7714_v47 = vstv %s7703_s4  ;;  %v1665_v38 = vmul.f32 %v5506_v27, %v1663_v32  ;;  %s7736_s3 = sld [smem:[#allocation59_spill]] }
 0x370   : > { %v1565_v49 = vmul.f32 %v7714_v47, %v1562_v7  ;;  %v1683_v58 = vmul.f32 %v5464_v2, %v1681_v28  ;;  %v7718_v59 = vstv %s7706_s27  ;;  %v1639_v40 = vadd.f32 %v1637_v10, %v1633_v51  ;;  %s7739_s22 = sld [smem:[#allocation217_spill]] }
 0x371   : > { %v1590_v14 = vmax.f32 %v1587_v9, 0.0  ;;  %v1615_v3 = vadd.f32 %v7718_v59, %v1611_v11  ;;  %v1661_v5 = vadd.f32 %v1659_v48, %v1655_v12  ;;  %v1687_v62 = vmul.f32 %v5484_v29, %v1685_v34  ;;  %s7741_s30 = sld [smem:[#allocation65_spill]] }
 0x372   : > { %v1567_v22 = vadd.f32 %v1565_v49, %v1539_v13  ;;  %v1693_v30 = vmul.f32 %v5506_v27, %v1691_v57  ;;  %v1711_v32 = vmul.f32 %v5464_v2, %v1709_v17  ;;  %v7722_v28 = vstv %s7712_s2  ;;  %s7743_s9 = sld [smem:[#allocation218_spill]] }
 0x373   : > { %v1593_v6 = vmul.f32 %v7722_v28, %v1590_v14  ;;  %v1618_v50 = vmax.f32 %v1615_v3, 0.0  ;;  %v1643_v44 = vadd.f32 %v1641_v26, %v1639_v40  ;;  %v1667_v52 = vadd.f32 %v1665_v38, %v1661_v5  ;;  %s7744_s11 = sld [smem:[#allocation58_spill]] }
 0x374   : > { %v1689_v19 = vadd.f32 %v1687_v62, %v1683_v58  ;;  %v1715_v34 = vmul.f32 %v5484_v29, %v1713_v24  ;;  %v7727_v0 = vstv %s7716_s18  ;;  %v7728_v21 = vstv %s7717_s8  ;;  %s7746_s4 = sld [smem:[#allocation214_spill]] }
 0x375   : > { %v1721_v57 = vmul.f32 %v5506_v27, %v7727_v0  ;;  %v1739_v17 = vmul.f32 %v5464_v2, %v7728_v21  ;;  %v1595_v43 = vadd.f32 %v1593_v6, %v1567_v22  ;;  %v7730_v35 = vstv %s7719_s26  ;;  %s7749_s10 = sld [smem:[#allocation72_spill]] }
 0x376   : > { %v1621_v15 = vmul.f32 %v7730_v35, %v1618_v50  ;;  %v1646_v42 = vmax.f32 %v1643_v44, 0.0  ;;  %v7732_v26 = vstv %s7720_s23  ;;  %v1695_v31 = vadd.f32 %v1693_v30, %v1689_v19  ;;  %s7751_s14 = sld [smem:[#allocation70_spill]] }
 0x377   : > { %v1671_v45 = vadd.f32 %v7732_v26, %v1667_v52  ;;  %v1717_v33 = vadd.f32 %v1715_v34, %v1711_v32  ;;  %v7735_v46 = vstv %s7721_s25  ;;  %v7737_v61 = vstv %s7723_s21  ;;  %s7752_s27 = sld [smem:[#allocation76_spill]] }
 0x378   : > { %v1743_v24 = vmul.f32 %v5484_v29, %v7735_v46  ;;  %v1749_v56 = vmul.f32 %v5506_v27, %v7737_v61  ;;  %v1623_v1 = vadd.f32 %v1621_v15, %v1595_v43  ;;  %v7738_v54 = vstv %s7724_s17  ;;  %s7754_s28 = sld [smem:[#allocation61_spill]] }
 0x379   : > { %v1649_v18 = vmul.f32 %v7738_v54, %v1646_v42  ;;  %v1674_v16 = vmax.f32 %v1671_v45, 0.0  ;;  %v7740_v53 = vstv %s7725_s20  ;;  %v7742_v41 = vstv %s7726_s5  ;;  %s7755_s16 = sld [smem:[#allocation64_spill]] }
 0x37a   : > { %v1767_v36 = vmul.f32 %v5464_v2, %v7740_v53  ;;  %v1699_v60 = vadd.f32 %v7742_v41, %v1695_v31  ;;  %v1723_v4 = vadd.f32 %v1721_v57, %v1717_v33  ;;  %v1745_v63 = vadd.f32 %v1743_v24, %v1739_v17  ;;  %s7759_s29 = sld [smem:[#allocation220_spill]] }
 0x37b   : > { %v7745_v39 = vstv %s7729_s0  ;;  %v1651_v20 = vadd.f32 %v1649_v18, %v1623_v1  ;;  %v7747_v23 = vstv %s7731_s24  ;;  %v7748_v7 = vstv %s7733_s7  ;;  %s7761_s2 = sld [smem:[#allocation77_spill]] }
 0x37c   : > { %v1771_v10 = vmul.f32 %v5484_v29, %v7745_v39  ;;  %v1677_v55 = vmul.f32 %v7747_v23, %v1674_v16  ;;  %v1777_v12 = vmul.f32 %v5506_v27, %v7748_v7  ;;  %v7750_v37 = vstv %s7734_s15  ;;  %s7763_s12 = sld [smem:[#allocation63_spill]] }
 0x37d   : > { %v1795_v9 = vmul.f32 %v5464_v2, %v7750_v37  ;;  %v1702_v11 = vmax.f32 %v1699_v60, 0.0  ;;  %v7753_v51 = vstv %s7736_s3  ;;  %v1751_v13 = vadd.f32 %v1749_v56, %v1745_v63  ;;  %s7764_s13 = sld [smem:[#allocation36_spill]] }
 0x37e   : > { %v1727_v48 = vadd.f32 %v7753_v51, %v1723_v4  ;;  %v1773_v47 = vadd.f32 %v1771_v10, %v1767_v36  ;;  %v1679_v49 = vadd.f32 %v1677_v55, %v1651_v20  ;;  %v7756_v38 = vstv %s7739_s22  ;;  %s7766_s18 = sld [smem:[#allocation221_spill]] }
 0x37f   : > { %v1799_v58 = vmul.f32 %v5484_v29, %v7756_v38  ;;  %v7757_v14 = vstv %s7741_s30  ;;  %v7758_v3 = vstv %s7743_s9  ;;  %v7760_v5 = vstv %s7744_s11  ;;  %s7768_s8 = sld [smem:[#allocation69_spill]] }
 0x380   : > { %v1805_v59 = vmul.f32 %v5506_v27, %v7757_v14  ;;  %v1823_v40 = vmul.f32 %v5464_v2, %v7758_v3  ;;  %v1705_v22 = vmul.f32 %v7760_v5, %v1702_v11  ;;  %v1730_v62 = vmax.f32 %v1727_v48, 0.0  ;;  %s7771_s26 = sld [smem:[#allocation222_spill]] }
 0x381   : > { %v7762_v30 = vstv %s7746_s4  ;;  %v1779_v28 = vadd.f32 %v1777_v12, %v1773_v47  ;;  %v1801_v6 = vadd.f32 %v1799_v58, %v1795_v9  ;;  %v7765_v50 = vstv %s7749_s10  ;;  %s7773_s23 = sld [smem:[#allocation68_spill]] }
 0x382   : > { %v1755_v32 = vadd.f32 %v7762_v30, %v1751_v13  ;;  %v1827_v44 = vmul.f32 %v5484_v29, %v7765_v50  ;;  %v7767_v52 = vstv %s7751_s14  ;;  %v7769_v34 = vstv %s7752_s27  ;;  %s7774_s25 = sld [smem:[#allocation75_spill]] }
 0x383   : > { %v1833_v19 = vmul.f32 %v5506_v27, %v7767_v52  ;;  %v1851_v0 = vmul.f32 %v5464_v2, %v7769_v34  ;;  %v1707_v57 = vadd.f32 %v1705_v22, %v1679_v49  ;;  %v7770_v21 = vstv %s7754_s28  ;;  %s7775_s21 = sld [smem:[#allocation223_spill]]  ;;  %v6225_v1 = vld [vmem:[%s7764_s13 + $0x8] sm:$0xff]  ;;  %v6246_v48 = vld [vmem:[%s7764_s13 + $0x18] sm:$0xff] }
 0x384   : > { %v1733_v17 = vmul.f32 %v7770_v21, %v1730_v62  ;;  %v1758_v43 = vmax.f32 %v1755_v32, 0.0  ;;  %v7772_v35 = vstv %s7755_s16  ;;  %v1807_v42 = vadd.f32 %v1805_v59, %v1801_v6  ;;  %s7778_s17 = sld [smem:[#allocation219_spill]]  ;;  %v6265_v6 = vld [vmem:[%s7764_s13 + $0x28] sm:$0xff] }
 0x385   : > { %v1783_v15 = vadd.f32 %v7772_v35, %v1779_v28  ;;  %v1829_v26 = vadd.f32 %v1827_v44, %v1823_v40  ;;  %v7776_v45 = vstv %s7759_s29  ;;  %v7777_v33 = vstv %s7761_s2  ;;  %s7781_s20 = sld [smem:[#allocation82_spill]] }
 0x386   : > { %v1855_v31 = vmul.f32 %v5484_v29, %v7776_v45  ;;  %v1861_v46 = vmul.f32 %v5506_v27, %v7777_v33  ;;  %v1735_v2 = vadd.f32 %v1733_v17, %v1707_v57  ;;  %v7779_v24 = vstv %s7763_s12  ;;  %s7783_s5 = sld [smem:[#allocation80_spill]] }
 0x387   : > { %v1761_v61 = vmul.f32 %v7779_v24, %v1758_v43  ;;  %v1786_v56 = vmax.f32 %v1783_v15, 0.0  ;;  %v7780_v54 = vstv %s7766_s18  ;;  %v7782_v16 = vstv %s7768_s8  ;;  %s7784_s0 = sld [smem:[#allocation86_spill]] }
 0x388   : > { %v1879_v18 = vmul.f32 %v6225_v1, %v7780_v54  ;;  %v1811_v53 = vadd.f32 %v7782_v16, %v1807_v42  ;;  %v1835_v36 = vadd.f32 %v1833_v19, %v1829_v26  ;;  %s7785_s24 = sld [smem:[#allocation71_spill]]  ;;  %v1857_v41 = vadd.f32 %v1855_v31, %v1851_v0 }
 0x389   : > { %v7786_v60 = vstv %s7771_s26  ;;  %s7787_s7 = sld [smem:[#allocation74_spill]]  ;;  %v1763_v63 = vadd.f32 %v1761_v61, %v1735_v2  ;;  %v7788_v39 = vstv %s7773_s23  ;;  %v7789_v20 = vstv %s7774_s25 }
 0x38a   : > { %v1883_v4 = vmul.f32 %v5484_v29, %v7786_v60  ;;  %v1789_v10 = vmul.f32 %v7788_v39, %v1786_v56  ;;  %v1889_v23 = vmul.f32 %v5506_v27, %v7789_v20  ;;  %v7790_v55 = vstv %s7775_s21  ;;  %s7791_s15 = sld [smem:[#allocation225_spill]] }
 0x38b   : > { %v1907_v7 = vmul.f32 %v6225_v1, %v7790_v55  ;;  %v1814_v12 = vmax.f32 %v1811_v53, 0.0  ;;  %v7792_v37 = vstv %s7778_s17  ;;  %s7793_s3 = sld [smem:[#allocation87_spill]]  ;;  %v1863_v11 = vadd.f32 %v1861_v46, %v1857_v41 }
 0x38c   : > { %v1839_v9 = vadd.f32 %v7792_v37, %v1835_v36  ;;  %s7794_s22 = sld [smem:[#allocation226_spill]]  ;;  %v1885_v51 = vadd.f32 %v1883_v4, %v1879_v18  ;;  %v1791_v29 = vadd.f32 %v1789_v10, %v1763_v63  ;;  %v7796_v13 = vstv %s7781_s20 }
 0x38d   : > { %s7795_s30 = sld [smem:[#allocation73_spill]]  ;;  %v1911_v47 = vmul.f32 %v6246_v48, %v7796_v13  ;;  %v7798_v49 = vstv %s7783_s5  ;;  %v7799_v58 = vstv %s7784_s0 }
 0x38e   : > { %s7797_s9 = sld [smem:[#allocation79_spill]]  ;;  %v1917_v38 = vmul.f32 %v5506_v27, %v7798_v49  ;;  %v1935_v14 = vmul.f32 %v6225_v1, %v7799_v58  ;;  %v7800_v59 = vstv %s7785_s24  ;;  %v1842_v40 = vmax.f32 %v1839_v9, 0.0 }
 0x38f   : > { %s7801_s11 = sld [smem:[#allocation227_spill]]  ;;  %v1817_v3 = vmul.f32 %v7800_v59, %v1814_v12  ;;  %v7803_v5 = vstv %s7787_s7  ;;  %v1891_v62 = vadd.f32 %v1889_v23, %v1885_v51  ;;  %v1913_v30 = vadd.f32 %v1911_v47, %v1907_v7 }
 0x390   : > { %s7802_s4 = sld [smem:[#allocation85_spill]]  ;;  %v1867_v22 = vadd.f32 %v7803_v5, %v1863_v11  ;;  %v7805_v32 = vstv %s7791_s15 }
 0x391   : > { %s7804_s10 = sld [smem:[#allocation78_spill]]  ;;  %v1939_v28 = vmul.f32 %v6246_v48, %v7805_v32  ;;  %v7808_v27 = vstv %s7793_s3  ;;  %v1819_v19 = vadd.f32 %v1817_v3, %v1791_v29  ;;  %v1919_v43 = vadd.f32 %v1917_v38, %v1913_v30 }
 0x392   : > { %s7806_s14 = sld [smem:[#allocation228_spill]]  ;;  %v1945_v50 = vmul.f32 %v6265_v6, %v7808_v27  ;;  %v7809_v44 = vstv %s7794_s22  ;;  %v1870_v57 = vmax.f32 %v1867_v22, 0.0 }
 0x393   : > { %s7807_s27 = sld [smem:[#allocation224_spill]]  ;;  %v1963_v52 = vmul.f32 %v6225_v1, %v7809_v44  ;;  %v7811_v34 = vstv %s7795_s30  ;;  %v1941_v35 = vadd.f32 %v1939_v28, %v1935_v14 }
 0x394   : > { %s7810_s28 = sld [smem:[#allocation92_spill]]  ;;  %v1845_v0 = vmul.f32 %v7811_v34, %v1842_v40  ;;  %v7813_v21 = vstv %s7797_s9 }
 0x395   : > { %s7812_s16 = sld [smem:[#allocation81_spill]]  ;;  %v1895_v17 = vadd.f32 %v7813_v21, %v1891_v62  ;;  %v7816_v15 = vstv %s7801_s11  ;;  %v1947_v18 = vadd.f32 %v1945_v50, %v1941_v35 }
 0x396   : > { %s7814_s29 = sld [smem:[#allocation229_spill]]  ;;  %v1967_v42 = vmul.f32 %v6246_v48, %v7816_v15  ;;  %v7818_v26 = vstv %s7802_s4  ;;  %v1847_v31 = vadd.f32 %v1845_v0, %v1819_v19 }
 0x397   : > { %s7815_s2 = sld [smem:[#allocation96_spill]]  ;;  %v1973_v45 = vmul.f32 %v6265_v6, %v7818_v26  ;;  %v7819_v33 = vstv %s7804_s10  ;;  %v1898_v2 = vmax.f32 %v1895_v17, 0.0 }
 0x398   : > { %s7817_s12 = sld [smem:[#allocation84_spill]]  ;;  %v1873_v46 = vmul.f32 %v7819_v33, %v1870_v57  ;;  %v7821_v24 = vstv %s7806_s14  ;;  %v1969_v16 = vadd.f32 %v1967_v42, %v1963_v52 }
 0x399   : > { %s7820_s13 = sld [smem:[#allocation230_spill]]  ;;  %v1991_v61 = vmul.f32 %v6225_v1, %v7821_v24  ;;  %v7823_v56 = vstv %s7807_s27 }
 0x39a   : > { %s7822_s18 = sld [smem:[#allocation97_spill]]  ;;  %v1923_v54 = vadd.f32 %v7823_v56, %v1919_v43  ;;  %v7826_v53 = vstv %s7810_s28  ;;  %v1875_v41 = vadd.f32 %v1873_v46, %v1847_v31  ;;  %v1975_v12 = vadd.f32 %v1973_v45, %v1969_v16 }
 0x39b   : > { %s7824_s8 = sld [smem:[#allocation231_spill]]  ;;  %v1995_v36 = vmul.f32 %v6246_v48, %v7826_v53  ;;  %v7828_v60 = vstv %s7812_s16 }
 0x39c   : > { %s7825_s26 = sld [smem:[#allocation83_spill]]  ;;  %v1901_v4 = vmul.f32 %v7828_v60, %v1898_v2  ;;  %v7829_v63 = vstv %s7814_s29  ;;  %v1926_v23 = vmax.f32 %v1923_v54, 0.0 }
 0x39d   : > { %s7827_s23 = sld [smem:[#allocation89_spill]]  ;;  %v2001_v39 = vmul.f32 %v6265_v6, %v7829_v63  ;;  %v7831_v10 = vstv %s7815_s2  ;;  %v1997_v37 = vadd.f32 %v1995_v36, %v1991_v61 }
 0x39e   : > { %s7830_s25 = sld [smem:[#allocation232_spill]]  ;;  %v2019_v20 = vmul.f32 %v6225_v1, %v7831_v10  ;;  %v7834_v55 = vstv %s7817_s12  ;;  %v1903_v9 = vadd.f32 %v1901_v4, %v1875_v41 }
 0x39f   : > { %s7832_s21 = sld [smem:[#allocation95_spill]]  ;;  %v1951_v7 = vadd.f32 %v7834_v55, %v1947_v18  ;;  %v7837_v11 = vstv %s7820_s13  ;;  %v2003_v40 = vadd.f32 %v2001_v39, %v1997_v37 }
 0x3a0   : > { %s7833_s17 = sld [smem:[#allocation233_spill]]  ;;  %v2023_v51 = vmul.f32 %v6246_v48, %v7837_v11  ;;  %v7838_v29 = vstv %s7822_s18 }
 0x3a1   : > { %s7835_s20 = sld [smem:[#allocation88_spill]]  ;;  %v2029_v13 = vmul.f32 %v6265_v6, %v7838_v29  ;;  %v7839_v47 = vstv %s7824_s8  ;;  %v1954_v14 = vmax.f32 %v1951_v7, 0.0 }
 0x3a2   : > { %s7836_s5 = sld [smem:[#allocation90_spill]]  ;;  %v2047_v49 = vmul.f32 %v6225_v1, %v7839_v47  ;;  %v7841_v38 = vstv %s7825_s26  ;;  %v2025_v5 = vadd.f32 %v2023_v51, %v2019_v20  ;;  %v7878_v51 = vstv %s5685_s19 }
 0x3a3   : > { %s7840_s0 = sld [smem:[#allocation102_spill]]  ;;  %v1929_v58 = vmul.f32 %v7841_v38, %v1926_v23  ;;  %v7843_v59 = vstv %s7827_s23  ;;  %v2159_v29 = vmul.f32 %v6225_v1, %v7878_v51 }
 0x3a4   : > { %s7842_s24 = sld [smem:[#allocation100_spill]]  ;;  %v1979_v3 = vadd.f32 %v7843_v59, %v1975_v12  ;;  %v7846_v22 = vstv %s7830_s25  ;;  %v2031_v57 = vadd.f32 %v2029_v13, %v2025_v5 }
 0x3a5   : > { %s7844_s7 = sld [smem:[#allocation91_spill]]  ;;  %v2051_v62 = vmul.f32 %v6246_v48, %v7846_v22  ;;  %v7848_v30 = vstv %s7832_s21  ;;  %v1931_v50 = vadd.f32 %v1929_v58, %v1903_v9 }
 0x3a6   : > { %s7845_s15 = sld [smem:[#allocation106_spill]]  ;;  %v2057_v32 = vmul.f32 %v6265_v6, %v7848_v30  ;;  %v7849_v28 = vstv %s7833_s17  ;;  %v1982_v19 = vmax.f32 %v1979_v3, 0.0 }
 0x3a7   : > { %s7847_s3 = sld [smem:[#allocation94_spill]]  ;;  %v2075_v27 = vmul.f32 %v6225_v1, %v7849_v28  ;;  %v7851_v44 = vstv %s7835_s20  ;;  %v2053_v21 = vadd.f32 %v2051_v62, %v2047_v49 }
 0x3a8   : > { %s7850_s22 = sld [smem:[#allocation235_spill]]  ;;  %v1957_v52 = vmul.f32 %v7851_v44, %v1954_v14  ;;  %v7853_v34 = vstv %s7836_s5 }
 0x3a9   : > { %s7852_s30 = sld [smem:[#allocation93_spill]]  ;;  %v2007_v0 = vadd.f32 %v7853_v34, %v2003_v40  ;;  %v7856_v17 = vstv %s7840_s0  ;;  %v2059_v61 = vadd.f32 %v2057_v32, %v2053_v21 }
 0x3aa   : > { %s7854_s9 = sld [smem:[#allocation107_spill]]  ;;  %v2079_v43 = vmul.f32 %v6246_v48, %v7856_v17  ;;  %v7858_v35 = vstv %s7842_s24  ;;  %v1959_v42 = vadd.f32 %v1957_v52, %v1931_v50 }
 0x3ab   : > { %s7855_s11 = sld [smem:[#allocation236_spill]]  ;;  %v2085_v15 = vmul.f32 %v6265_v6, %v7858_v35  ;;  %v7859_v26 = vstv %s7844_s7  ;;  %v2010_v31 = vmax.f32 %v2007_v0, 0.0 }
 0x3ac   : > { %s7857_s4 = sld [smem:[#allocation99_spill]]  ;;  %v1985_v45 = vmul.f32 %v7859_v26, %v1982_v19  ;;  %v7861_v33 = vstv %s7845_s15  ;;  %v2081_v56 = vadd.f32 %v2079_v43, %v2075_v27 }
 0x3ad   : > { %s7860_s10 = sld [smem:[#allocation237_spill]]  ;;  %v2103_v46 = vmul.f32 %v6225_v1, %v7861_v33  ;;  %v7863_v2 = vstv %s7847_s3 }
 0x3ae   : > { %s7862_s14 = sld [smem:[#allocation105_spill]]  ;;  %v2035_v24 = vadd.f32 %v7863_v2, %v2031_v57  ;;  %v7865_v54 = vstv %s7850_s22  ;;  %v1987_v16 = vadd.f32 %v1985_v45, %v1959_v42  ;;  %v2087_v23 = vadd.f32 %v2085_v15, %v2081_v56 }
 0x3af   : > { %s7864_s27 = sld [smem:[#allocation98_spill]]  ;;  %v2107_v18 = vmul.f32 %v6246_v48, %v7865_v54  ;;  %v7867_v53 = vstv %s7852_s30 }
 0x3b0   : > { %s7866_s28 = sld [smem:[#allocation234_spill]]  ;;  %v2013_v36 = vmul.f32 %v7867_v53, %v2010_v31  ;;  %v7868_v41 = vstv %s7854_s9  ;;  %v2038_v39 = vmax.f32 %v2035_v24, 0.0 }
 0x3b1   : > { %s7869_s16 = sld [smem:[#allocation111_spill]]  ;;  %v2113_v60 = vmul.f32 %v6265_v6, %v7868_v41  ;;  %v7870_v4 = vstv %s7855_s11  ;;  %v2109_v55 = vadd.f32 %v2107_v18, %v2103_v46 }
 0x3b2   : > { %s7871_s29 = sld [smem:[#allocation112_spill]]  ;;  %v2131_v63 = vmul.f32 %v6225_v1, %v7870_v4  ;;  %v7873_v10 = vstv %s7857_s4  ;;  %v2015_v7 = vadd.f32 %v2013_v36, %v1987_v16 }
 0x3b3   : > { %s7872_s2 = sld [smem:[#allocation239_spill]]  ;;  %v2063_v20 = vadd.f32 %v7873_v10, %v2059_v61  ;;  %v7876_v12 = vstv %s7860_s10  ;;  %v2115_v14 = vadd.f32 %v2113_v60, %v2109_v55 }
 0x3b4   : > { %s7874_s12 = sld [smem:[#allocation101_spill]]  ;;  %v2135_v37 = vmul.f32 %v6246_v48, %v7876_v12  ;;  %v7877_v9 = vstv %s7862_s14 }
 0x3b5   : > { %s7875_s13 = sld [smem:[#allocation104_spill]]  ;;  %v2141_v11 = vmul.f32 %v6265_v6, %v7877_v9  ;;  %v7880_v13 = vstv %s7864_s27  ;;  %v2066_v49 = vmax.f32 %v2063_v20, 0.0  ;;  %v7913_v9 = vstv %s5782_s1 }
 0x3b6   : > { %s7879_s18 = sld [smem:[#allocation240_spill]]  ;;  %v2041_v47 = vmul.f32 %v7880_v13, %v2038_v39  ;;  %v7882_v38 = vstv %s7866_s28  ;;  %v2137_v59 = vadd.f32 %v2135_v37, %v2131_v63 }
 0x3b7   : > { %s7881_s8 = sld [smem:[#allocation116_spill]]  ;;  %v2091_v58 = vadd.f32 %v7882_v38, %v2087_v23  ;;  %v7885_v3 = vstv %s7869_s16  ;;  %v7915_v38 = vstv %s5790_s6 }
 0x3b8   : > { %s7883_s26 = sld [smem:[#allocation103_spill]]  ;;  %v2163_v40 = vmul.f32 %v6246_v48, %v7885_v3  ;;  %v7887_v5 = vstv %s7871_s29  ;;  %v2043_v32 = vadd.f32 %v2041_v47, %v2015_v7  ;;  %v2143_v19 = vadd.f32 %v2141_v11, %v2137_v59 }
 0x3b9   : > { %s7884_s23 = sld [smem:[#allocation118_spill]]  ;;  %v2169_v22 = vmul.f32 %v6265_v6, %v7887_v5  ;;  %v7888_v62 = vstv %s7872_s2  ;;  %v2094_v50 = vmax.f32 %v2091_v58, 0.0 }
 0x3ba   : > { %s7886_s25 = sld [smem:[#allocation238_spill]]  ;;  %v2187_v30 = vmul.f32 %v6225_v1, %v7888_v62  ;;  %v7890_v28 = vstv %s7874_s12  ;;  %v2165_v34 = vadd.f32 %v2163_v40, %v2159_v29  ;;  %v2296_v62 = vpop.f32.mrf.mxu0 }
 0x3bb   : > { %s7889_s19 = sld [smem:[#allocation241_spill]]  ;;  %v2069_v27 = vmul.f32 %v7890_v28, %v2066_v49  ;;  %v7892_v44 = vstv %s7875_s13  ;;  %v6433_v28 = vld [vmem:[#allocation14] sm:$0xff] }
 0x3bc   : > { %s7891_s21 = sld [smem:[#allocation108_spill]]  ;;  %v2119_v52 = vadd.f32 %v7892_v44, %v2115_v14  ;;  %v7895_v0 = vstv %s7879_s18  ;;  %v2171_v46 = vadd.f32 %v2169_v22, %v2165_v34  ;;  %v6437_v44 = vld [vmem:[#allocation14 + $0x8] sm:$0xff]  ;;  %v3216_v34 = vld [vmem:[#allocation15] sm:$0xff] }
 0x3bd   : > { %s7893_s17 = sld [smem:[#allocation115_spill]]  ;;  %v2191_v57 = vmul.f32 %v6246_v48, %v7895_v0  ;;  %v7896_v21 = vstv %s7881_s8  ;;  %v2071_v43 = vadd.f32 %v2069_v27, %v2043_v32 }
 0x3be   : > { %s7894_s20 = sld [smem:[#allocation110_spill]]  ;;  %v2197_v17 = vmul.f32 %v6265_v6, %v7896_v21  ;;  %v7897_v35 = vstv %s7883_s26  ;;  %v2122_v42 = vmax.f32 %v2119_v52, 0.0 }
 0x3bf   : > { %s7898_s5 = sld [smem:[#allocation109_spill]]  ;;  %v2097_v15 = vmul.f32 %v7897_v35, %v2094_v50  ;;  %v7899_v26 = vstv %s7884_s23  ;;  %v2193_v2 = vadd.f32 %v2191_v57, %v2187_v30  ;;  %v2314_v30 = vpop.f32.mrf.mxu3 }
 0x3c0   : > { %s7900_s0 = sld [smem:[#allocation114_spill]]  ;;  %v2215_v45 = vmul.f32 %v6225_v1, %v7899_v26  ;;  %v7901_v31 = vstv %s7886_s25 }
 0x3c1   : > { %v2147_v33 = vadd.f32 %v7901_v31, %v2143_v19  ;;  %s7902_s24 = sld [smem:[#allocation113_spill]]  ;;  %v7903_v24 = vstv %s7889_s19  ;;  %v2099_v56 = vadd.f32 %v2097_v15, %v2071_v43  ;;  %v2199_v1 = vadd.f32 %v2197_v17, %v2193_v2  ;;  %v3215_v19 = vld [vmem:[#allocation15 + $0x8] sm:$0xff] }
 0x3c2   : > { %v2219_v61 = vmul.f32 %v6246_v48, %v7903_v24  ;;  %v7904_v54 = vstv %s7891_s21  ;;  %s7906_s7 = sld [smem:[#allocation117_spill]] }
 0x3c3   : > { %v2125_v18 = vmul.f32 %v7904_v54, %v2122_v42  ;;  %v7905_v16 = vstv %s7893_s17  ;;  %v2150_v36 = vmax.f32 %v2147_v33, 0.0  ;;  %s7911_s3 = sld [smem:[#allocation37_spill]] }
 0x3c4   : > { %v2225_v53 = vmul.f32 %v6265_v6, %v7905_v16  ;;  %v7907_v41 = vstv %s7894_s20  ;;  %v2221_v4 = vadd.f32 %v2219_v61, %v2215_v45  ;;  %s7916_s6 = sld [smem:[#allocation30_spill]] }
 0x3c5   : > { %v2175_v60 = vadd.f32 %v7907_v41, %v2171_v46  ;;  %v2127_v63 = vadd.f32 %v2125_v18, %v2099_v56  ;;  %v7909_v39 = vstv %s7898_s5  ;;  %s7917_s1 = sld [smem:[#allocation35_spill]] }
 0x3c6   : > { %v2153_v10 = vmul.f32 %v7909_v39, %v2150_v36  ;;  %v7910_v48 = vstv %s7900_s0  ;;  %v2227_v55 = vadd.f32 %v2225_v53, %v2221_v4  ;;  %s7918_s11 = sld [smem:[#allocation249_spill]] }
 0x3c7   : > { %v2178_v20 = vmax.f32 %v2175_v60, 0.0  ;;  %v2203_v23 = vadd.f32 %v7910_v48, %v2199_v1  ;;  %v7912_v12 = vstv %s7902_s24 }
 0x3c8   : > { %v2155_v7 = vadd.f32 %v2153_v10, %v2127_v63  ;;  %v2231_v11 = vadd.f32 %v7913_v9, %v2227_v55  ;;  %v7914_v29 = vstv %s7906_s7 }
 0x3c9   : > { %v2181_v37 = vmul.f32 %v7912_v12, %v2178_v20  ;;  %v2206_v6 = vmax.f32 %v2203_v23, 0.0  ;;  %v2244_v40 = vld [vmem:[%s7911_s3] sm:$0xff]  ;;  %v2245_v5 = vld [vmem:[%s7911_s3 + $0x8] sm:$0xff] }
 0x3ca   : > { %v2234_v47 = vmax.f32 %v2231_v11, 0.0  ;;  %v2250_v22 = vmul.f32 %v2244_v40, %v5892_v8  ;;  %s3087_s22 = sshll.u32 %s7916_s6, 4 }
 0x3cb   : > { %v2183_v51 = vadd.f32 %v2181_v37, %v2155_v7  ;;  %v2209_v13 = vmul.f32 %v7914_v29, %v2206_v6  ;;  %s7919_s10 = sshll.u32 %s7917_s1, 4  ;;  %s2556_s29 = scalar_lea.sflag [#allocation5], %s7917_s1 }
 0x3cc   : > { %v2237_v58 = vmul.f32 %v7915_v38, %v2234_v47  ;;  %s2567_s4 = scalar_lea.hbm %s7918_s11, %s3087_s22  ;;  %s441_s27 = scalar_lea.vmem [#allocation17], %s7919_s10 }
 0x3cd   : > { %v2211_v49 = vadd.f32 %v2209_v13, %v2183_v51  ;;  %s2568_s28 = sshll.u32 %s441_s27, 4  ;;  %s2570_s16 = sshll.u32 %s2567_s4, 4  ;;  %s2569_s28 = int_to_ptr.vmem [resolvable:$true] %s2568_s28  ;;  %s2571_s16 = int_to_ptr.hbm [resolvable:$true] %s2570_s16 }
 0x3ce   : > { %s3396_s2 = sshra.s32 %s2571_s16, 4  ;;  %s3402_s8 = scalar_lea.hbm %s7918_s11, 32  ;;  %s3397_s2 = int_to_ptr.hbm [resolvable:$true] %s3396_s2 }
 0x3cf   : > { %v2239_v14 = vadd.f32 %v2237_v58, %v2211_v49  ;;  %s3398_s12 = scalar_lea.hbm %s3397_s2, 16  ;;  %p3403_p8 = scmp.lt.s32.totalorder %s3397_s2, %s7918_s11 }
 0x3d0   : > { %p3399_p1 = scmp.ne.s32.totalorder %s3397_s2, %s3398_s12  ;;  %p3404_p9 = scmp.lt.s32.totalorder %s3402_s8, %s3398_s12 }
 0x3d1   : > { %v6418_v59 = vadd.f32 %v2241_v25, %v2239_v14 }
 0x3d2   : > { %p3400_p3 = pnand %p3399_p1, %p3623_p0  ;;  %p3405_p5 = por %p3404_p9, %p3403_p8 }
 0x3d3   : > { %3058 = vmatmul.msk.f32.gmra.mxu0 %vm2254_vm0, %v6418_v59  ;;  %v2253_v3 = vmul.f32 %v6418_v59, %v6418_v59  ;;  %v2251_v25 = vmul.f32 %v2245_v5, %v6418_v59 }
 0x3d4   : > { %p3401_p13 = pneg %p3400_p3 }
 0x3d5   : > { %3064 = vmatmul.msk.f32.gmra.mxu3 %vm2254_vm0, %v2253_v3 }
 0x3d6   : > { %p3406_p7 = pnand %p3405_p5, %p3401_p13 }
 0x3db   : > { %3059 = vmatmul.msk.f32.gmra.mxu0 %vm2254_vm0, %v2244_v40 }
 0x3e3   : > { %3060 = vmatmul.msk.f32.gmra.mxu0 %vm2254_vm0, %v2245_v5 }
 0x3eb   : > { %3061 = vmatmul.msk.f32.gmra.mxu0 %vm2254_vm0, %v2250_v22 }
 0x3f3   : > { %3062 = vmatmul.msk.f32.gmra.mxu0 %vm2254_vm0, %v2251_v25 }
 0x450   : > { %v2299_v32 = vpop.f32.mrf.mxu0 }
 0x451   : > { %2340 = vmatpush.msra.mxu1 %v2299_v32 }
 0x453   : > { %2341 = vmatpush.msra.mxu1 %v2296_v62 }
 0x454   : > { %3065 = vmatmul.msk.f32.vlgmr.msra.gmra.mxu1 %vm2254_vm0, %v6433_v28 }
 0x458   : > { %v2302_v27 = vpop.f32.mrf.mxu0  ;;  %v2317_v50 = vpop.f32.mrf.mxu3 }
 0x459   : > { %2409 = vmatpush.msrb.mxu1 %v2317_v50 }
 0x45b   : > { %2410 = vmatpush.msrb.mxu1 %v2314_v30 }
 0x45c   : > { %3066 = vmatmul.msk.f32.gmra.mxu1 %vm2254_vm0, %v6437_v44 }
 0x460   : > { %v2305_v52 = vpop.f32.mrf.mxu0 }
 0x461   : > { %2363 = vmatpush.msra.mxu2 %v2305_v52 }
 0x463   : > { %2364 = vmatpush.msra.mxu2 %v2302_v27 }
 0x464   : > { %3067 = vmatmul.msk.f32.vlgmr.msra.gmra.mxu2 %vm2254_vm0, %v6433_v28  ;;  %3071 = vmatmul.msk.f32.vlgmr.msrb.gmra.mxu1 %vm2254_vm0, %v6433_v28 }
 0x465   : > { %2488 = vmatpush.msrb.mxu2 %v3215_v19 }
 0x467   : > { %2489 = vmatpush.msrb.mxu2 %v3216_v34 }
 0x468   : > { %v2308_v0 = vpop.f32.mrf.mxu0 }
 0x46c   : > { %3068 = vmatmul.msk.f32.gmra.mxu2 %vm2254_vm0, %v6437_v44  ;;  %3072 = vmatmul.msk.f32.gmra.mxu1 %vm2254_vm0, %v6437_v44 }
 0x470   : > { %v2311_v57 = vpop.f32.mrf.mxu0 }
 0x471   : > { %2386 = vmatpush.msrb.mxu3 %v2311_v57 }
 0x473   : > { %2387 = vmatpush.msrb.mxu3 %v2308_v0 }
 0x474   : > { %3069 = vmatmul.msk.f32.vlgmr.msrb.gmra.mxu3 %vm2254_vm0, %v6433_v28 }
 0x47c   : > { %3070 = vmatmul.msk.f32.gmra.mxu3 %vm2254_vm0, %v6437_v44 }
 0x4d1   : > { %v2343_v21 = vpop.f32.mrf.mxu1 }
 0x4d2   : > { %v2422_v43 = vmul.f32 %v2343_v21, %v2343_v21 }
 0x4d9   : > { %v2346_v17 = vpop.f32.mrf.mxu1 }
 0x4da   : > { %v2423_v26 = vmul.f32 %v2346_v17, %v2346_v17 }
 0x4e1   : > { %v2412_v35 = vpop.f32.mrf.mxu1 }
 0x4e2   : > { %v2424_v15 = vsub.f32 %v2412_v35, %v2422_v43 }
 0x4e4   : > { %v2426_v42 = vadd.f32 0.01, %v2424_v15 }
 0x4e6   : > { %3199 = vrcp.f32 %v2426_v42  ;;  %v2439_v18 = vand.u32 2147483648, %v2426_v42  ;;  %vm2433_vm2 = vweird.f32 %v2426_v42  ;;  %v2437_v53 = vand.u32 2147483647, %v2426_v42 }
 0x4e7   : > { %v2366_v61 = vpop.f32.mrf.mxu2 }
 0x4e8   : > { %v2418_v41 = vmul.f32 %v2366_v61, %v2343_v21  ;;  %v2440_v63 = vor.u32 1.1754944e-38, %v2439_v18  ;;  %vm2438_vm4 = vcmp.eq.f32.partialorder %v2437_v53, 8.507059e+37 }
 0x4e9   : > { %v2415_v45 = vpop.f32.mrf.mxu1 }
 0x4ea   : > { %v2425_v31 = vsub.f32 %v2415_v45, %v2423_v26 }
 0x4ec   : > { %v3200_v33 = vpop.eup %3199  ;;  %v2427_v46 = vadd.f32 0.01, %v2425_v31 }
 0x4ed   : > { %v2429_v2 = vmul.f32 %v3200_v33, %v2426_v42  ;;  %vm2434_vm1 = vweird.f32 %v3200_v33 }
 0x4ee   : > { %3201 = vrcp.f32 %v2427_v46  ;;  %vm2435_vm3 = vmor %vm2433_vm2, %vm2434_vm1  ;;  %v2453_v7 = vand.u32 2147483648, %v2427_v46  ;;  %vm2447_vm6 = vweird.f32 %v2427_v46  ;;  %v2451_v12 = vand.u32 2147483647, %v2427_v46 }
 0x4ef   : > { %v2430_v24 = vsub.f32 1.0, %v2429_v2  ;;  %v2369_v23 = vpop.f32.mrf.mxu2 }
 0x4f0   : > { %v2419_v37 = vmul.f32 %v2369_v23, %v2346_v17  ;;  %v2454_v11 = vor.u32 1.1754944e-38, %v2453_v7  ;;  %vm2452_vm8 = vcmp.eq.f32.partialorder %v2451_v12, 8.507059e+37 }
 0x4f1   : > { %v2431_v56 = vmul.f32 %v3200_v33, %v2430_v24 }
 0x4f3   : > { %v2432_v54 = vadd.f32 %v3200_v33, %v2431_v56 }
 0x4f4   : > { %v3202_v16 = vpop.eup %3201 }
 0x4f5   : > { %v2443_v36 = vmul.f32 %v3202_v16, %v2427_v46  ;;  %v2436_v60 = vsel %vm2435_vm3, %v3200_v33, %v2432_v54  ;;  %vm2448_vm5 = vweird.f32 %v3202_v16 }
 0x4f6   : > { %v2441_v10 = vsel %vm2438_vm4, %v2440_v63, %v2436_v60  ;;  %vm2449_vm7 = vmor %vm2447_vm6, %vm2448_vm5 }
 0x4f7   : > { %v2444_v1 = vsub.f32 1.0, %v2443_v36  ;;  %v2389_v4 = vpop.f32.mrf.mxu3 }
 0x4f8   : > { %v2420_v39 = vsub.f32 %v2389_v4, %v2418_v41 }
 0x4f9   : > { %v2445_v20 = vmul.f32 %v3202_v16, %v2444_v1 }
 0x4fa   : > { %v2456_v48 = vmul.f32 %v2441_v10, %v2420_v39 }
 0x4fb   : > { %v2446_v55 = vadd.f32 %v3202_v16, %v2445_v20 }
 0x4fc   : > { %3073 = vmatmul.msk.f32.vlgmr.msrb.gmra.mxu2 %vm2254_vm0, %v2456_v48  ;;  %v2458_v47 = vmul.f32 %v2456_v48, %v2343_v21 }
 0x4fd   : > { %v2450_v6 = vsel %vm2449_vm7, %v3202_v16, %v2446_v55 }
 0x4fe   : > { %v2455_v29 = vsel %vm2452_vm8, %v2454_v11, %v2450_v6  ;;  %v2460_v49 = vsub.f32 %v2366_v61, %v2458_v47 }
 0x4ff   : > { %v2392_v9 = vpop.f32.mrf.mxu3 }
 0x500   : > { %v2421_v51 = vsub.f32 %v2392_v9, %v2419_v37 }
 0x502   : > { %v2457_v13 = vmul.f32 %v2455_v29, %v2421_v51 }
 0x504   : > { %3074 = vmatmul.msk.f32.gmra.mxu2 %vm2254_vm0, %v2457_v13  ;;  %v2459_v38 = vmul.f32 %v2457_v13, %v2346_v17 }
 0x506   : > { %v2461_v58 = vsub.f32 %v2369_v23, %v2459_v38 }
 0x50c   : > { %3075 = vmatmul.msk.f32.gmra.mxu2 %vm2254_vm0, %v2460_v49 }
 0x514   : > { %3076 = vmatmul.msk.f32.gmra.mxu2 %vm2254_vm0, %v2461_v58 }
 0x57f   : > { %v2491_v14 = vpop.f32.mrf.mxu2 }
 0x587   : > { %v2494_v3 = vpop.f32.mrf.mxu2 }
 0x588   : > { %2517 = vmatpush.msra.mxu3 %v2494_v3 }
 0x58a   : > { %2518 = vmatpush.msra.mxu3 %v2491_v14 }
 0x58b   : > { %3077 = vmatmul.msk.f32.vlgmr.msra.gmra.mxu3 %vm2254_vm0, %v6433_v28 }
 0x58f   : > { %v2497_v40 = vpop.f32.mrf.mxu2 }
 0x593   : > { %3078 = vmatmul.msk.f32.gmra.mxu3 %vm2254_vm0, %v6437_v44 }
 0x597   : > { %v2500_v5 = vpop.f32.mrf.mxu2 }
 0x598   : > { %2540 = vmatpush.msra.mxu1 %v2500_v5 }
 0x59a   : > { %2541 = vmatpush.msra.mxu1 %v2497_v40 }
 0x59b   : > { %3079 = vmatmul.msk.f32.vlgmr.msra.gmra.mxu1 %vm2254_vm0, %v6433_v28 }
 0x5a3   : > { %3080 = vmatmul.msk.f32.gmra.mxu1 %vm2254_vm0, %v6437_v44 }
 0x60e   : > { %v2520_v22 = vpop.f32.mrf.mxu3 }
 0x60f   : > { %v2549_v25 = vmul.f32 %v2520_v22, %v5892_v8 }
 0x616   : > { %v2523_v32 = vpop.f32.mrf.mxu3 }
 0x617   : > { %v2550_v28 = vmul.f32 %v2523_v32, %v6418_v59 }
 0x618   : > { %v2543_v62 = vpop.f32.mrf.mxu1 }
 0x619   : > { %v2551_v30 = vadd.f32 %v2549_v25, %v2543_v62 }
 0x61b   : > { %2553 = vst.msk [vmem:[%s441_s27] sm:$0xff] %vm2254_vm0, %v2551_v30 }
 0x620   : > { %v2546_v8 = vpop.f32.mrf.mxu1 }
 0x621   : > { %v2552_v27 = vadd.f32 %v2550_v28, %v2546_v8 }
 0x623   : > { %2554 = vst.msk [vmem:[%s441_s27 + $0x8] sm:$0xff] %vm2254_vm0, %v2552_v27 }
 0x624   : > { %3409 = shalt.err (!%p3406_p7)
}
 0x625   : > { %s3481_s25 = smov 128   ;;  %s3482_s19 = smov 8  }
 0x626   : > { %3117 = dma.vmem_to_hbm [thread:$0]  (%p3623_p0), %s2569_s28, 256, %s2571_s16, %s2556_s29, %s3481_s25, %s3481_s25, %s3482_s19  }
 0x627 PF: > { %s7921_s21 = sld [smem:[#allocation26_spill]] }
 0x628   : > { %s7923_s20 = sld [smem:[#allocation29_spill]] }
 0x62d   : > { %s2585_s5 = sand.u32 1, %s7921_s21  }
 0x62e   : > { %p7924_p10 = scmp.ge.s32.totalorder %s7923_s20, 2  ;;  %s2586_s0 = scalar_lea.sflag [#allocation5], %s2585_s5 }
 0x630   : > { %p3143_p11 = pnand %p7924_p10, %p3631_p6 }
 0x632   : > { %p3144_p12 = pneg %p3143_p11 }
 0x634   : > { %3455 = dma.done.wait (%p3144_p12), %s2586_s0, 256  }
 0x635   : > { %3457 = vsyncadd (%p3144_p12), %s2586_s0, 4294967040  ;;  %s7925_s10 = sld [smem:[#allocation31_spill]] }
 0x636   : > { %s7926_s29 = sld [smem:[#allocation27_spill]] }
 0x637   : > { %s7927_s30 = sld [smem:[#allocation28_spill]] }
 0x638   : > { %s7928_s9 = sld [smem:[#allocation32_spill]] }
 0x63b   : > { %p29_p2 = scmp.ge.s32.totalorder %s7925_s10, 4  }
 0x63d   :  { %31 = sbr.rel (!%p29_p2) target bundleno = 21 (0x15), region = 132 }
 0x642   :  { %2592 = vsyncpa [#allocation4], 1 }
 0x643   :  { %2594 = vsyncpa [#allocation4 + $0x1], 1 }
 0x644   :  { %2595 = vsyncpa [#allocation13], 1 }
 0x645   :  { %2597 = vsyncpa [#allocation13 + $0x1], 1 }
 0x646   :  { %2598 = vsyncpa [#allocation16], 1 }
 0x647   :  { %2599 = vsyncpa [#allocation5], 1 }
 0x648   :  { %2601 = vsyncpa [#allocation5 + $0x1], 1 }
 0x649   :  { %2602 = vsyncpa [#allocation6], 1 }
 0x64a   :  { %2604 = vsyncpa [#allocation6 + $0x1], 1 }
 0x64b   :  { %2605 = vsyncpa [#allocation7], 1 }
 0x64c   :  { %2607 = vsyncpa [#allocation7 + $0x1], 1 }
 0x64d   :  { %2608 = vsyncpa [#allocation10], 1 }

</bundles_post_ra>
